<compile_context>
chip_gen: v6e
topology: v6e:2x2x1
jax: 0.10.0
libtpu: 0.0.40
codegen_flags: <defaults>
</compile_context>

<pallas_src>
import jax
import jax.numpy as jnp
from jax.experimental import pallas as pl
from jax.experimental.pallas import tpu as pltpu

_CP = 128  # lane-dense padded channel count


# ----------------------------- kernel helpers ----------------------------- #

def _pad_hw(x):
    """Zero-pad an (H, W, C) value by 1 on each spatial side (concat only)."""
    H, W, C = x.shape
    zc = jnp.zeros((H, 1, C), x.dtype)
    x = jnp.concatenate([zc, x, zc], axis=1)            # (H, W+2, C)
    zr = jnp.zeros((1, W + 2, C), x.dtype)
    return jnp.concatenate([zr, x, zr], axis=0)         # (H+2, W+2, C)


def _conv3x3_stage(x, w_ref, b_ref, stride):
    """3x3 conv (pad=1, given stride) + bias + ReLU on a VMEM-resident activation.

    x:     (H, W, Cin)  f32 value
    w_ref: (9*Cin, _CP) bf16 ref, taps flattened in (ky, kx, cin) order
    b_ref: (1, _CP)     f32 ref
    returns (out3d: (Ho, Wo, _CP) f32, out2d: (Ho*Wo, _CP) f32)
    """
    H, W, Cin = x.shape
    Ho, Wo = H // stride, W // stride
    xp = _pad_hw(x)                                     # (H+2, W+2, Cin)
    Wp = W + 2

    if stride == 1:
        def window(ky, kx):
            return xp[ky:ky + Ho, kx:kx + Wo, :]
    else:  # stride == 2 (H, W even)
        assert H % 2 == 0 and W % 2 == 0
        half = Wp // 2
        # De-interleave columns once per stage; afterwards every tap is a
        # contiguous static slice (row phase handled by a leading-dim reshape).
        even_cols = jnp.concatenate(
            [xp[:, 2 * j:2 * j + 1, :] for j in range(half)], axis=1)
        odd_cols = jnp.concatenate(
            [xp[:, 2 * j + 1:2 * j + 2, :] for j in range(half)], axis=1)

        def window(ky, kx):
            src = even_cols if kx % 2 == 0 else odd_cols
            c0 = kx // 2
            blk = src[:, c0:c0 + Wo, :]                 # cols kx, kx+2, ...
            blk = blk[ky:ky + 2 * Ho, :, :]             # rows ky .. ky+2*Ho-1
            return blk.reshape(Ho, 2, Wo, Cin)[:, 0]    # rows ky, ky+2, ...

    # Fused im2col: (Ho*Wo, 9*Cin) patch block built in VMEM/registers only.
    patches = jnp.concatenate(
        [window(ky, kx) for ky in range(3) for kx in range(3)], axis=-1)
    patches = patches.reshape(Ho * Wo, 9 * Cin).astype(jnp.bfloat16)

    acc = jnp.dot(patches, w_ref[...], preferred_element_type=jnp.float32)
    acc = jnp.maximum(acc + b_ref[...], 0.0)            # bias + ReLU in f32
    return acc.reshape(Ho, Wo, _CP), acc


def _backbone_kernel(x_ref, w0_ref, b0_ref, w1_ref, b1_ref, w2_ref, b2_ref,
                     w3_ref, b3_ref, o1_ref, o2_ref, o3_ref):
    x = x_ref[0]                                          # (H, W, Cin) f32
    a, _ = _conv3x3_stage(x, w0_ref, b0_ref, stride=2)    # stem
    a, a2d = _conv3x3_stage(a, w1_ref, b1_ref, stride=1)  # layer1
    o1_ref[0] = a2d
    a, a2d = _conv3x3_stage(a, w2_ref, b2_ref, stride=2)  # layer2
    o2_ref[0] = a2d
    _, a2d = _conv3x3_stage(a, w3_ref, b3_ref, stride=2)  # layer3
    o3_ref[0] = a2d


def _fused_backbone(x_nhwc, packed):
    """Run stem + layer1..3 in a single pallas_call; returns padded flat features."""
    N, H, W, Cin = x_nhwc.shape
    H1, W1 = H // 2, W // 2          # layer1 (stem /2, layer1 stride 1)
    H2, W2 = H1 // 2, W1 // 2        # layer2
    H3, W3 = H2 // 2, W2 // 2        # layer3
    (w0, b0), (w1, b1), (w2, b2), (w3, b3) = packed

    def _full(a):                    # whole (small) array resident per grid step
        return pl.BlockSpec(a.shape, lambda b: (0, 0))

    grid_spec = pltpu.PrefetchScalarGridSpec(
        num_scalar_prefetch=0,
        grid=(N,),
        in_specs=[
            pl.BlockSpec((1, H, W, Cin), lambda b: (b, 0, 0, 0)),
            _full(w0), _full(b0), _full(w1), _full(b1),
            _full(w2), _full(b2), _full(w3), _full(b3),
        ],
        out_specs=(
            pl.BlockSpec((1, H1 * W1, _CP), lambda b: (b, 0, 0)),
            pl.BlockSpec((1, H2 * W2, _CP), lambda b: (b, 0, 0)),
            pl.BlockSpec((1, H3 * W3, _CP), lambda b: (b, 0, 0)),
        ),
    )
    return pl.pallas_call(
        _backbone_kernel,
        out_shape=(
            jax.ShapeDtypeStruct((N, H1 * W1, _CP), jnp.float32),
            jax.ShapeDtypeStruct((N, H2 * W2, _CP), jnp.float32),
            jax.ShapeDtypeStruct((N, H3 * W3, _CP), jnp.float32),
        ),
        grid_spec=grid_spec,
        compiler_params=pltpu.CompilerParams(
            dimension_semantics=("parallel",)),
    )(x_nhwc, w0, b0, w1, b1, w2, b2, w3, b3)


# ------------------------------ module glue -------------------------------- #

def init_backbone_params(key, cin=4, widths=(8, 16, 32, 64)):
    """Deterministic synthetic backbone weights (stem + layer1..layer3), f32."""
    params = {}
    names = ["stem", "layer1", "layer2", "layer3"]
    c_prev = cin
    for name, c in zip(names, widths):
        key, kw = jax.random.split(key)
        fan_in = 3 * 3 * c_prev
        w = jax.random.normal(kw, (3, 3, c_prev, c), jnp.float32) / jnp.sqrt(
            jnp.float32(fan_in))
        b = jnp.zeros((c,), jnp.float32)
        params[name] = (w, b)
        c_prev = c
    return params


class BackboneBase:
    """Pallas re-implementation of BackboneBase.

    - requires_grad freezing in the PyTorch __init__ is training-only (no effect
      on the forward pass); it is a no-op here.
    - IntermediateLayerGetter semantics are reproduced: stages run in order,
      layer4 is never executed, outputs are collected under
      {'layer3':'0','layer2':'1','layer1':'2'} (or {'layer3':'0'}) and forward
      returns [xs['0'], xs['1'], ...] i.e. [layer3, layer2, layer1].
    """

    _STRIDES = {"stem": 2, "layer1": 1, "layer2": 2, "layer3": 2}
    _ORDER = ["stem", "layer1", "layer2", "layer3"]

    def __init__(self, params, return_interm_layers=True):
        self.params = params
        if return_interm_layers:
            self.return_layers = {"layer3": "0", "layer2": "1", "layer1": "2"}
            self.num_channels = [params["layer3"][0].shape[-1],
                                 params["layer2"][0].shape[-1],
                                 params["layer1"][0].shape[-1]]
        else:
            self.return_layers = {"layer3": "0"}
            self.num_channels = [params["layer3"][0].shape[-1]]

        # Pack weights once for the fused kernel: zero-pad output channels to
        # _CP (=128) lanes, flatten taps to (9*Cin_p, _CP), store weights in bf16.
        self._packed = []
        self._true_cout = {}
        cin_p = params["stem"][0].shape[2]        # stem consumes the true Cin
        for name in self._ORDER:
            w, b = params[name]
            kh, kw_, cin_t, cout_t = w.shape
            wp = jnp.zeros((kh, kw_, cin_p, _CP), jnp.float32)
            wp = wp.at[:, :, :cin_t, :cout_t].set(w)
            bp = jnp.zeros((1, _CP), jnp.float32).at[0, :cout_t].set(b)
            self._packed.append(
                (wp.reshape(kh * kw_ * cin_p, _CP).astype(jnp.bfloat16), bp))
            self._true_cout[name] = cout_t
            cin_p = _CP                            # later stages see padded lanes
        self._packed = tuple(self._packed)
        self._fwd = jax.jit(self._forward_impl)

    def _forward_impl(self, tensor_list):
        x = jnp.transpose(tensor_list, (0, 2, 3, 1))      # NCHW -> NHWC
        N, H, W, _ = x.shape
        o1, o2, o3 = _fused_backbone(x, self._packed)

        def unpack(flat, h, w, name):
            c = self._true_cout[name]
            f = flat[:, :, :c].reshape(N, h, w, c)
            return jnp.transpose(f, (0, 3, 1, 2))          # NHWC -> NCHW

        feats = {
            "layer1": unpack(o1, H // 2, W // 2, "layer1"),
            "layer2": unpack(o2, H // 4, W // 4, "layer2"),
            "layer3": unpack(o3, H // 8, W // 8, "layer3"),
        }
        xs = {self.return_layers[k]: v for k, v in feats.items()
              if k in self.return_layers}
        return [xs[str(i)] for i in range(len(xs))]

    def forward(self, tensor_list):
        return self._fwd(tensor_list)


def _reference_forward(x_nchw, params):
    """Pure-JAX (XLA conv) reference using the same bf16-rounded weights."""
    x = jnp.transpose(x_nchw, (0, 2, 3, 1))
    feats = {}
    for name in BackboneBase._ORDER:
        w, b = params[name]
        w = w.astype(jnp.bfloat16).astype(jnp.float32)
        s = BackboneBase._STRIDES[name]
        x = jax.lax.conv_general_dilated(
            x, w, window_strides=(s, s), padding=((1, 1), (1, 1)),
            dimension_numbers=("NHWC", "HWIO", "NHWC"))
        x = jnp.maximum(x + b, 0.0)
        feats[name] = x
    return [jnp.transpose(feats[n], (0, 3, 1, 2))
            for n in ("layer3", "layer2", "layer1")]


if __name__ == "__main__":
    key = jax.random.PRNGKey(0)
    kx, kp = jax.random.split(key)
    x = jax.random.normal(kx, (2, 4, 16, 16), jnp.float32)   # NCHW input

    params = init_backbone_params(kp, cin=4, widths=(8, 16, 32, 64))
    model = BackboneBase(params, return_interm_layers=True)

    outs = jax.block_until_ready(model.forward(x))

    # list order = [layer3, layer2, layer1]; channels 1024:512:256 scaled -> 64:32:16
    assert outs[0].shape == (2, 64, 2, 2)
    assert outs[1].shape == (2, 32, 4, 4)
    assert outs[2].shape == (2, 16, 8, 8)
    assert all(o.dtype == jnp.float32 for o in outs)

    # numerical check vs. a pure-JAX conv reference (bf16 MXU inputs in the kernel)
    refs = _reference_forward(x, params)
    max_err = max(float(jnp.max(jnp.abs(a - b))) for a, b in zip(outs, refs))
    assert max_err < 1e-1, f"max abs error vs reference: {max_err}"

    print("KERNEL_OK")
</pallas_src>

<mosaic_0001>
module attributes {stable_mosaic.version = 11 : i64} {
  func.func @_backbone_kernel(%arg0: i32, %arg1: memref<1x16x16x4xf32, #tpu.memory_space<vmem>>, %arg2: memref<36x128xbf16, #tpu.memory_space<vmem>>, %arg3: memref<1x128xf32, #tpu.memory_space<vmem>>, %arg4: memref<1152x128xbf16, #tpu.memory_space<vmem>>, %arg5: memref<1x128xf32, #tpu.memory_space<vmem>>, %arg6: memref<1152x128xbf16, #tpu.memory_space<vmem>>, %arg7: memref<1x128xf32, #tpu.memory_space<vmem>>, %arg8: memref<1152x128xbf16, #tpu.memory_space<vmem>>, %arg9: memref<1x128xf32, #tpu.memory_space<vmem>>, %arg10: memref<1x64x128xf32, #tpu.memory_space<vmem>>, %arg11: memref<1x16x128xf32, #tpu.memory_space<vmem>>, %arg12: memref<1x4x128xf32, #tpu.memory_space<vmem>>) attributes {dimension_semantics = [#tpu.dimension_semantics<parallel>], iteration_bounds = array<i64: 2>, scalar_prefetch = 0 : i64, scratch_operands = 0 : i64, tpu.core_type = #tpu.core_type<tc>, window_params = [{transform_indices = @transform_0, window_bounds = array<i64: 1, 16, 16, 4>}, {pipeline_mode = #tpu.pipeline_mode<synchronous>, transform_indices = @transform_1, window_bounds = array<i64: 36, 128>}, {pipeline_mode = #tpu.pipeline_mode<synchronous>, transform_indices = @transform_2, window_bounds = array<i64: 1, 128>}, {pipeline_mode = #tpu.pipeline_mode<synchronous>, transform_indices = @transform_3, window_bounds = array<i64: 1152, 128>}, {pipeline_mode = #tpu.pipeline_mode<synchronous>, transform_indices = @transform_4, window_bounds = array<i64: 1, 128>}, {pipeline_mode = #tpu.pipeline_mode<synchronous>, transform_indices = @transform_5, window_bounds = array<i64: 1152, 128>}, {pipeline_mode = #tpu.pipeline_mode<synchronous>, transform_indices = @transform_6, window_bounds = array<i64: 1, 128>}, {pipeline_mode = #tpu.pipeline_mode<synchronous>, transform_indices = @transform_7, window_bounds = array<i64: 1152, 128>}, {pipeline_mode = #tpu.pipeline_mode<synchronous>, transform_indices = @transform_8, window_bounds = array<i64: 1, 128>}, {transform_indices = @transform_9, window_bounds = array<i64: 1, 64, 128>}, {transform_indices = @transform_10, window_bounds = array<i64: 1, 16, 128>}, {transform_indices = @transform_11, window_bounds = array<i64: 1, 4, 128>}]} {
    %c0 = arith.constant 0 : index
    %c0_0 = arith.constant 0 : index
    %c0_1 = arith.constant 0 : index
    %c0_2 = arith.constant 0 : index
    %0 = vector.load %arg1[%c0, %c0_0, %c0_1, %c0_2] : memref<1x16x16x4xf32, #tpu.memory_space<vmem>>, vector<1x16x16x4xf32>
    %1 = vector.shape_cast %0 : vector<1x16x16x4xf32> to vector<16x16x4xf32>
    %cst = arith.constant 0.000000e+00 : f32
    %2 = vector.broadcast %cst : f32 to vector<16x1x4xf32>
    %3 = tpu.concatenate %2, %1, %2 in 1 : vector<16x1x4xf32>, vector<16x16x4xf32>, vector<16x1x4xf32> -> vector<16x18x4xf32>
    %cst_3 = arith.constant 0.000000e+00 : f32
    %4 = vector.broadcast %cst_3 : f32 to vector<1x18x4xf32>
    %5 = tpu.concatenate %4, %3, %4 in 0 : vector<1x18x4xf32>, vector<16x18x4xf32>, vector<1x18x4xf32> -> vector<18x18x4xf32>
    %6 = vector.extract_strided_slice %5 {offsets = [0, 0, 0], sizes = [18, 1, 4], strides = [1, 1, 1]} : vector<18x18x4xf32> to vector<18x1x4xf32>
    %7 = vector.extract_strided_slice %5 {offsets = [0, 2, 0], sizes = [18, 1, 4], strides = [1, 1, 1]} : vector<18x18x4xf32> to vector<18x1x4xf32>
    %8 = vector.extract_strided_slice %5 {offsets = [0, 4, 0], sizes = [18, 1, 4], strides = [1, 1, 1]} : vector<18x18x4xf32> to vector<18x1x4xf32>
    %9 = vector.extract_strided_slice %5 {offsets = [0, 6, 0], sizes = [18, 1, 4], strides = [1, 1, 1]} : vector<18x18x4xf32> to vector<18x1x4xf32>
    %10 = vector.extract_strided_slice %5 {offsets = [0, 8, 0], sizes = [18, 1, 4], strides = [1, 1, 1]} : vector<18x18x4xf32> to vector<18x1x4xf32>
    %11 = vector.extract_strided_slice %5 {offsets = [0, 10, 0], sizes = [18, 1, 4], strides = [1, 1, 1]} : vector<18x18x4xf32> to vector<18x1x4xf32>
    %12 = vector.extract_strided_slice %5 {offsets = [0, 12, 0], sizes = [18, 1, 4], strides = [1, 1, 1]} : vector<18x18x4xf32> to vector<18x1x4xf32>
    %13 = vector.extract_strided_slice %5 {offsets = [0, 14, 0], sizes = [18, 1, 4], strides = [1, 1, 1]} : vector<18x18x4xf32> to vector<18x1x4xf32>
    %14 = vector.extract_strided_slice %5 {offsets = [0, 16, 0], sizes = [18, 1, 4], strides = [1, 1, 1]} : vector<18x18x4xf32> to vector<18x1x4xf32>
    %15 = tpu.concatenate %6, %7, %8, %9, %10, %11, %12, %13, %14 in 1 : vector<18x1x4xf32>, vector<18x1x4xf32>, vector<18x1x4xf32>, vector<18x1x4xf32>, vector<18x1x4xf32>, vector<18x1x4xf32>, vector<18x1x4xf32>, vector<18x1x4xf32>, vector<18x1x4xf32> -> vector<18x9x4xf32>
    %16 = vector.extract_strided_slice %5 {offsets = [0, 1, 0], sizes = [18, 1, 4], strides = [1, 1, 1]} : vector<18x18x4xf32> to vector<18x1x4xf32>
    %17 = vector.extract_strided_slice %5 {offsets = [0, 3, 0], sizes = [18, 1, 4], strides = [1, 1, 1]} : vector<18x18x4xf32> to vector<18x1x4xf32>
    %18 = vector.extract_strided_slice %5 {offsets = [0, 5, 0], sizes = [18, 1, 4], strides = [1, 1, 1]} : vector<18x18x4xf32> to vector<18x1x4xf32>
    %19 = vector.extract_strided_slice %5 {offsets = [0, 7, 0], sizes = [18, 1, 4], strides = [1, 1, 1]} : vector<18x18x4xf32> to vector<18x1x4xf32>
    %20 = vector.extract_strided_slice %5 {offsets = [0, 9, 0], sizes = [18, 1, 4], strides = [1, 1, 1]} : vector<18x18x4xf32> to vector<18x1x4xf32>
    %21 = vector.extract_strided_slice %5 {offsets = [0, 11, 0], sizes = [18, 1, 4], strides = [1, 1, 1]} : vector<18x18x4xf32> to vector<18x1x4xf32>
    %22 = vector.extract_strided_slice %5 {offsets = [0, 13, 0], sizes = [18, 1, 4], strides = [1, 1, 1]} : vector<18x18x4xf32> to vector<18x1x4xf32>
    %23 = vector.extract_strided_slice %5 {offsets = [0, 15, 0], sizes = [18, 1, 4], strides = [1, 1, 1]} : vector<18x18x4xf32> to vector<18x1x4xf32>
    %24 = vector.extract_strided_slice %5 {offsets = [0, 17, 0], sizes = [18, 1, 4], strides = [1, 1, 1]} : vector<18x18x4xf32> to vector<18x1x4xf32>
    %25 = tpu.concatenate %16, %17, %18, %19, %20, %21, %22, %23, %24 in 1 : vector<18x1x4xf32>, vector<18x1x4xf32>, vector<18x1x4xf32>, vector<18x1x4xf32>, vector<18x1x4xf32>, vector<18x1x4xf32>, vector<18x1x4xf32>, vector<18x1x4xf32>, vector<18x1x4xf32> -> vector<18x9x4xf32>
    %26 = vector.extract_strided_slice %15 {offsets = [0, 0, 0], sizes = [18, 8, 4], strides = [1, 1, 1]} : vector<18x9x4xf32> to vector<18x8x4xf32>
    %27 = vector.extract_strided_slice %26 {offsets = [0, 0, 0], sizes = [16, 8, 4], strides = [1, 1, 1]} : vector<18x8x4xf32> to vector<16x8x4xf32>
    %28 = vector.shape_cast %27 : vector<16x8x4xf32> to vector<8x2x8x4xf32>
    %29 = vector.extract_strided_slice %28 {offsets = [0, 0, 0, 0], sizes = [8, 1, 8, 4], strides = [1, 1, 1, 1]} : vector<8x2x8x4xf32> to vector<8x1x8x4xf32>
    %30 = vector.shape_cast %29 : vector<8x1x8x4xf32> to vector<8x8x4xf32>
    %31 = vector.extract_strided_slice %25 {offsets = [0, 0, 0], sizes = [18, 8, 4], strides = [1, 1, 1]} : vector<18x9x4xf32> to vector<18x8x4xf32>
    %32 = vector.extract_strided_slice %31 {offsets = [0, 0, 0], sizes = [16, 8, 4], strides = [1, 1, 1]} : vector<18x8x4xf32> to vector<16x8x4xf32>
    %33 = vector.shape_cast %32 : vector<16x8x4xf32> to vector<8x2x8x4xf32>
    %34 = vector.extract_strided_slice %33 {offsets = [0, 0, 0, 0], sizes = [8, 1, 8, 4], strides = [1, 1, 1, 1]} : vector<8x2x8x4xf32> to vector<8x1x8x4xf32>
    %35 = vector.shape_cast %34 : vector<8x1x8x4xf32> to vector<8x8x4xf32>
    %36 = vector.extract_strided_slice %15 {offsets = [0, 1, 0], sizes = [18, 8, 4], strides = [1, 1, 1]} : vector<18x9x4xf32> to vector<18x8x4xf32>
    %37 = vector.extract_strided_slice %36 {offsets = [0, 0, 0], sizes = [16, 8, 4], strides = [1, 1, 1]} : vector<18x8x4xf32> to vector<16x8x4xf32>
    %38 = vector.shape_cast %37 : vector<16x8x4xf32> to vector<8x2x8x4xf32>
    %39 = vector.extract_strided_slice %38 {offsets = [0, 0, 0, 0], sizes = [8, 1, 8, 4], strides = [1, 1, 1, 1]} : vector<8x2x8x4xf32> to vector<8x1x8x4xf32>
    %40 = vector.shape_cast %39 : vector<8x1x8x4xf32> to vector<8x8x4xf32>
    %41 = vector.extract_strided_slice %15 {offsets = [0, 0, 0], sizes = [18, 8, 4], strides = [1, 1, 1]} : vector<18x9x4xf32> to vector<18x8x4xf32>
    %42 = vector.extract_strided_slice %41 {offsets = [1, 0, 0], sizes = [16, 8, 4], strides = [1, 1, 1]} : vector<18x8x4xf32> to vector<16x8x4xf32>
    %43 = vector.shape_cast %42 : vector<16x8x4xf32> to vector<8x2x8x4xf32>
    %44 = vector.extract_strided_slice %43 {offsets = [0, 0, 0, 0], sizes = [8, 1, 8, 4], strides = [1, 1, 1, 1]} : vector<8x2x8x4xf32> to vector<8x1x8x4xf32>
    %45 = vector.shape_cast %44 : vector<8x1x8x4xf32> to vector<8x8x4xf32>
    %46 = vector.extract_strided_slice %25 {offsets = [0, 0, 0], sizes = [18, 8, 4], strides = [1, 1, 1]} : vector<18x9x4xf32> to vector<18x8x4xf32>
    %47 = vector.extract_strided_slice %46 {offsets = [1, 0, 0], sizes = [16, 8, 4], strides = [1, 1, 1]} : vector<18x8x4xf32> to vector<16x8x4xf32>
    %48 = vector.shape_cast %47 : vector<16x8x4xf32> to vector<8x2x8x4xf32>
    %49 = vector.extract_strided_slice %48 {offsets = [0, 0, 0, 0], sizes = [8, 1, 8, 4], strides = [1, 1, 1, 1]} : vector<8x2x8x4xf32> to vector<8x1x8x4xf32>
    %50 = vector.shape_cast %49 : vector<8x1x8x4xf32> to vector<8x8x4xf32>
    %51 = vector.extract_strided_slice %15 {offsets = [0, 1, 0], sizes = [18, 8, 4], strides = [1, 1, 1]} : vector<18x9x4xf32> to vector<18x8x4xf32>
    %52 = vector.extract_strided_slice %51 {offsets = [1, 0, 0], sizes = [16, 8, 4], strides = [1, 1, 1]} : vector<18x8x4xf32> to vector<16x8x4xf32>
    %53 = vector.shape_cast %52 : vector<16x8x4xf32> to vector<8x2x8x4xf32>
    %54 = vector.extract_strided_slice %53 {offsets = [0, 0, 0, 0], sizes = [8, 1, 8, 4], strides = [1, 1, 1, 1]} : vector<8x2x8x4xf32> to vector<8x1x8x4xf32>
    %55 = vector.shape_cast %54 : vector<8x1x8x4xf32> to vector<8x8x4xf32>
    %56 = vector.extract_strided_slice %15 {offsets = [0, 0, 0], sizes = [18, 8, 4], strides = [1, 1, 1]} : vector<18x9x4xf32> to vector<18x8x4xf32>
    %57 = vector.extract_strided_slice %56 {offsets = [2, 0, 0], sizes = [16, 8, 4], strides = [1, 1, 1]} : vector<18x8x4xf32> to vector<16x8x4xf32>
    %58 = vector.shape_cast %57 : vector<16x8x4xf32> to vector<8x2x8x4xf32>
    %59 = vector.extract_strided_slice %58 {offsets = [0, 0, 0, 0], sizes = [8, 1, 8, 4], strides = [1, 1, 1, 1]} : vector<8x2x8x4xf32> to vector<8x1x8x4xf32>
    %60 = vector.shape_cast %59 : vector<8x1x8x4xf32> to vector<8x8x4xf32>
    %61 = vector.extract_strided_slice %25 {offsets = [0, 0, 0], sizes = [18, 8, 4], strides = [1, 1, 1]} : vector<18x9x4xf32> to vector<18x8x4xf32>
    %62 = vector.extract_strided_slice %61 {offsets = [2, 0, 0], sizes = [16, 8, 4], strides = [1, 1, 1]} : vector<18x8x4xf32> to vector<16x8x4xf32>
    %63 = vector.shape_cast %62 : vector<16x8x4xf32> to vector<8x2x8x4xf32>
    %64 = vector.extract_strided_slice %63 {offsets = [0, 0, 0, 0], sizes = [8, 1, 8, 4], strides = [1, 1, 1, 1]} : vector<8x2x8x4xf32> to vector<8x1x8x4xf32>
    %65 = vector.shape_cast %64 : vector<8x1x8x4xf32> to vector<8x8x4xf32>
    %66 = vector.extract_strided_slice %15 {offsets = [0, 1, 0], sizes = [18, 8, 4], strides = [1, 1, 1]} : vector<18x9x4xf32> to vector<18x8x4xf32>
    %67 = vector.extract_strided_slice %66 {offsets = [2, 0, 0], sizes = [16, 8, 4], strides = [1, 1, 1]} : vector<18x8x4xf32> to vector<16x8x4xf32>
    %68 = vector.shape_cast %67 : vector<16x8x4xf32> to vector<8x2x8x4xf32>
    %69 = vector.extract_strided_slice %68 {offsets = [0, 0, 0, 0], sizes = [8, 1, 8, 4], strides = [1, 1, 1, 1]} : vector<8x2x8x4xf32> to vector<8x1x8x4xf32>
    %70 = vector.shape_cast %69 : vector<8x1x8x4xf32> to vector<8x8x4xf32>
    %71 = tpu.concatenate %30, %35, %40, %45, %50, %55, %60, %65, %70 in 2 : vector<8x8x4xf32>, vector<8x8x4xf32>, vector<8x8x4xf32>, vector<8x8x4xf32>, vector<8x8x4xf32>, vector<8x8x4xf32>, vector<8x8x4xf32>, vector<8x8x4xf32>, vector<8x8x4xf32> -> vector<8x8x36xf32>
    %72 = vector.shape_cast %71 : vector<8x8x36xf32> to vector<64x36xf32>
    %73 = arith.truncf %72 : vector<64x36xf32> to vector<64x36xbf16>
    %c0_4 = arith.constant 0 : index
    %c0_5 = arith.constant 0 : index
    %74 = vector.load %arg2[%c0_4, %c0_5] : memref<36x128xbf16, #tpu.memory_space<vmem>>, vector<36x128xbf16>
    %cst_6 = arith.constant dense<0.000000e+00> : vector<64x128xf32>
    %75 = tpu.matmul %73, %74, %cst_6 {dimension_numbers = #tpu.dot_dimension_numbers<[1], [0], [0], [1], [0, 0, 1, 1], [], []>} : vector<64x36xbf16>, vector<36x128xbf16>, vector<64x128xf32> -> vector<64x128xf32>
    %c0_7 = arith.constant 0 : index
    %c0_8 = arith.constant 0 : index
    %76 = vector.load %arg3[%c0_7, %c0_8] : memref<1x128xf32, #tpu.memory_space<vmem>>, vector<1x128xf32>
    %77 = vector.broadcast %76 : vector<1x128xf32> to vector<64x128xf32>
    %78 = arith.addf %75, %77 : vector<64x128xf32>
    %cst_9 = arith.constant 0.000000e+00 : f32
    %79 = vector.broadcast %cst_9 : f32 to vector<64x128xf32>
    %80 = arith.maximumf %78, %79 : vector<64x128xf32>
    %81 = vector.shape_cast %80 : vector<64x128xf32> to vector<8x8x128xf32>
    %cst_10 = arith.constant 0.000000e+00 : f32
    %82 = vector.broadcast %cst_10 : f32 to vector<8x1x128xf32>
    %83 = tpu.concatenate %82, %81, %82 in 1 : vector<8x1x128xf32>, vector<8x8x128xf32>, vector<8x1x128xf32> -> vector<8x10x128xf32>
    %cst_11 = arith.constant 0.000000e+00 : f32
    %84 = vector.broadcast %cst_11 : f32 to vector<1x10x128xf32>
    %85 = tpu.concatenate %84, %83, %84 in 0 : vector<1x10x128xf32>, vector<8x10x128xf32>, vector<1x10x128xf32> -> vector<10x10x128xf32>
    %86 = vector.extract_strided_slice %85 {offsets = [0, 0, 0], sizes = [8, 8, 128], strides = [1, 1, 1]} : vector<10x10x128xf32> to vector<8x8x128xf32>
    %87 = vector.extract_strided_slice %85 {offsets = [0, 1, 0], sizes = [8, 8, 128], strides = [1, 1, 1]} : vector<10x10x128xf32> to vector<8x8x128xf32>
    %88 = vector.extract_strided_slice %85 {offsets = [0, 2, 0], sizes = [8, 8, 128], strides = [1, 1, 1]} : vector<10x10x128xf32> to vector<8x8x128xf32>
    %89 = vector.extract_strided_slice %85 {offsets = [1, 0, 0], sizes = [8, 8, 128], strides = [1, 1, 1]} : vector<10x10x128xf32> to vector<8x8x128xf32>
    %90 = vector.extract_strided_slice %85 {offsets = [1, 1, 0], sizes = [8, 8, 128], strides = [1, 1, 1]} : vector<10x10x128xf32> to vector<8x8x128xf32>
    %91 = vector.extract_strided_slice %85 {offsets = [1, 2, 0], sizes = [8, 8, 128], strides = [1, 1, 1]} : vector<10x10x128xf32> to vector<8x8x128xf32>
    %92 = vector.extract_strided_slice %85 {offsets = [2, 0, 0], sizes = [8, 8, 128], strides = [1, 1, 1]} : vector<10x10x128xf32> to vector<8x8x128xf32>
    %93 = vector.extract_strided_slice %85 {offsets = [2, 1, 0], sizes = [8, 8, 128], strides = [1, 1, 1]} : vector<10x10x128xf32> to vector<8x8x128xf32>
    %94 = vector.extract_strided_slice %85 {offsets = [2, 2, 0], sizes = [8, 8, 128], strides = [1, 1, 1]} : vector<10x10x128xf32> to vector<8x8x128xf32>
    %95 = tpu.concatenate %86, %87, %88, %89, %90, %91, %92, %93, %94 in 2 : vector<8x8x128xf32>, vector<8x8x128xf32>, vector<8x8x128xf32>, vector<8x8x128xf32>, vector<8x8x128xf32>, vector<8x8x128xf32>, vector<8x8x128xf32>, vector<8x8x128xf32>, vector<8x8x128xf32> -> vector<8x8x1152xf32>
    %96 = vector.shape_cast %95 : vector<8x8x1152xf32> to vector<64x1152xf32>
    %97 = arith.truncf %96 : vector<64x1152xf32> to vector<64x1152xbf16>
    %c0_12 = arith.constant 0 : index
    %c0_13 = arith.constant 0 : index
    %98 = vector.load %arg4[%c0_12, %c0_13] : memref<1152x128xbf16, #tpu.memory_space<vmem>>, vector<1152x128xbf16>
    %cst_14 = arith.constant dense<0.000000e+00> : vector<64x128xf32>
    %99 = tpu.matmul %97, %98, %cst_14 {dimension_numbers = #tpu.dot_dimension_numbers<[1], [0], [0], [1], [0, 0, 1, 1], [], []>} : vector<64x1152xbf16>, vector<1152x128xbf16>, vector<64x128xf32> -> vector<64x128xf32>
    %c0_15 = arith.constant 0 : index
    %c0_16 = arith.constant 0 : index
    %100 = vector.load %arg5[%c0_15, %c0_16] : memref<1x128xf32, #tpu.memory_space<vmem>>, vector<1x128xf32>
    %101 = vector.broadcast %100 : vector<1x128xf32> to vector<64x128xf32>
    %102 = arith.addf %99, %101 : vector<64x128xf32>
    %cst_17 = arith.constant 0.000000e+00 : f32
    %103 = vector.broadcast %cst_17 : f32 to vector<64x128xf32>
    %104 = arith.maximumf %102, %103 : vector<64x128xf32>
    %105 = vector.shape_cast %104 : vector<64x128xf32> to vector<8x8x128xf32>
    %c0_18 = arith.constant 0 : index
    %c0_19 = arith.constant 0 : index
    %c0_20 = arith.constant 0 : index
    %106 = vector.load %arg10[%c0_18, %c0_19, %c0_20] : memref<1x64x128xf32, #tpu.memory_space<vmem>>, vector<1x64x128xf32>
    %107 = vector.shape_cast %106 : vector<1x64x128xf32> to vector<64x128xf32>
    %108 = vector.shape_cast %104 : vector<64x128xf32> to vector<1x64x128xf32>
    tpu.vector_store %arg10[%c0_18, %c0_19, %c0_20], %108 {strides = array<i32>} : memref<1x64x128xf32, #tpu.memory_space<vmem>>, vector<1x64x128xf32>,
    %cst_21 = arith.constant 0.000000e+00 : f32
    %109 = vector.broadcast %cst_21 : f32 to vector<8x1x128xf32>
    %110 = tpu.concatenate %109, %105, %109 in 1 : vector<8x1x128xf32>, vector<8x8x128xf32>, vector<8x1x128xf32> -> vector<8x10x128xf32>
    %cst_22 = arith.constant 0.000000e+00 : f32
    %111 = vector.broadcast %cst_22 : f32 to vector<1x10x128xf32>
    %112 = tpu.concatenate %111, %110, %111 in 0 : vector<1x10x128xf32>, vector<8x10x128xf32>, vector<1x10x128xf32> -> vector<10x10x128xf32>
    %113 = vector.extract_strided_slice %112 {offsets = [0, 0, 0], sizes = [10, 1, 128], strides = [1, 1, 1]} : vector<10x10x128xf32> to vector<10x1x128xf32>
    %114 = vector.extract_strided_slice %112 {offsets = [0, 2, 0], sizes = [10, 1, 128], strides = [1, 1, 1]} : vector<10x10x128xf32> to vector<10x1x128xf32>
    %115 = vector.extract_strided_slice %112 {offsets = [0, 4, 0], sizes = [10, 1, 128], strides = [1, 1, 1]} : vector<10x10x128xf32> to vector<10x1x128xf32>
    %116 = vector.extract_strided_slice %112 {offsets = [0, 6, 0], sizes = [10, 1, 128], strides = [1, 1, 1]} : vector<10x10x128xf32> to vector<10x1x128xf32>
    %117 = vector.extract_strided_slice %112 {offsets = [0, 8, 0], sizes = [10, 1, 128], strides = [1, 1, 1]} : vector<10x10x128xf32> to vector<10x1x128xf32>
    %118 = tpu.concatenate %113, %114, %115, %116, %117 in 1 : vector<10x1x128xf32>, vector<10x1x128xf32>, vector<10x1x128xf32>, vector<10x1x128xf32>, vector<10x1x128xf32> -> vector<10x5x128xf32>
    %119 = vector.extract_strided_slice %112 {offsets = [0, 1, 0], sizes = [10, 1, 128], strides = [1, 1, 1]} : vector<10x10x128xf32> to vector<10x1x128xf32>
    %120 = vector.extract_strided_slice %112 {offsets = [0, 3, 0], sizes = [10, 1, 128], strides = [1, 1, 1]} : vector<10x10x128xf32> to vector<10x1x128xf32>
    %121 = vector.extract_strided_slice %112 {offsets = [0, 5, 0], sizes = [10, 1, 128], strides = [1, 1, 1]} : vector<10x10x128xf32> to vector<10x1x128xf32>
    %122 = vector.extract_strided_slice %112 {offsets = [0, 7, 0], sizes = [10, 1, 128], strides = [1, 1, 1]} : vector<10x10x128xf32> to vector<10x1x128xf32>
    %123 = vector.extract_strided_slice %112 {offsets = [0, 9, 0], sizes = [10, 1, 128], strides = [1, 1, 1]} : vector<10x10x128xf32> to vector<10x1x128xf32>
    %124 = tpu.concatenate %119, %120, %121, %122, %123 in 1 : vector<10x1x128xf32>, vector<10x1x128xf32>, vector<10x1x128xf32>, vector<10x1x128xf32>, vector<10x1x128xf32> -> vector<10x5x128xf32>
    %125 = vector.extract_strided_slice %118 {offsets = [0, 0, 0], sizes = [10, 4, 128], strides = [1, 1, 1]} : vector<10x5x128xf32> to vector<10x4x128xf32>
    %126 = vector.extract_strided_slice %125 {offsets = [0, 0, 0], sizes = [8, 4, 128], strides = [1, 1, 1]} : vector<10x4x128xf32> to vector<8x4x128xf32>
    %127 = vector.shape_cast %126 : vector<8x4x128xf32> to vector<4x2x4x128xf32>
    %128 = vector.extract_strided_slice %127 {offsets = [0, 0, 0, 0], sizes = [4, 1, 4, 128], strides = [1, 1, 1, 1]} : vector<4x2x4x128xf32> to vector<4x1x4x128xf32>
    %129 = vector.shape_cast %128 : vector<4x1x4x128xf32> to vector<4x4x128xf32>
    %130 = vector.extract_strided_slice %124 {offsets = [0, 0, 0], sizes = [10, 4, 128], strides = [1, 1, 1]} : vector<10x5x128xf32> to vector<10x4x128xf32>
    %131 = vector.extract_strided_slice %130 {offsets = [0, 0, 0], sizes = [8, 4, 128], strides = [1, 1, 1]} : vector<10x4x128xf32> to vector<8x4x128xf32>
    %132 = vector.shape_cast %131 : vector<8x4x128xf32> to vector<4x2x4x128xf32>
    %133 = vector.extract_strided_slice %132 {offsets = [0, 0, 0, 0], sizes = [4, 1, 4, 128], strides = [1, 1, 1, 1]} : vector<4x2x4x128xf32> to vector<4x1x4x128xf32>
    %134 = vector.shape_cast %133 : vector<4x1x4x128xf32> to vector<4x4x128xf32>
    %135 = vector.extract_strided_slice %118 {offsets = [0, 1, 0], sizes = [10, 4, 128], strides = [1, 1, 1]} : vector<10x5x128xf32> to vector<10x4x128xf32>
    %136 = vector.extract_strided_slice %135 {offsets = [0, 0, 0], sizes = [8, 4, 128], strides = [1, 1, 1]} : vector<10x4x128xf32> to vector<8x4x128xf32>
    %137 = vector.shape_cast %136 : vector<8x4x128xf32> to vector<4x2x4x128xf32>
    %138 = vector.extract_strided_slice %137 {offsets = [0, 0, 0, 0], sizes = [4, 1, 4, 128], strides = [1, 1, 1, 1]} : vector<4x2x4x128xf32> to vector<4x1x4x128xf32>
    %139 = vector.shape_cast %138 : vector<4x1x4x128xf32> to vector<4x4x128xf32>
    %140 = vector.extract_strided_slice %118 {offsets = [0, 0, 0], sizes = [10, 4, 128], strides = [1, 1, 1]} : vector<10x5x128xf32> to vector<10x4x128xf32>
    %141 = vector.extract_strided_slice %140 {offsets = [1, 0, 0], sizes = [8, 4, 128], strides = [1, 1, 1]} : vector<10x4x128xf32> to vector<8x4x128xf32>
    %142 = vector.shape_cast %141 : vector<8x4x128xf32> to vector<4x2x4x128xf32>
    %143 = vector.extract_strided_slice %142 {offsets = [0, 0, 0, 0], sizes = [4, 1, 4, 128], strides = [1, 1, 1, 1]} : vector<4x2x4x128xf32> to vector<4x1x4x128xf32>
    %144 = vector.shape_cast %143 : vector<4x1x4x128xf32> to vector<4x4x128xf32>
    %145 = vector.extract_strided_slice %124 {offsets = [0, 0, 0], sizes = [10, 4, 128], strides = [1, 1, 1]} : vector<10x5x128xf32> to vector<10x4x128xf32>
    %146 = vector.extract_strided_slice %145 {offsets = [1, 0, 0], sizes = [8, 4, 128], strides = [1, 1, 1]} : vector<10x4x128xf32> to vector<8x4x128xf32>
    %147 = vector.shape_cast %146 : vector<8x4x128xf32> to vector<4x2x4x128xf32>
    %148 = vector.extract_strided_slice %147 {offsets = [0, 0, 0, 0], sizes = [4, 1, 4, 128], strides = [1, 1, 1, 1]} : vector<4x2x4x128xf32> to vector<4x1x4x128xf32>
    %149 = vector.shape_cast %148 : vector<4x1x4x128xf32> to vector<4x4x128xf32>
    %150 = vector.extract_strided_slice %118 {offsets = [0, 1, 0], sizes = [10, 4, 128], strides = [1, 1, 1]} : vector<10x5x128xf32> to vector<10x4x128xf32>
    %151 = vector.extract_strided_slice %150 {offsets = [1, 0, 0], sizes = [8, 4, 128], strides = [1, 1, 1]} : vector<10x4x128xf32> to vector<8x4x128xf32>
    %152 = vector.shape_cast %151 : vector<8x4x128xf32> to vector<4x2x4x128xf32>
    %153 = vector.extract_strided_slice %152 {offsets = [0, 0, 0, 0], sizes = [4, 1, 4, 128], strides = [1, 1, 1, 1]} : vector<4x2x4x128xf32> to vector<4x1x4x128xf32>
    %154 = vector.shape_cast %153 : vector<4x1x4x128xf32> to vector<4x4x128xf32>
    %155 = vector.extract_strided_slice %118 {offsets = [0, 0, 0], sizes = [10, 4, 128], strides = [1, 1, 1]} : vector<10x5x128xf32> to vector<10x4x128xf32>
    %156 = vector.extract_strided_slice %155 {offsets = [2, 0, 0], sizes = [8, 4, 128], strides = [1, 1, 1]} : vector<10x4x128xf32> to vector<8x4x128xf32>
    %157 = vector.shape_cast %156 : vector<8x4x128xf32> to vector<4x2x4x128xf32>
    %158 = vector.extract_strided_slice %157 {offsets = [0, 0, 0, 0], sizes = [4, 1, 4, 128], strides = [1, 1, 1, 1]} : vector<4x2x4x128xf32> to vector<4x1x4x128xf32>
    %159 = vector.shape_cast %158 : vector<4x1x4x128xf32> to vector<4x4x128xf32>
    %160 = vector.extract_strided_slice %124 {offsets = [0, 0, 0], sizes = [10, 4, 128], strides = [1, 1, 1]} : vector<10x5x128xf32> to vector<10x4x128xf32>
    %161 = vector.extract_strided_slice %160 {offsets = [2, 0, 0], sizes = [8, 4, 128], strides = [1, 1, 1]} : vector<10x4x128xf32> to vector<8x4x128xf32>
    %162 = vector.shape_cast %161 : vector<8x4x128xf32> to vector<4x2x4x128xf32>
    %163 = vector.extract_strided_slice %162 {offsets = [0, 0, 0, 0], sizes = [4, 1, 4, 128], strides = [1, 1, 1, 1]} : vector<4x2x4x128xf32> to vector<4x1x4x128xf32>
    %164 = vector.shape_cast %163 : vector<4x1x4x128xf32> to vector<4x4x128xf32>
    %165 = vector.extract_strided_slice %118 {offsets = [0, 1, 0], sizes = [10, 4, 128], strides = [1, 1, 1]} : vector<10x5x128xf32> to vector<10x4x128xf32>
    %166 = vector.extract_strided_slice %165 {offsets = [2, 0, 0], sizes = [8, 4, 128], strides = [1, 1, 1]} : vector<10x4x128xf32> to vector<8x4x128xf32>
    %167 = vector.shape_cast %166 : vector<8x4x128xf32> to vector<4x2x4x128xf32>
    %168 = vector.extract_strided_slice %167 {offsets = [0, 0, 0, 0], sizes = [4, 1, 4, 128], strides = [1, 1, 1, 1]} : vector<4x2x4x128xf32> to vector<4x1x4x128xf32>
    %169 = vector.shape_cast %168 : vector<4x1x4x128xf32> to vector<4x4x128xf32>
    %170 = tpu.concatenate %129, %134, %139, %144, %149, %154, %159, %164, %169 in 2 : vector<4x4x128xf32>, vector<4x4x128xf32>, vector<4x4x128xf32>, vector<4x4x128xf32>, vector<4x4x128xf32>, vector<4x4x128xf32>, vector<4x4x128xf32>, vector<4x4x128xf32>, vector<4x4x128xf32> -> vector<4x4x1152xf32>
    %171 = vector.shape_cast %170 : vector<4x4x1152xf32> to vector<16x1152xf32>
    %172 = arith.truncf %171 : vector<16x1152xf32> to vector<16x1152xbf16>
    %c0_23 = arith.constant 0 : index
    %c0_24 = arith.constant 0 : index
    %173 = vector.load %arg6[%c0_23, %c0_24] : memref<1152x128xbf16, #tpu.memory_space<vmem>>, vector<1152x128xbf16>
    %cst_25 = arith.constant dense<0.000000e+00> : vector<16x128xf32>
    %174 = tpu.matmul %172, %173, %cst_25 {dimension_numbers = #tpu.dot_dimension_numbers<[1], [0], [0], [1], [0, 0, 1, 1], [], []>} : vector<16x1152xbf16>, vector<1152x128xbf16>, vector<16x128xf32> -> vector<16x128xf32>
    %c0_26 = arith.constant 0 : index
    %c0_27 = arith.constant 0 : index
    %175 = vector.load %arg7[%c0_26, %c0_27] : memref<1x128xf32, #tpu.memory_space<vmem>>, vector<1x128xf32>
    %176 = vector.broadcast %175 : vector<1x128xf32> to vector<16x128xf32>
    %177 = arith.addf %174, %176 : vector<16x128xf32>
    %cst_28 = arith.constant 0.000000e+00 : f32
    %178 = vector.broadcast %cst_28 : f32 to vector<16x128xf32>
    %179 = arith.maximumf %177, %178 : vector<16x128xf32>
    %180 = vector.shape_cast %179 : vector<16x128xf32> to vector<4x4x128xf32>
    %c0_29 = arith.constant 0 : index
    %c0_30 = arith.constant 0 : index
    %c0_31 = arith.constant 0 : index
    %181 = vector.load %arg11[%c0_29, %c0_30, %c0_31] : memref<1x16x128xf32, #tpu.memory_space<vmem>>, vector<1x16x128xf32>
    %182 = vector.shape_cast %181 : vector<1x16x128xf32> to vector<16x128xf32>
    %183 = vector.shape_cast %179 : vector<16x128xf32> to vector<1x16x128xf32>
    tpu.vector_store %arg11[%c0_29, %c0_30, %c0_31], %183 {strides = array<i32>} : memref<1x16x128xf32, #tpu.memory_space<vmem>>, vector<1x16x128xf32>,
    %cst_32 = arith.constant 0.000000e+00 : f32
    %184 = vector.broadcast %cst_32 : f32 to vector<4x1x128xf32>
    %185 = tpu.concatenate %184, %180, %184 in 1 : vector<4x1x128xf32>, vector<4x4x128xf32>, vector<4x1x128xf32> -> vector<4x6x128xf32>
    %cst_33 = arith.constant 0.000000e+00 : f32
    %186 = vector.broadcast %cst_33 : f32 to vector<1x6x128xf32>
    %187 = tpu.concatenate %186, %185, %186 in 0 : vector<1x6x128xf32>, vector<4x6x128xf32>, vector<1x6x128xf32> -> vector<6x6x128xf32>
    %188 = vector.extract_strided_slice %187 {offsets = [0, 0, 0], sizes = [6, 1, 128], strides = [1, 1, 1]} : vector<6x6x128xf32> to vector<6x1x128xf32>
    %189 = vector.extract_strided_slice %187 {offsets = [0, 2, 0], sizes = [6, 1, 128], strides = [1, 1, 1]} : vector<6x6x128xf32> to vector<6x1x128xf32>
    %190 = vector.extract_strided_slice %187 {offsets = [0, 4, 0], sizes = [6, 1, 128], strides = [1, 1, 1]} : vector<6x6x128xf32> to vector<6x1x128xf32>
    %191 = tpu.concatenate %188, %189, %190 in 1 : vector<6x1x128xf32>, vector<6x1x128xf32>, vector<6x1x128xf32> -> vector<6x3x128xf32>
    %192 = vector.extract_strided_slice %187 {offsets = [0, 1, 0], sizes = [6, 1, 128], strides = [1, 1, 1]} : vector<6x6x128xf32> to vector<6x1x128xf32>
    %193 = vector.extract_strided_slice %187 {offsets = [0, 3, 0], sizes = [6, 1, 128], strides = [1, 1, 1]} : vector<6x6x128xf32> to vector<6x1x128xf32>
    %194 = vector.extract_strided_slice %187 {offsets = [0, 5, 0], sizes = [6, 1, 128], strides = [1, 1, 1]} : vector<6x6x128xf32> to vector<6x1x128xf32>
    %195 = tpu.concatenate %192, %193, %194 in 1 : vector<6x1x128xf32>, vector<6x1x128xf32>, vector<6x1x128xf32> -> vector<6x3x128xf32>
    %196 = vector.extract_strided_slice %191 {offsets = [0, 0, 0], sizes = [6, 2, 128], strides = [1, 1, 1]} : vector<6x3x128xf32> to vector<6x2x128xf32>
    %197 = vector.extract_strided_slice %196 {offsets = [0, 0, 0], sizes = [4, 2, 128], strides = [1, 1, 1]} : vector<6x2x128xf32> to vector<4x2x128xf32>
    %198 = vector.shape_cast %197 : vector<4x2x128xf32> to vector<2x2x2x128xf32>
    %199 = vector.extract_strided_slice %198 {offsets = [0, 0, 0, 0], sizes = [2, 1, 2, 128], strides = [1, 1, 1, 1]} : vector<2x2x2x128xf32> to vector<2x1x2x128xf32>
    %200 = vector.shape_cast %199 : vector<2x1x2x128xf32> to vector<2x2x128xf32>
    %201 = vector.extract_strided_slice %195 {offsets = [0, 0, 0], sizes = [6, 2, 128], strides = [1, 1, 1]} : vector<6x3x128xf32> to vector<6x2x128xf32>
    %202 = vector.extract_strided_slice %201 {offsets = [0, 0, 0], sizes = [4, 2, 128], strides = [1, 1, 1]} : vector<6x2x128xf32> to vector<4x2x128xf32>
    %203 = vector.shape_cast %202 : vector<4x2x128xf32> to vector<2x2x2x128xf32>
    %204 = vector.extract_strided_slice %203 {offsets = [0, 0, 0, 0], sizes = [2, 1, 2, 128], strides = [1, 1, 1, 1]} : vector<2x2x2x128xf32> to vector<2x1x2x128xf32>
    %205 = vector.shape_cast %204 : vector<2x1x2x128xf32> to vector<2x2x128xf32>
    %206 = vector.extract_strided_slice %191 {offsets = [0, 1, 0], sizes = [6, 2, 128], strides = [1, 1, 1]} : vector<6x3x128xf32> to vector<6x2x128xf32>
    %207 = vector.extract_strided_slice %206 {offsets = [0, 0, 0], sizes = [4, 2, 128], strides = [1, 1, 1]} : vector<6x2x128xf32> to vector<4x2x128xf32>
    %208 = vector.shape_cast %207 : vector<4x2x128xf32> to vector<2x2x2x128xf32>
    %209 = vector.extract_strided_slice %208 {offsets = [0, 0, 0, 0], sizes = [2, 1, 2, 128], strides = [1, 1, 1, 1]} : vector<2x2x2x128xf32> to vector<2x1x2x128xf32>
    %210 = vector.shape_cast %209 : vector<2x1x2x128xf32> to vector<2x2x128xf32>
    %211 = vector.extract_strided_slice %191 {offsets = [0, 0, 0], sizes = [6, 2, 128], strides = [1, 1, 1]} : vector<6x3x128xf32> to vector<6x2x128xf32>
    %212 = vector.extract_strided_slice %211 {offsets = [1, 0, 0], sizes = [4, 2, 128], strides = [1, 1, 1]} : vector<6x2x128xf32> to vector<4x2x128xf32>
    %213 = vector.shape_cast %212 : vector<4x2x128xf32> to vector<2x2x2x128xf32>
    %214 = vector.extract_strided_slice %213 {offsets = [0, 0, 0, 0], sizes = [2, 1, 2, 128], strides = [1, 1, 1, 1]} : vector<2x2x2x128xf32> to vector<2x1x2x128xf32>
    %215 = vector.shape_cast %214 : vector<2x1x2x128xf32> to vector<2x2x128xf32>
    %216 = vector.extract_strided_slice %195 {offsets = [0, 0, 0], sizes = [6, 2, 128], strides = [1, 1, 1]} : vector<6x3x128xf32> to vector<6x2x128xf32>
    %217 = vector.extract_strided_slice %216 {offsets = [1, 0, 0], sizes = [4, 2, 128], strides = [1, 1, 1]} : vector<6x2x128xf32> to vector<4x2x128xf32>
    %218 = vector.shape_cast %217 : vector<4x2x128xf32> to vector<2x2x2x128xf32>
    %219 = vector.extract_strided_slice %218 {offsets = [0, 0, 0, 0], sizes = [2, 1, 2, 128], strides = [1, 1, 1, 1]} : vector<2x2x2x128xf32> to vector<2x1x2x128xf32>
    %220 = vector.shape_cast %219 : vector<2x1x2x128xf32> to vector<2x2x128xf32>
    %221 = vector.extract_strided_slice %191 {offsets = [0, 1, 0], sizes = [6, 2, 128], strides = [1, 1, 1]} : vector<6x3x128xf32> to vector<6x2x128xf32>
    %222 = vector.extract_strided_slice %221 {offsets = [1, 0, 0], sizes = [4, 2, 128], strides = [1, 1, 1]} : vector<6x2x128xf32> to vector<4x2x128xf32>
    %223 = vector.shape_cast %222 : vector<4x2x128xf32> to vector<2x2x2x128xf32>
    %224 = vector.extract_strided_slice %223 {offsets = [0, 0, 0, 0], sizes = [2, 1, 2, 128], strides = [1, 1, 1, 1]} : vector<2x2x2x128xf32> to vector<2x1x2x128xf32>
    %225 = vector.shape_cast %224 : vector<2x1x2x128xf32> to vector<2x2x128xf32>
    %226 = vector.extract_strided_slice %191 {offsets = [0, 0, 0], sizes = [6, 2, 128], strides = [1, 1, 1]} : vector<6x3x128xf32> to vector<6x2x128xf32>
    %227 = vector.extract_strided_slice %226 {offsets = [2, 0, 0], sizes = [4, 2, 128], strides = [1, 1, 1]} : vector<6x2x128xf32> to vector<4x2x128xf32>
    %228 = vector.shape_cast %227 : vector<4x2x128xf32> to vector<2x2x2x128xf32>
    %229 = vector.extract_strided_slice %228 {offsets = [0, 0, 0, 0], sizes = [2, 1, 2, 128], strides = [1, 1, 1, 1]} : vector<2x2x2x128xf32> to vector<2x1x2x128xf32>
    %230 = vector.shape_cast %229 : vector<2x1x2x128xf32> to vector<2x2x128xf32>
    %231 = vector.extract_strided_slice %195 {offsets = [0, 0, 0], sizes = [6, 2, 128], strides = [1, 1, 1]} : vector<6x3x128xf32> to vector<6x2x128xf32>
    %232 = vector.extract_strided_slice %231 {offsets = [2, 0, 0], sizes = [4, 2, 128], strides = [1, 1, 1]} : vector<6x2x128xf32> to vector<4x2x128xf32>
    %233 = vector.shape_cast %232 : vector<4x2x128xf32> to vector<2x2x2x128xf32>
    %234 = vector.extract_strided_slice %233 {offsets = [0, 0, 0, 0], sizes = [2, 1, 2, 128], strides = [1, 1, 1, 1]} : vector<2x2x2x128xf32> to vector<2x1x2x128xf32>
    %235 = vector.shape_cast %234 : vector<2x1x2x128xf32> to vector<2x2x128xf32>
    %236 = vector.extract_strided_slice %191 {offsets = [0, 1, 0], sizes = [6, 2, 128], strides = [1, 1, 1]} : vector<6x3x128xf32> to vector<6x2x128xf32>
    %237 = vector.extract_strided_slice %236 {offsets = [2, 0, 0], sizes = [4, 2, 128], strides = [1, 1, 1]} : vector<6x2x128xf32> to vector<4x2x128xf32>
    %238 = vector.shape_cast %237 : vector<4x2x128xf32> to vector<2x2x2x128xf32>
    %239 = vector.extract_strided_slice %238 {offsets = [0, 0, 0, 0], sizes = [2, 1, 2, 128], strides = [1, 1, 1, 1]} : vector<2x2x2x128xf32> to vector<2x1x2x128xf32>
    %240 = vector.shape_cast %239 : vector<2x1x2x128xf32> to vector<2x2x128xf32>
    %241 = tpu.concatenate %200, %205, %210, %215, %220, %225, %230, %235, %240 in 2 : vector<2x2x128xf32>, vector<2x2x128xf32>, vector<2x2x128xf32>, vector<2x2x128xf32>, vector<2x2x128xf32>, vector<2x2x128xf32>, vector<2x2x128xf32>, vector<2x2x128xf32>, vector<2x2x128xf32> -> vector<2x2x1152xf32>
    %242 = vector.shape_cast %241 : vector<2x2x1152xf32> to vector<4x1152xf32>
    %243 = arith.truncf %242 : vector<4x1152xf32> to vector<4x1152xbf16>
    %c0_34 = arith.constant 0 : index
    %c0_35 = arith.constant 0 : index
    %244 = vector.load %arg8[%c0_34, %c0_35] : memref<1152x128xbf16, #tpu.memory_space<vmem>>, vector<1152x128xbf16>
    %cst_36 = arith.constant dense<0.000000e+00> : vector<4x128xf32>
    %245 = tpu.matmul %243, %244, %cst_36 {dimension_numbers = #tpu.dot_dimension_numbers<[1], [0], [0], [1], [0, 0, 1, 1], [], []>} : vector<4x1152xbf16>, vector<1152x128xbf16>, vector<4x128xf32> -> vector<4x128xf32>
    %c0_37 = arith.constant 0 : index
    %c0_38 = arith.constant 0 : index
    %246 = vector.load %arg9[%c0_37, %c0_38] : memref<1x128xf32, #tpu.memory_space<vmem>>, vector<1x128xf32>
    %247 = vector.broadcast %246 : vector<1x128xf32> to vector<4x128xf32>
    %248 = arith.addf %245, %247 : vector<4x128xf32>
    %cst_39 = arith.constant 0.000000e+00 : f32
    %249 = vector.broadcast %cst_39 : f32 to vector<4x128xf32>
    %250 = arith.maximumf %248, %249 : vector<4x128xf32>
    %c0_40 = arith.constant 0 : index
    %c0_41 = arith.constant 0 : index
    %c0_42 = arith.constant 0 : index
    %251 = vector.load %arg12[%c0_40, %c0_41, %c0_42] : memref<1x4x128xf32, #tpu.memory_space<vmem>>, vector<1x4x128xf32>
    %252 = vector.shape_cast %251 : vector<1x4x128xf32> to vector<4x128xf32>
    %253 = vector.shape_cast %250 : vector<4x128xf32> to vector<1x4x128xf32>
    tpu.vector_store %arg12[%c0_40, %c0_41, %c0_42], %253 {strides = array<i32>} : memref<1x4x128xf32, #tpu.memory_space<vmem>>, vector<1x4x128xf32>,
    return
  }
  func.func @transform_0(%arg0: i32) -> (i32, i32, i32, i32) {
    %c0_i32 = arith.constant 0 : i32
    %c0_i32_0 = arith.constant 0 : i32
    %c0_i32_1 = arith.constant 0 : i32
    %c0_i32_2 = arith.constant 0 : i32
    return %arg0, %c0_i32, %c0_i32_0, %c0_i32_1 : i32, i32, i32, i32
  }
  func.func @transform_1(%arg0: i32) -> (i32, i32) {
    %c0_i32 = arith.constant 0 : i32
    %c0_i32_0 = arith.constant 0 : i32
    %c0_i32_1 = arith.constant 0 : i32
    return %c0_i32, %c0_i32_0 : i32, i32
  }
  func.func @transform_2(%arg0: i32) -> (i32, i32) {
    %c0_i32 = arith.constant 0 : i32
    %c0_i32_0 = arith.constant 0 : i32
    %c0_i32_1 = arith.constant 0 : i32
    return %c0_i32, %c0_i32_0 : i32, i32
  }
  func.func @transform_3(%arg0: i32) -> (i32, i32) {
    %c0_i32 = arith.constant 0 : i32
    %c0_i32_0 = arith.constant 0 : i32
    %c0_i32_1 = arith.constant 0 : i32
    return %c0_i32, %c0_i32_0 : i32, i32
  }
  func.func @transform_4(%arg0: i32) -> (i32, i32) {
    %c0_i32 = arith.constant 0 : i32
    %c0_i32_0 = arith.constant 0 : i32
    %c0_i32_1 = arith.constant 0 : i32
    return %c0_i32, %c0_i32_0 : i32, i32
  }
  func.func @transform_5(%arg0: i32) -> (i32, i32) {
    %c0_i32 = arith.constant 0 : i32
    %c0_i32_0 = arith.constant 0 : i32
    %c0_i32_1 = arith.constant 0 : i32
    return %c0_i32, %c0_i32_0 : i32, i32
  }
  func.func @transform_6(%arg0: i32) -> (i32, i32) {
    %c0_i32 = arith.constant 0 : i32
    %c0_i32_0 = arith.constant 0 : i32
    %c0_i32_1 = arith.constant 0 : i32
    return %c0_i32, %c0_i32_0 : i32, i32
  }
  func.func @transform_7(%arg0: i32) -> (i32, i32) {
    %c0_i32 = arith.constant 0 : i32
    %c0_i32_0 = arith.constant 0 : i32
    %c0_i32_1 = arith.constant 0 : i32
    return %c0_i32, %c0_i32_0 : i32, i32
  }
  func.func @transform_8(%arg0: i32) -> (i32, i32) {
    %c0_i32 = arith.constant 0 : i32
    %c0_i32_0 = arith.constant 0 : i32
    %c0_i32_1 = arith.constant 0 : i32
    return %c0_i32, %c0_i32_0 : i32, i32
  }
  func.func @transform_9(%arg0: i32) -> (i32, i32, i32) {
    %c0_i32 = arith.constant 0 : i32
    %c0_i32_0 = arith.constant 0 : i32
    %c0_i32_1 = arith.constant 0 : i32
    return %arg0, %c0_i32, %c0_i32_0 : i32, i32, i32
  }
  func.func @transform_10(%arg0: i32) -> (i32, i32, i32) {
    %c0_i32 = arith.constant 0 : i32
    %c0_i32_0 = arith.constant 0 : i32
    %c0_i32_1 = arith.constant 0 : i32
    return %arg0, %c0_i32, %c0_i32_0 : i32, i32, i32
  }
  func.func @transform_11(%arg0: i32) -> (i32, i32, i32) {
    %c0_i32 = arith.constant 0 : i32
    %c0_i32_0 = arith.constant 0 : i32
    %c0_i32_1 = arith.constant 0 : i32
    return %arg0, %c0_i32, %c0_i32_0 : i32, i32, i32
  }
}

</mosaic_0001>

<bundles_post_ra>
// kernel: _forward_impl.1
= control target key start
LH: loop header
LB: loop body
LE: loop exit
PB: predicated region body
PF: predicated region fallthrough
CT: control target
= control target key end

     0   :  { %s8608_s0 = inlined_call_operand.vmem [shape: f32[2,16,16,4], index: 0, kind: input, shape index: {}]   ;;  %s8609_s1 = inlined_call_operand.vmem [shape: bf16[36,128], index: 1, kind: input, shape index: {}]   ;;  %s8610_s2 = inlined_call_operand.vmem [shape: f32[1,128], index: 2, kind: input, shape index: {}, may-alias: {2,4,6,8}]   ;;  %s8611_s3 = inlined_call_operand.hbm [shape: bf16[1152,128], index: 3, kind: input, shape index: {}]   ;;  %s8612_s4 = inlined_call_operand.vmem [shape: f32[1,128], index: 4, kind: input, shape index: {}, may-alias: {2,4,6,8}]   ;;  %s8613_s5 = inlined_call_operand.hbm [shape: bf16[1152,128], index: 5, kind: input, shape index: {}]   ;;  %s8614_s6 = inlined_call_operand.vmem [shape: f32[1,128], index: 6, kind: input, shape index: {}, may-alias: {2,4,6,8}]   ;;  %s8615_s7 = inlined_call_operand.vmem [shape: bf16[1152,128], index: 7, kind: input, shape index: {}]   ;;  %s8616_s8 = inlined_call_operand.vmem [shape: f32[1,128], index: 8, kind: input, shape index: {}, may-alias: {2,4,6,8}]   ;;  %s8617_s9 = inlined_call_operand.vmem [shape: f32[2,64,128], index: 9, kind: output, shape index: {0}]   ;;  %s8618_s10 = inlined_call_operand.hbm [shape: f32[2,16,128], index: 10, kind: output, shape index: {1}]   ;;  %s8619_s11 = inlined_call_operand.hbm [shape: f32[2,4,128], index: 11, kind: output, shape index: {2}]  }
   0x1   :  { %8666 = sst [smem:[#allocation24_spill]] %s8608_s0 }
   0x2   :  { %17 = vsyncpa [#allocation3], 0 }
   0x3   :  { %18 = vsyncpa [#allocation6], 0 }
   0x4   :  { %19 = vsyncpa [#allocation4], 0 }
   0x5   :  { %21 = vsyncpa [#allocation4 + $0x1], 0 }
   0x6   :  { %22 = vsyncpa [#allocation9], 0 }
   0x7   :  { %24 = vsyncpa [#allocation9 + $0x1], 0  ;;  %s6467_s17 = smov 0   ;;  %s6469_s18 = smov 0  }
   0x8   :  { %s6471_s19 = smov 0   ;;  %s6473_s20 = smov 0  }
   0x9 LB: > { %s6488_s21 = sadd.s32 4294967295, %s6386_s20   ;;  %s4996_s22 = sadd.s32 4294967294, %s6386_s20   ;;  %s6386_s20 = sphi %s6473_s20, %s8753_s20   ;;  %s6382_s19 = sphi %s6471_s19, %s8752_s19   ;;  %s6378_s18 = sphi %s6469_s18, %s8751_s18   ;;  %s6374_s17 = sphi %s6467_s17, %s8750_s17  }
   0xa   : > { %s6492_s23 = sadd.s32 1, %s6386_s20   ;;  %s257_s24 = sadd.s32 1, %s6382_s19 }
   0xb   : > { %s254_s25 = ssub.s32 %s6386_s20, %s6492_s23  ;;  %p267_p0 = scmp.ne.s32.totalorder %s6382_s19, %s6378_s18 }
   0xc   : > { %p255_p1 = scmp.eq.s32.totalorder %s254_s25, 0  ;;  %p268_p2 = scmp.eq.s32.totalorder %s6488_s21, 1 }
   0xd   : > { %p273_p3 = scmp.ne.s32.totalorder %s6378_s18, %s6374_s17  ;;  %p274_p4 = scmp.eq.s32.totalorder %s4996_s22, 1 }
   0xe   : > { %s6503_s26 = scalar_select %p255_p1, %s6382_s19, %s257_s24  }
   0xf   : > { %p6505_p5 = por %p268_p2, %p267_p0  ;;  %p6509_p6 = por %p274_p4, %p273_p3 }
  0x10   : > { %8667 = sst [smem:[#allocation14_spill]] %s6503_s26  ;;  %p4997_p7 = scmp.ge.s32.totalorder %s6386_s20, 1 }
  0x11   : > { %s8669_s28 = scalar_select %p6509_p6, 1, 0 }
  0x12   : > { %p307_p8 = scmp.lt.s32.totalorder %s6386_s20, 3  ;;  %p8620_p9 = scmp.eq.s32.totalorder %s6488_s21, 0 }
  0x13   : > { %s6388_s30 = smov [#allocation2]   ;;  %s6389_s14 = smov [#allocation5]  }
  0x14   : > { %p6516_p10 = pnand %p4997_p7, %p307_p8  ;;  %s325_s12 = sshll.u32 %s6388_s30, 4  ;;  %s326_s12 = int_to_ptr.vmem [resolvable:$true] %s325_s12 }
  0x15   : > { %s341_s15 = sshll.u32 %s6389_s14, 4  ;;  %s6247_s16 = scalar_lea.vmem %s326_s12, 9216  ;;  %s342_s15 = int_to_ptr.vmem [resolvable:$true] %s341_s15 }
  0x16   : > { %p5789_p11 = pneg %p6516_p10  ;;  %p6248_p0 = scmp.ne.s32.totalorder %s326_s12, %s6247_s16 }
  0x17   : > { %p6255_p3 = scmp.lt.s32.totalorder %s326_s12, %s326_s12  ;;  %p6256_p4 = scmp.lt.s32.totalorder %s6247_s16, %s6247_s16 }
  0x18   : > { %p6524_p12 = pnand %p8620_p9, %p5789_p11 }
  0x19   : > { %p6257_p7 = por %p6256_p4, %p6255_p3 }
  0x1a   : > { %p6238_p13 = pneg %p6524_p12 }
  0x1c   : > { %p6250_p1 = pnand %p6248_p0, %p6238_p13 }
  0x1e   : > { %p6251_p2 = pneg %p6250_p1 }
  0x20   : > { %p6258_p8 = pnand %p6257_p7, %p6251_p2 }
  0x22   : > { %6261 = shalt.err (!%p6258_p8)
}
  0x23   : > { %s6390_s22 = smov 64   ;;  %s6391_s24 = smov 4  }
  0x24   : > { %5792 = dma.hbm_to_vmem [thread:$0]  (!%p6524_p12), %s8611_s3, 9216, %s326_s12, [#allocation3], %s6390_s22, %s6390_s22, %s6391_s24  }
  0x25   : > { %s6273_s14 = scalar_lea.vmem %s342_s15, 9216  ;;  %p6281_p9 = scmp.lt.s32.totalorder %s342_s15, %s342_s15 }
  0x26   : > { %p6274_p11 = scmp.ne.s32.totalorder %s342_s15, %s6273_s14  ;;  %p6282_p6 = scmp.lt.s32.totalorder %s6273_s14, %s6273_s14 }
  0x28   : > { %p6276_p0 = pnand %p6274_p11, %p6238_p13  ;;  %p6283_p3 = por %p6282_p6, %p6281_p9 }
  0x2a   : > { %p6277_p1 = pneg %p6276_p0 }
  0x2c   : > { %p6284_p2 = pnand %p6283_p3, %p6277_p1 }
  0x2e   : > { %6287 = shalt.err (!%p6284_p2)
}
  0x2f   : > { %5795 = dma.hbm_to_vmem [thread:$0]  (!%p6524_p12), %s8613_s5, 9216, %s342_s15, [#allocation6], %s6390_s22, %s6390_s22, %s6391_s24  }
  0x30   : > { %374 = sbr.rel (%p6516_p10) target bundleno = 1388 (0x56c), region = 56 }
  0x35   : > { %p8672_p4 = scmp.eq.s32.totalorder %s6488_s21, 0 }
  0x37   : > { %6357 = dma.done.wait (%p8672_p4), [#allocation3], 9216   ;;  %p8673_p13 = pmov %p8672_p4 }
  0x38   : > { %p8674_p7 = pmov %p8672_p4 }
  0x39   : > { %6359 = vsyncadd (%p8673_p13), [#allocation3], 4294958080 }
  0x3a   : > { %6361 = dma.done.wait (%p8674_p7), [#allocation6], 9216   ;;  %p8675_p6 = pmov %p8672_p4 }
  0x3b   : > { %p428_p9 = scmp.lt.s32.totalorder %s6488_s21, 1  ;;  %vm904_vm0 = vcmask 1041408   ;;  %v8621_v0 = vmov 0.0   ;;  %vm503_vm1 = vcmask 1040384   ;;  %vm922_vm2 = vcmask 1042432   ;;  %s8676_s0 = sld [smem:[#allocation24_spill]] }
  0x3c   : > { %6363 = vsyncadd (%p8675_p6), [#allocation6], 4294958080  ;;  %v6561_v1 = vrot.slane %v8621_v0, 1  ;;  %v6564_v2 = vrot.slane %v8621_v0, 2  ;;  %v717_v3 = vrot.slane %v8621_v0, 3  ;;  %v6568_v4 = vrot.slane %v8621_v0, 4 }
  0x3d   : > { %s6558_s26 = scalar_select %p428_p9, %s6488_s21, 1  ;;  %v6572_v5 = vrot.slane %v8621_v0, 5  ;;  %vm940_vm3 = vcmask 1043456   ;;  %v6580_v6 = vrot.slane %v8621_v0, 6  ;;  %vm958_vm4 = vcmask 1044480  }
  0x3e   : > { %v1044_v7 = vsel %vm503_vm1, %v6561_v1, %v6564_v2  ;;  %v887_v8 = vsel %vm503_vm1, 0.0, %v6561_v1  ;;  %v6600_v14 = vrot.slane %v8621_v0, 7  ;;  %vm976_vm5 = vcmask 1045504   ;;  %s6393_s22 = smov 12   ;;  %s6394_s24 = smov 4  }
  0x3f   : > { %s5322_s29 = sshll.u32 %s6558_s26, 8  ;;  %v6588_v9 = vsel %vm904_vm0, %v1044_v7, %v717_v3  ;;  %v6592_v10 = vsel %vm904_vm0, %v887_v8, %v6564_v2  ;;  %vm994_vm6 = vcmask 1046528   ;;  %s6395_s25 = smov 16   ;;  %vm1455_vm7 = vcmask 31744  }
  0x40   : > { %8677 = vst [vmem:[#allocation15_spill] sm:$0xff] %v6588_v9  ;;  %8678 = vst [vmem:[#allocation16_spill] sm:$0xff] %v6592_v10  ;;  %v1078_v15 = vsel %vm922_vm2, %v6588_v9, %v6568_v4  ;;  %v6607_v16 = vsel %vm922_vm2, %v6592_v10, %v717_v3  ;;  %s6396_s30 = smov 24   ;;  %s8665_s14 = smov 8   ;;  %vm1464_vm8 = vcmask 64512   ;;  %vm1473_vm9 = vcmask 97280  }
  0x41   : > { %s6577_s15 = scalar_lea.vmem %s8676_s0, %s5322_s29  ;;  %v6619_v23 = vsel %vm940_vm3, %v1078_v15, %v6572_v5  ;;  %s6398_s12 = smov 20   ;;  %vm1482_vm10 = vcmask 130048   ;;  %vm1491_vm11 = vcmask 162816   ;;  %vm1500_vm12 = vcmask 195584  }
  0x42   : > { %v447_v11 = vld [vmem:[%s6577_s15 + $0x40] sm:$0xff]  ;;  %v6596_v12 = vld [vmem:[%s6577_s15 + $0x48] sm:$0xff]  ;;  %v441_v21 = vld [vmem:[%s6577_s15 + $0x10] sm:$0xff]  ;;  %8679 = vst [vmem:[#allocation17_spill] sm:$0xff] %v6619_v23  ;;  %v6627_v28 = vsel %vm958_vm4, %v6619_v23, %v6580_v6  ;;  %s6399_s13 = smov 28   ;;  %s6400_s16 = smov 32  }
  0x43   : > { %v451_v13 = vld [vmem:[%s6577_s15 + $0x60] sm:$0xff]  ;;  %v6610_v17 = vld [vmem:[%s6577_s15 + $0x68] sm:$0xff]  ;;  %v516_v18 = vrot.slane %v447_v11, 7  ;;  %v8624_v19 = vrot.slane %v6596_v12, 7  ;;  %v6615_v22 = vld [vmem:[%s6577_s15 + $0x18] sm:$0xff]  ;;  %v507_v26 = vrot.slane %v441_v21, 7 }
  0x44   : > { %v522_v20 = vrot.slane %v451_v13, 7  ;;  %v8623_v24 = vrot.slane %v6610_v17, 7  ;;  %v445_v25 = vld [vmem:[%s6577_s15 + $0x30] sm:$0xff]  ;;  %v508_v27 = vrot.slane %v6615_v22, 7  ;;  %v6653_v41 = vld [vmem:[%s6577_s15 + $0x38] sm:$0xff]  ;;  %vm1509_vm13 = vcmask 228352  }
  0x45   : > { %v6632_v29 = vsel %vm503_vm1, %v516_v18, %v8624_v19  ;;  %v6635_v30 = vsel %vm503_vm1, 0.0, %v516_v18  ;;  %v513_v32 = vrot.slane %v445_v25, 7  ;;  %v8640_v53 = vrot.slane %v6653_v41, 7 }
  0x46   : > { %v6638_v31 = vsel %vm503_vm1, 0.0, %v522_v20  ;;  %v6643_v33 = vsel %vm503_vm1, %v522_v20, %v8623_v24  ;;  %v654_v34 = vrot.slane %v6635_v30, 1  ;;  %v688_v36 = vrot.slane %v6635_v30, 2 }
  0x47   : > { %v656_v35 = vrot.slane %v6638_v31, 1  ;;  %v690_v37 = vrot.slane %v6638_v31, 2  ;;  %v722_v38 = vrot.slane %v6635_v30, 3  ;;  %v724_v39 = vrot.slane %v6638_v31, 3 }
  0x48   : > { %v756_v40 = vrot.slane %v6632_v29, 4  ;;  %v758_v42 = vrot.slane %v6643_v33, 4  ;;  %v790_v43 = vrot.slane %v6632_v29, 5  ;;  %v792_v44 = vrot.slane %v6643_v33, 5 }
  0x49   : > { %v824_v45 = vrot.slane %v6632_v29, 6  ;;  %v826_v46 = vrot.slane %v6643_v33, 6  ;;  %v858_v47 = vrot.slane %v6632_v29, 7  ;;  %v860_v48 = vrot.slane %v6643_v33, 7 }
  0x4a   : > { %v892_v49 = vsel %vm503_vm1, %v6635_v30, %v654_v34  ;;  %v894_v50 = vsel %vm503_vm1, %v6638_v31, %v656_v35  ;;  %v6676_v52 = vsel %vm503_vm1, %v507_v26, %v508_v27  ;;  %v6686_v56 = vsel %vm503_vm1, 0.0, %v507_v26 }
  0x4b   : > { %v910_v51 = vsel %vm904_vm0, %v892_v49, %v688_v36  ;;  %v912_v54 = vsel %vm904_vm0, %v894_v50, %v690_v37  ;;  %v6689_v57 = vsel %vm503_vm1, 0.0, %v513_v32  ;;  %v6698_v60 = vsel %vm503_vm1, %v513_v32, %v8640_v53 }
  0x4c   : > { %v928_v55 = vsel %vm922_vm2, %v910_v51, %v722_v38  ;;  %v930_v58 = vsel %vm922_vm2, %v912_v54, %v724_v39  ;;  %v651_v61 = vrot.slane %v6686_v56, 1  ;;  %v653_v3 = vrot.slane %v6689_v57, 1 }
  0x4d   : > { %v946_v59 = vsel %vm940_vm3, %v928_v55, %v756_v40  ;;  %v948_v62 = vsel %vm940_vm3, %v930_v58, %v758_v42  ;;  %v685_v7 = vrot.slane %v6686_v56, 2  ;;  %v8630_v13 = vrot.slane %v6689_v57, 2 }
  0x4e   : > { %v964_v63 = vsel %vm958_vm4, %v946_v59, %v790_v43  ;;  %v966_v8 = vsel %vm958_vm4, %v948_v62, %v792_v44  ;;  %v719_v15 = vrot.slane %v6686_v56, 3  ;;  %v8629_v21 = vrot.slane %v6689_v57, 3 }
  0x4f   : > { %v982_v11 = vsel %vm976_vm5, %v964_v63, %v824_v45  ;;  %v984_v18 = vsel %vm976_vm5, %v966_v8, %v826_v46  ;;  %v787_v40 = vrot.slane %v6676_v52, 5  ;;  %v8628_v42 = vrot.slane %v6698_v60, 5 }
  0x50   : > { %v6721_v20 = vsel %vm994_vm6, %v982_v11, %v858_v47  ;;  %v6728_v26 = vsel %vm994_vm6, %v984_v18, %v860_v48  ;;  %v8642_v51 = vrot.slane %v6676_v52, 6  ;;  %v8625_v54 = vrot.slane %v6698_v60, 6 }
  0x51   : > { %v5872_v50 = vpack.i.bf16 %v6728_v26, %v6721_v20  ;;  %v8641_v55 = vrot.slane %v6676_v52, 7  ;;  %v8627_v58 = vrot.slane %v6698_v60, 7  ;;  %v6742_v59 = vsel %vm503_vm1, %v6686_v56, %v651_v61 }
  0x52   : > { %v6746_v62 = vsel %vm503_vm1, %v6689_v57, %v653_v3  ;;  %v1013_v63 = vrot.slane %v6686_v56, 4  ;;  %v1015_v8 = vrot.slane %v6689_v57, 4  ;;  %v1046_v11 = vsel %vm503_vm1, %v651_v61, %v685_v7 }
  0x53   : > { %5873 = vrot.lane.b32.xlu1 %v5872_v50, %s6393_s22  ;;  %v1048_v18 = vsel %vm503_vm1, %v653_v3, %v8630_v13  ;;  %v1063_v0 = vsel %vm904_vm0, %v1046_v11, %v719_v15  ;;  %v1129_v49 = vsel %vm976_vm5, %v6627_v28, %v6600_v14  ;;  %v753_v32 = vrot.slane %v6676_v52, 4  ;;  %v6895_v13 = vld [vmem:[%s6577_s15 + $0x28] sm:$0xff] }
  0x54   : > { %v1065_v50 = vsel %vm904_vm0, %v1048_v18, %v8629_v21  ;;  %v1080_v61 = vsel %vm922_vm2, %v1063_v0, %v1013_v63  ;;  %v1146_v24 = vsel %vm994_vm6, %v1129_v49, 0.0  ;;  %v1016_v11 = vrot.slane %v6635_v30, 4  ;;  %v449_v49 = vld [vmem:[%s6577_s15 + $0x50] sm:$0xff]  ;;  %v6785_v63 = vld [vmem:[%s6577_s15 + $0x58] sm:$0xff]  ;;  %v6816_v30 = vld [vmem:[%s6577_s15] sm:$0xff] }
  0x55   : > { %v1082_v3 = vsel %vm922_vm2, %v1065_v50, %v1015_v8  ;;  %v1097_v18 = vsel %vm940_vm3, %v1080_v61, %v787_v40  ;;  %v1018_v19 = vrot.slane %v6638_v31, 4  ;;  %v1049_v0 = vsel %vm503_vm1, %v654_v34, %v688_v36  ;;  %v453_v36 = vld [vmem:[%s6577_s15 + $0x70] sm:$0xff] }
  0x56   : > { %v1099_v28 = vsel %vm940_vm3, %v1082_v3, %v8628_v42  ;;  %v1114_v8 = vsel %vm958_vm4, %v1097_v18, %v8642_v51  ;;  %v1051_v61 = vsel %vm503_vm1, %v656_v35, %v690_v37  ;;  %v1066_v34 = vsel %vm904_vm0, %v1049_v0, %v722_v38  ;;  %v6803_v3 = vld [vmem:[%s6577_s15 + $0x78] sm:$0xff] }
  0x57   : > { %v1116_v50 = vsel %vm958_vm4, %v1099_v28, %v8625_v54  ;;  %v1131_v18 = vsel %vm976_vm5, %v1114_v8, %v8641_v55  ;;  %v1068_v54 = vsel %vm904_vm0, %v1051_v61, %v724_v39  ;;  %v1083_v35 = vsel %vm922_vm2, %v1066_v34, %v1016_v11 }
  0x58   : > { %v1133_v28 = vsel %vm976_vm5, %v1116_v50, %v8627_v58  ;;  %v6820_v37 = vsel %vm994_vm6, %v1131_v18, %v6676_v52  ;;  %v1085_v0 = vsel %vm922_vm2, %v1068_v54, %v1018_v19  ;;  %v1100_v31 = vsel %vm940_vm3, %v1083_v35, %v790_v43 }
  0x59   : > { %v6824_v38 = vsel %vm994_vm6, %v1133_v28, %v6698_v60  ;;  %v5857_v11 = vpack.i.bf16 %v6820_v37, %v1146_v24  ;;  %v1102_v8 = vsel %vm940_vm3, %v1085_v0, %v792_v44  ;;  %v1117_v50 = vsel %vm958_vm4, %v1100_v31, %v824_v45 }
  0x5a   : > { %v1119_v19 = vsel %vm958_vm4, %v1102_v8, %v826_v46  ;;  %v1134_v43 = vsel %vm976_vm5, %v1117_v50, %v858_v47  ;;  %v519_v54 = vrot.slane %v449_v49, 7  ;;  %v8631_v61 = vrot.slane %v6785_v63, 7 }
  0x5b   : > { %5858 = vrot.lane.b32.xlu0 %v5857_v11, %s6394_s24  ;;  %v1136_v24 = vsel %vm976_vm5, %v1119_v19, %v860_v48  ;;  %v1151_v44 = vsel %vm994_vm6, %v1134_v43, %v6632_v29  ;;  %v525_v45 = vrot.slane %v453_v36, 7  ;;  %v8626_v46 = vrot.slane %v6803_v3, 7 }
  0x5c   : > { %v1153_v34 = vsel %vm994_vm6, %v1136_v24, %v6643_v33  ;;  %v521_v47 = vsel %vm503_vm1, %v519_v54, %v8631_v61  ;;  %v605_v49 = vsel %vm503_vm1, 0.0, %v519_v54  ;;  %v504_v18 = vrot.slane %v6816_v30, 7 }
  0x5d   : > { %v5882_v28 = vpack.i.bf16 %v1153_v34, %v1151_v44  ;;  %v655_v35 = vrot.slane %v605_v49, 1  ;;  %v689_v48 = vrot.slane %v605_v49, 2  ;;  %v723_v0 = vrot.slane %v605_v49, 3  ;;  %v6875_v44 = vld [vmem:[%s6577_s15 + $0x8] sm:$0xff] }
  0x5e   : > { %v791_v29 = vrot.slane %v521_v47, 5  ;;  %v825_v36 = vrot.slane %v521_v47, 6  ;;  %v859_v31 = vrot.slane %v521_v47, 7  ;;  %v1017_v11 = vrot.slane %v605_v49, 4 }
  0x5f   : > { %5883 = vrot.lane.b32.xlu1 %v5882_v28, %s6395_s25  ;;  %v1050_v33 = vsel %vm503_vm1, %v655_v35, %v689_v48  ;;  %v6865_v8 = vsel %vm503_vm1, %v525_v45, %v8626_v46  ;;  %v6868_v30 = vsel %vm503_vm1, 0.0, %v525_v45  ;;  %v757_v50 = vrot.slane %v521_v47, 4  ;;  %v443_v46 = vld [vmem:[%s6577_s15 + $0x20] sm:$0xff] }
  0x60   : > { %v1067_v19 = vsel %vm904_vm0, %v1050_v33, %v723_v0  ;;  %v8632_v43 = vrot.slane %v6868_v30, 1  ;;  %v8637_v54 = vrot.slane %v6868_v30, 2  ;;  %v8636_v24 = vrot.slane %v6868_v30, 3 }
  0x61   : > { %v1084_v34 = vsel %vm922_vm2, %v1067_v19, %v1017_v11  ;;  %v759_v28 = vrot.slane %v6865_v8, 4  ;;  %v8635_v39 = vrot.slane %v6865_v8, 5  ;;  %v8634_v45 = vrot.slane %v6865_v8, 6 }
  0x62   : > { %v1101_v33 = vsel %vm940_vm3, %v1084_v34, %v791_v29  ;;  %v8633_v58 = vrot.slane %v6865_v8, 7  ;;  %v893_v42 = vsel %vm503_vm1, %v605_v49, %v655_v35  ;;  %v895_v25 = vsel %vm503_vm1, %v6868_v30, %v8632_v43 }
  0x63   : > { %v1118_v11 = vsel %vm958_vm4, %v1101_v33, %v825_v36  ;;  %v911_v19 = vsel %vm904_vm0, %v893_v42, %v689_v48  ;;  %v913_v21 = vsel %vm904_vm0, %v895_v25, %v8637_v54  ;;  %v8639_v34 = vrot.slane %v6875_v44, 7 }
  0x64   : > { %v1135_v61 = vsel %vm976_vm5, %v1118_v11, %v859_v31  ;;  %v929_v49 = vsel %vm922_vm2, %v911_v19, %v723_v0  ;;  %v931_v35 = vsel %vm922_vm2, %v913_v21, %v8636_v24  ;;  %v510_v43 = vrot.slane %v443_v46, 7 }
  0x65   : > { %v6904_v33 = vsel %vm994_vm6, %v1135_v61, %v521_v47  ;;  %v947_v42 = vsel %vm940_vm3, %v929_v49, %v757_v50  ;;  %v949_v25 = vsel %vm940_vm3, %v931_v35, %v759_v28  ;;  %v6911_v48 = vsel %vm503_vm1, %v504_v18, %v8639_v34 }
  0x66   : > { %v5862_v0 = vpack.i.bf16 %v6904_v33, %v6824_v38  ;;  %v965_v11 = vsel %vm958_vm4, %v947_v42, %v791_v29  ;;  %v967_v21 = vsel %vm958_vm4, %v949_v25, %v8635_v39  ;;  %v8638_v61 = vrot.slane %v6895_v13, 7 }
  0x67   : > { %v983_v46 = vsel %vm976_vm5, %v965_v11, %v825_v36  ;;  %v985_v47 = vsel %vm976_vm5, %v967_v21, %v8634_v45  ;;  %v6925_v50 = vsel %vm503_vm1, 0.0, %v504_v18  ;;  %v6928_v28 = vsel %vm503_vm1, 0.0, %v510_v43 }
  0x68   : > { %5863 = vrot.lane.b32.xlu0 %v5862_v0, %s6394_s24  ;;  %v6932_v29 = vsel %vm994_vm6, %v983_v46, %v859_v31  ;;  %v6937_v19 = vsel %vm994_vm6, %v985_v47, %v8633_v58  ;;  %v6942_v36 = vsel %vm503_vm1, %v510_v43, %v8638_v61  ;;  %v650_v18 = vrot.slane %v6925_v50, 1 }
  0x69   : > { %v5892_v35 = vpack.i.bf16 %v6937_v19, %v6932_v29  ;;  %v652_v42 = vrot.slane %v6928_v28, 1  ;;  %v684_v25 = vrot.slane %v6925_v50, 2  ;;  %v686_v0 = vrot.slane %v6928_v28, 2 }
  0x6a   : > { %v718_v11 = vrot.slane %v6925_v50, 3  ;;  %v720_v43 = vrot.slane %v6928_v28, 3  ;;  %v752_v21 = vrot.slane %v6911_v48, 4  ;;  %v754_v46 = vrot.slane %v6942_v36, 4 }
  0x6b   : > { %5893 = vrot.lane.b32.xlu1 %v5892_v35, %s6396_s30  ;;  %v786_v47 = vrot.slane %v6911_v48, 5  ;;  %v788_v58 = vrot.slane %v6942_v36, 5  ;;  %v820_v45 = vrot.slane %v6911_v48, 6  ;;  %v822_v49 = vrot.slane %v6942_v36, 6 }
  0x6c   : > { %v854_v39 = vrot.slane %v6911_v48, 7  ;;  %v856_v24 = vrot.slane %v6942_v36, 7  ;;  %v888_v54 = vsel %vm503_vm1, %v6925_v50, %v650_v18  ;;  %v890_v35 = vsel %vm503_vm1, %v6928_v28, %v652_v42 }
  0x6d   : > { %v617_v61 = vsel %vm503_vm1, %v508_v27, 0.0  ;;  %v907_v34 = vsel %vm904_vm0, %v6742_v59, %v685_v7  ;;  %v906_v31 = vsel %vm904_vm0, %v888_v54, %v684_v25  ;;  %v908_v53 = vsel %vm904_vm0, %v890_v35, %v686_v0 }
  0x6e   : > { %v925_v55 = vsel %vm922_vm2, %v907_v34, %v719_v15  ;;  %v6982_v51 = vsel %vm940_vm3, %v6607_v16, %v6568_v4  ;;  %v924_v22 = vsel %vm922_vm2, %v906_v31, %v718_v11  ;;  %v926_v27 = vsel %vm922_vm2, %v908_v53, %v720_v43 }
  0x6f   : > { %8680 = vst [vmem:[#allocation18_spill] sm:$0xff] %v6982_v51  ;;  %v943_v7 = vsel %vm940_vm3, %v925_v55, %v753_v32  ;;  %v959_v59 = vsel %vm958_vm4, %v6982_v51, %v6572_v5  ;;  %v942_v56 = vsel %vm940_vm3, %v924_v22, %v752_v21  ;;  %v944_v15 = vsel %vm940_vm3, %v926_v27, %v754_v46 }
  0x70   : > { %v961_v4 = vsel %vm958_vm4, %v943_v7, %v787_v40  ;;  %v977_v16 = vsel %vm976_vm5, %v959_v59, %v6580_v6  ;;  %v960_v53 = vsel %vm958_vm4, %v942_v56, %v786_v47  ;;  %v962_v54 = vsel %vm958_vm4, %v944_v15, %v788_v58 }
  0x71   : > { %v8681_v32 = vrot.slane %v6676_v52, 6  ;;  %v7006_v5 = vsel %vm994_vm6, %v977_v16, %v6600_v14  ;;  %v978_v34 = vsel %vm976_vm5, %v960_v53, %v820_v45  ;;  %v980_v31 = vsel %vm976_vm5, %v962_v54, %v822_v49 }
  0x72   : > { %v8682_v40 = vrot.slane %v6676_v52, 7  ;;  %v1210_v21 = vrot.slane %v7006_v5, 1  ;;  %v7017_v46 = vsel %vm994_vm6, %v978_v34, %v854_v39  ;;  %v7020_v35 = vsel %vm994_vm6, %v980_v31, %v856_v24 }
  0x73   : > { %v979_v55 = vsel %vm976_vm5, %v961_v4, %v8681_v32  ;;  %v1213_v22 = vrot.slane %v617_v61, 1  ;;  %v1332_v27 = vrot.slane %v7020_v35, 1  ;;  %v5867_v7 = vpack.i.bf16 %v7020_v35, %v7017_v46 }
  0x74   : > { %v7013_v6 = vsel %vm994_vm6, %v979_v55, %v8682_v40  ;;  %v1329_v52 = vrot.slane %v7017_v46, 1  ;;  %v1211_v59 = vsel %vm994_vm6, %v1210_v21, %v6561_v1  ;;  %v1012_v15 = vrot.slane %v6925_v50, 4 }
  0x75   : > { %v1212_v14 = vrot.slane %v7013_v6, 1  ;;  %v1014_v4 = vrot.slane %v6928_v28, 4  ;;  %v1045_v16 = vsel %vm503_vm1, %v650_v18, %v684_v25  ;;  %5868 = vrot.lane.b32.xlu0 %v5867_v7, %s6393_s22  ;;  %v1047_v53 = vsel %vm503_vm1, %v652_v42, %v686_v0 }
  0x76   : > { %v1062_v54 = vsel %vm904_vm0, %v1045_v16, %v718_v11  ;;  %v8683_v32 = vrot.slane %v6653_v41, 7  ;;  %v1064_v34 = vsel %vm904_vm0, %v1047_v53, %v720_v43  ;;  %v8684_v28 = vrot.slane %v6785_v63, 7 }
  0x77   : > { %v7030_v56 = vsel %vm994_vm6, %v1212_v14, %v1213_v22  ;;  %v1079_v50 = vsel %vm922_vm2, %v1062_v54, %v1012_v15  ;;  %v8685_v25 = vrot.slane %v6689_v57, 2  ;;  %v1081_v41 = vsel %vm922_vm2, %v1064_v34, %v1014_v4  ;;  %v7094_v54 = vld [vmem:[%s8609_s1 + $0x10] ss:$0 sps:$4 sm:$0x33]  }
  0x78   : > { %v5897_v61 = vpack.i.bf16 %v7030_v56, %v1211_v59  ;;  %v619_v55 = vsel %vm503_vm1, %v8683_v32, 0.0  ;;  %v621_v18 = vsel %vm503_vm1, %v8684_v28, 0.0  ;;  %v1096_v42 = vsel %vm940_vm3, %v1079_v50, %v786_v47  ;;  %5776 = vmatprep.subr.msk.bf16.mxu0 %vm904_vm0, %v7094_v54 }
  0x79   : > { %v909_v31 = vsel %vm904_vm0, %v6746_v62, %v8685_v25  ;;  %v8686_v0 = vrot.slane %v6689_v57, 3  ;;  %v1216_v43 = vrot.slane %v619_v55, 1  ;;  %v1098_v63 = vsel %vm940_vm3, %v1081_v41, %v788_v58 }
  0x7a   : > { %5898 = vrot.lane.b32.xlu1 %v5897_v61, %s8665_s14  ;;  %v1113_v40 = vsel %vm958_vm4, %v1096_v42, %v820_v45  ;;  %v8687_v21 = vrot.slane %v6698_v60, 4  ;;  %v1219_v46 = vrot.slane %v621_v18, 1  ;;  %v1115_v14 = vsel %vm958_vm4, %v1098_v63, %v822_v49 }
  0x7b   : > { %v927_v11 = vsel %vm922_vm2, %v909_v31, %v8686_v0  ;;  %v1130_v22 = vsel %vm976_vm5, %v1113_v40, %v854_v39  ;;  %v8688_v47 = vrot.slane %v6698_v60, 5  ;;  %v8689_v7 = vrot.slane %v6596_v12, 7 }
  0x7c   : > { %v945_v62 = vsel %vm940_vm3, %v927_v11, %v8687_v21  ;;  %v1132_v58 = vsel %vm976_vm5, %v1115_v14, %v856_v24  ;;  %v1147_v45 = vsel %vm994_vm6, %v1130_v22, %v6911_v48  ;;  %v8690_v15 = vrot.slane %v6698_v60, 6  ;;  %v7120_v11 = vld [vmem:[%s6577_s15 + $0xb8] sm:$0xff]  ;;  %v465_v14 = vld [vmem:[%s6577_s15 + $0xd0] sm:$0xff] }
  0x7d   : > { %v963_v57 = vsel %vm958_vm4, %v945_v62, %v8688_v47  ;;  %v620_v59 = vsel %vm503_vm1, %v8689_v7, 0.0  ;;  %v8691_v49 = vrot.slane %v6932_v29, 1  ;;  %v1149_v16 = vsel %vm994_vm6, %v1132_v58, %v6942_v36  ;;  %v466_v58 = vld [vmem:[%s6577_s15 + $0xd8] sm:$0xff] }
  0x7e   : > { %v981_v4 = vsel %vm976_vm5, %v963_v57, %v8690_v15  ;;  %v8692_v12 = vrot.slane %v6698_v60, 7  ;;  %v8693_v24 = vrot.slane %v6610_v17, 7  ;;  %v1336_v53 = vrot.slane %v620_v59, 1 }
  0x7f   : > { %v7079_v39 = vsel %vm994_vm6, %v8691_v49, %v1219_v46  ;;  %v5877_v32 = vpack.i.bf16 %v1149_v16, %v1147_v45  ;;  %v8694_v34 = vrot.slane %v6721_v20, 1  ;;  %v8695_v50 = vrot.slane %v6875_v44, 7 }
  0x80   : > { %v7086_v61 = vsel %vm994_vm6, %v981_v4, %v8692_v12  ;;  %v622_v48 = vsel %vm503_vm1, %v8693_v24, 0.0  ;;  %v8696_v18 = vrot.slane %v6895_v13, 7  ;;  %v1019_v31 = vrot.slane %v6868_v30, 4  ;;  %v461_v13 = vld [vmem:[%s6577_s15 + $0xb0] sm:$0xff] }
  0x81   : > { %v1215_v36 = vrot.slane %v7086_v61, 1  ;;  %v5887_v60 = vpack.i.bf16 %v7086_v61, %v7013_v6  ;;  %v1339_v55 = vrot.slane %v622_v48, 1  ;;  %v1337_v17 = vsel %vm994_vm6, %v8694_v34, %v1336_v53  ;;  %5878 = vrot.lane.b32.xlu0 %v5877_v32, %s6395_s25 }
  0x82   : > { %v616_v28 = vsel %vm503_vm1, %v8695_v50, 0.0  ;;  %v618_v25 = vsel %vm503_vm1, %v8696_v18, 0.0  ;;  %v8697_v44 = vrot.slane %v6728_v26, 1  ;;  %v8698_v21 = vrot.slane %v6868_v30, 2 }
  0x83   : > { %v7113_v20 = vsel %vm994_vm6, %v1215_v36, %v1216_v43  ;;  %v1330_v42 = vrot.slane %v616_v28, 1  ;;  %v1333_v0 = vrot.slane %v618_v25, 1  ;;  %v8699_v62 = vrot.slane %v6868_v30, 1 }
  0x84   : > { %v1340_v41 = vsel %vm994_vm6, %v8697_v44, %v1339_v55  ;;  %v5902_v63 = vpack.i.bf16 %v7079_v39, %v7113_v20  ;;  %v8700_v46 = vrot.slane %v6803_v3, 7  ;;  %v8701_v57 = vrot.slane %v6868_v30, 3 }
  0x85   : > { %v5917_v40 = vpack.i.bf16 %v1340_v41, %v1337_v17  ;;  %v1052_v43 = vsel %vm503_vm1, %v8699_v62, %v8698_v21  ;;  %v1331_v22 = vsel %vm994_vm6, %v1329_v52, %v1330_v42  ;;  %v1334_v47 = vsel %vm994_vm6, %v1332_v27, %v1333_v0  ;;  %5888 = vrot.lane.b32.xlu0 %v5887_v60, %s6396_s30 }
  0x86   : > { %v623_v26 = vsel %vm503_vm1, %v8700_v46, 0.0  ;;  %v1069_v7 = vsel %vm904_vm0, %v1052_v43, %v8701_v57  ;;  %5903 = vrot.lane.b32.xlu1 %v5902_v63, %s8665_s14  ;;  %v5907_v45 = vpack.i.bf16 %v1334_v47, %v1331_v22  ;;  %v5927_v15 = vpack.i.bf16 %v7113_v20, %v7030_v56  ;;  %v457_v20 = vld [vmem:[%s6577_s15 + $0x90] sm:$0xff] }
  0x87   : > { %v1222_v59 = vrot.slane %v623_v26, 1  ;;  %v1086_v3 = vsel %vm922_vm2, %v1069_v7, %v1019_v31  ;;  %v537_v4 = vrot.slane %v461_v13, 7  ;;  %v8702_v35 = vrot.slane %v6865_v8, 5 }
  0x88   : > { %v8703_v30 = vrot.slane %v6937_v19, 1  ;;  %v538_v49 = vrot.slane %v7120_v11, 7  ;;  %v543_v16 = vrot.slane %v465_v14, 7  ;;  %v8704_v12 = vrot.slane %v6865_v8, 6 }
  0x89   : > { %v1103_v27 = vsel %vm940_vm3, %v1086_v3, %v8702_v35  ;;  %v544_v48 = vrot.slane %v466_v58, 7  ;;  %v7161_v53 = vsel %vm503_vm1, 0.0, %v537_v4  ;;  %v8705_v32 = vrot.slane %v6865_v8, 7  ;;  %5908 = vrot.lane.b32.xlu0 %v5907_v45, %s6398_s12 }
  0x8a   : > { %v7152_v52 = vsel %vm994_vm6, %v8703_v30, %v1222_v59  ;;  %v1120_v24 = vsel %vm958_vm4, %v1103_v27, %v8704_v12  ;;  %v7167_v60 = vsel %vm503_vm1, %v537_v4, %v538_v49  ;;  %v7170_v55 = vsel %vm503_vm1, 0.0, %v543_v16  ;;  %5918 = vrot.lane.b32.xlu1 %v5917_v40, %s6398_s12  ;;  %v458_v40 = vld [vmem:[%s6577_s15 + $0x98] sm:$0xff] }
  0x8b   : > { %v5932_v56 = vpack.i.bf16 %v7152_v52, %v7079_v39  ;;  %v1137_v36 = vsel %vm976_vm5, %v1120_v24, %v8705_v32  ;;  %v661_v34 = vrot.slane %v7161_v53, 1  ;;  %v7179_v17 = vsel %vm503_vm1, %v543_v16, %v544_v48 }
  0x8c   : > { %v7176_v39 = vsel %vm994_vm6, %v1137_v36, %v6865_v8  ;;  %v663_v50 = vrot.slane %v7170_v55, 1  ;;  %v695_v28 = vrot.slane %v7161_v53, 2  ;;  %v697_v25 = vrot.slane %v7170_v55, 2 }
  0x8d   : > { %v5922_v18 = vpack.i.bf16 %v7176_v39, %v6904_v33  ;;  %v729_v31 = vrot.slane %v7161_v53, 3  ;;  %v731_v8 = vrot.slane %v7170_v55, 3  ;;  %v765_v44 = vrot.slane %v7179_v17, 4 }
  0x8e   : > { %v797_v41 = vrot.slane %v7167_v60, 5  ;;  %v799_v42 = vrot.slane %v7179_v17, 5  ;;  %v831_v0 = vrot.slane %v7167_v60, 6  ;;  %v833_v13 = vrot.slane %v7179_v17, 6 }
  0x8f   : > { %v865_v11 = vrot.slane %v7167_v60, 7  ;;  %v867_v33 = vrot.slane %v7179_v17, 7  ;;  %v899_v63 = vsel %vm503_vm1, %v7161_v53, %v661_v34  ;;  %5923 = vrot.lane.b32.xlu1 %v5922_v18, %s6399_s13  ;;  %v901_v21 = vsel %vm503_vm1, %v7170_v55, %v663_v50 }
  0x90   : > { %v1023_v62 = vrot.slane %v7161_v53, 4  ;;  %v1025_v43 = vrot.slane %v7170_v55, 4  ;;  %v1056_v46 = vsel %vm503_vm1, %v661_v34, %v695_v28  ;;  %v8706_v26 = vpack.i.bf16 %v6824_v38, %v6820_v37 }
  0x91   : > { %v1058_v14 = vsel %vm503_vm1, %v663_v50, %v697_v25  ;;  %v1073_v22 = vsel %vm904_vm0, %v1056_v46, %v729_v31  ;;  %v763_v47 = vrot.slane %v7167_v60, 4  ;;  %v531_v57 = vrot.slane %v457_v20, 7 }
  0x92   : > { %5913 = vrot.lane.b32.xlu0 %v8706_v26, %s6399_s13  ;;  %v1075_v7 = vsel %vm904_vm0, %v1058_v14, %v731_v8  ;;  %v1090_v59 = vsel %vm922_vm2, %v1073_v22, %v1023_v62  ;;  %v532_v58 = vrot.slane %v458_v40, 7  ;;  %v7216_v45 = vsel %vm503_vm1, %v538_v49, 0.0 }
  0x93   : > { %v1092_v3 = vsel %vm922_vm2, %v1075_v7, %v1025_v43  ;;  %v1107_v37 = vsel %vm940_vm3, %v1090_v59, %v797_v41  ;;  %v609_v38 = vsel %vm503_vm1, 0.0, %v531_v57  ;;  %v7222_v4 = vsel %vm503_vm1, %v544_v48, 0.0  ;;  %5933 = vrot.lane.b32.xlu1 %v5932_v56, %s6400_s16 }
  0x94   : > { %v1109_v35 = vsel %vm940_vm3, %v1092_v3, %v799_v42  ;;  %v1124_v27 = vsel %vm958_vm4, %v1107_v37, %v831_v0  ;;  %v533_v30 = vsel %vm503_vm1, %v531_v57, %v532_v58  ;;  %v659_v49 = vrot.slane %v609_v38, 1  ;;  %v467_v37 = vld [vmem:[%s6577_s15 + $0xe0] sm:$0xff] }
  0x95   : > { %v1126_v16 = vsel %vm958_vm4, %v1109_v35, %v833_v13  ;;  %v1141_v12 = vsel %vm976_vm5, %v1124_v27, %v865_v11  ;;  %v693_v24 = vrot.slane %v609_v38, 2  ;;  %v727_v56 = vrot.slane %v609_v38, 3 }
  0x96   : > { %5928 = vrot.lane.b32.xlu0 %v5927_v15, %s6400_s16  ;;  %v1143_v48 = vsel %vm976_vm5, %v1126_v16, %v867_v33  ;;  %v7244_v53 = vsel %vm994_vm6, %v1141_v12, %v7167_v60  ;;  %v761_v32 = vrot.slane %v533_v30, 4  ;;  %v795_v15 = vrot.slane %v533_v30, 5 }
  0x97   : > { %v7248_v36 = vsel %vm994_vm6, %v1143_v48, %v7179_v17  ;;  %v829_v55 = vrot.slane %v533_v30, 6  ;;  %v863_v34 = vrot.slane %v533_v30, 7  ;;  %v897_v50 = vsel %vm503_vm1, %v609_v38, %v659_v49 }
  0x98   : > { %v5942_v18 = vpack.i.bf16 %v7248_v36, %v7244_v53  ;;  %v1021_v20 = vrot.slane %v609_v38, 4  ;;  %v1054_v40 = vsel %vm503_vm1, %v659_v49, %v693_v24  ;;  %v917_v62 = vsel %vm904_vm0, %v899_v63, %v695_v28 }
  0x99   : > { %v1071_v43 = vsel %vm904_vm0, %v1054_v40, %v727_v56  ;;  %v919_v46 = vsel %vm904_vm0, %v901_v21, %v697_v25  ;;  %v935_v26 = vsel %vm922_vm2, %v917_v62, %v729_v31  ;;  %v1228_v14 = vrot.slane %v7216_v45, 1  ;;  %v463_v21 = vld [vmem:[%s6577_s15 + $0xc0] sm:$0xff]  ;;  %v7270_v45 = vld [vmem:[%s6577_s15 + $0xc8] sm:$0xff] }
  0x9a   : > { %5943 = vrot.lane.b32.xlu1 %v5942_v18, %s6394_s24  ;;  %v1088_v22 = vsel %vm922_vm2, %v1071_v43, %v1021_v20  ;;  %v937_v57 = vsel %vm922_vm2, %v919_v46, %v731_v8  ;;  %v953_v7 = vsel %vm940_vm3, %v935_v26, %v763_v47  ;;  %v1231_v59 = vrot.slane %v7222_v4, 1  ;;  %v455_v62 = vld [vmem:[%s6577_s15 + $0x80] sm:$0xff]  ;;  %v7344_v43 = vld [vmem:[%s6577_s15 + $0x88] sm:$0xff] }
  0x9b   : > { %v1105_v28 = vsel %vm940_vm3, %v1088_v22, %v795_v15  ;;  %v955_v63 = vsel %vm940_vm3, %v937_v57, %v765_v44  ;;  %v971_v25 = vsel %vm958_vm4, %v953_v7, %v797_v41  ;;  %v625_v31 = vsel %vm503_vm1, %v532_v58, 0.0  ;;  %v459_v57 = vld [vmem:[%s6577_s15 + $0xa0] sm:$0xff] }
  0x9c   : > { %v1122_v3 = vsel %vm958_vm4, %v1105_v28, %v829_v55  ;;  %v973_v8 = vsel %vm958_vm4, %v955_v63, %v799_v42  ;;  %v989_v47 = vsel %vm976_vm5, %v971_v25, %v831_v0  ;;  %v915_v44 = vsel %vm904_vm0, %v897_v50, %v693_v24  ;;  %v7360_v25 = vld [vmem:[%s6577_s15 + $0xa8] sm:$0xff] }
  0x9d   : > { %v1139_v41 = vsel %vm976_vm5, %v1122_v3, %v863_v34  ;;  %v991_v58 = vsel %vm976_vm5, %v973_v8, %v833_v13  ;;  %v7288_v38 = vsel %vm994_vm6, %v989_v47, %v865_v11  ;;  %v933_v42 = vsel %vm922_vm2, %v915_v44, %v727_v56  ;;  %v7302_v13 = vld [vmem:[%s6577_s15 + $0xe8] sm:$0xff] }
  0x9e   : > { %v7292_v4 = vsel %vm994_vm6, %v1139_v41, %v533_v30  ;;  %v7297_v0 = vsel %vm994_vm6, %v991_v58, %v867_v33  ;;  %v1227_v35 = vrot.slane %v7288_v38, 1  ;;  %v951_v27 = vsel %vm940_vm3, %v933_v42, %v761_v32 }
  0x9f   : > { %v5937_v60 = vpack.i.bf16 %v7292_v4, %v7176_v39  ;;  %v1230_v11 = vrot.slane %v7297_v0, 1  ;;  %v969_v49 = vsel %vm958_vm4, %v951_v27, %v795_v15  ;;  %v1225_v30 = vrot.slane %v625_v31, 1 }
  0xa0   : > { %v7309_v16 = vsel %vm994_vm6, %v1227_v35, %v1228_v14  ;;  %v987_v17 = vsel %vm976_vm5, %v969_v49, %v829_v55  ;;  %v540_v33 = vrot.slane %v463_v21, 7  ;;  %v8646_v12 = vrot.slane %v7270_v45, 7 }
  0xa1   : > { %5938 = vrot.lane.b32.xlu0 %v5937_v60, %s6394_s24  ;;  %v7315_v24 = vsel %vm994_vm6, %v1230_v11, %v1231_v59  ;;  %v7318_v39 = vsel %vm994_vm6, %v987_v17, %v863_v34  ;;  %v546_v56 = vrot.slane %v467_v37, 7  ;;  %v8645_v48 = vrot.slane %v7302_v13, 7  ;;  %s8327_s24 = sand.u32 1, %s6378_s18  }
  0xa2   : > { %v5952_v32 = vpack.i.bf16 %v7315_v24, %v7309_v16  ;;  %v1224_v15 = vrot.slane %v7318_v39, 1  ;;  %v7327_v55 = vsel %vm503_vm1, %v540_v33, %v8646_v12  ;;  %v7330_v50 = vsel %vm503_vm1, 0.0, %v540_v33 }
  0xa3   : > { %v7335_v34 = vsel %vm503_vm1, %v546_v56, %v8645_v48  ;;  %v7338_v18 = vsel %vm503_vm1, 0.0, %v546_v56  ;;  %v662_v20 = vrot.slane %v7330_v50, 1  ;;  %v696_v40 = vrot.slane %v7330_v50, 2 }
  0xa4   : > { %5953 = vrot.lane.b32.xlu1 %v5952_v32, %s8665_s14  ;;  %v7348_v46 = vsel %vm994_vm6, %v1224_v15, %v1225_v30  ;;  %v664_v26 = vrot.slane %v7338_v18, 1  ;;  %v698_v14 = vrot.slane %v7338_v18, 2  ;;  %v730_v22 = vrot.slane %v7330_v50, 3 }
  0xa5   : > { %v5947_v7 = vpack.i.bf16 %v7348_v46, %v7152_v52  ;;  %v8653_v59 = vrot.slane %v7338_v18, 3  ;;  %v764_v28 = vrot.slane %v7327_v55, 4  ;;  %v766_v63 = vrot.slane %v7335_v34, 4 }
  0xa6   : > { %v8652_v31 = vrot.slane %v7327_v55, 5  ;;  %v8651_v21 = vrot.slane %v7335_v34, 5  ;;  %v8650_v3 = vrot.slane %v7327_v55, 6  ;;  %v8649_v8 = vrot.slane %v7335_v34, 6 }
  0xa7   : > { %5948 = vrot.lane.b32.xlu0 %v5947_v7, %s8665_s14  ;;  %v8648_v52 = vrot.slane %v7327_v55, 7  ;;  %v8647_v47 = vrot.slane %v7335_v34, 7  ;;  %v900_v44 = vsel %vm503_vm1, %v7330_v50, %v662_v20  ;;  %v902_v37 = vsel %vm503_vm1, %v7338_v18, %v664_v26 }
  0xa8   : > { %v918_v41 = vsel %vm904_vm0, %v900_v44, %v696_v40  ;;  %v920_v58 = vsel %vm904_vm0, %v902_v37, %v698_v14  ;;  %v528_v42 = vrot.slane %v455_v62, 7  ;;  %v8644_v35 = vrot.slane %v7344_v43, 7 }
  0xa9   : > { %v936_v27 = vsel %vm922_vm2, %v918_v41, %v730_v22  ;;  %v938_v60 = vsel %vm922_vm2, %v920_v58, %v8653_v59  ;;  %v534_v11 = vrot.slane %v459_v57, 7  ;;  %v8643_v49 = vrot.slane %v7360_v25, 7 }
  0xaa   : > { %v954_v30 = vsel %vm940_vm3, %v936_v27, %v764_v28  ;;  %v956_v17 = vsel %vm940_vm3, %v938_v60, %v766_v63  ;;  %v7396_v33 = vsel %vm503_vm1, %v528_v42, %v8644_v35  ;;  %v7399_v56 = vsel %vm503_vm1, 0.0, %v528_v42 }
  0xab   : > { %v972_v32 = vsel %vm958_vm4, %v954_v30, %v8652_v31  ;;  %v974_v15 = vsel %vm958_vm4, %v956_v17, %v8651_v21  ;;  %v7410_v62 = vsel %vm503_vm1, %v534_v11, %v8643_v49  ;;  %v7413_v57 = vsel %vm503_vm1, 0.0, %v534_v11 }
  0xac   : > { %v990_v7 = vsel %vm976_vm5, %v972_v32, %v8650_v3  ;;  %v992_v28 = vsel %vm976_vm5, %v974_v15, %v8649_v8  ;;  %v658_v63 = vrot.slane %v7399_v56, 1  ;;  %v660_v44 = vrot.slane %v7413_v57, 1 }
  0xad   : > { %v7426_v37 = vsel %vm994_vm6, %v990_v7, %v8648_v52  ;;  %v7431_v41 = vsel %vm994_vm6, %v992_v28, %v8647_v47  ;;  %v692_v58 = vrot.slane %v7399_v56, 2  ;;  %v694_v42 = vrot.slane %v7413_v57, 2 }
  0xae   : > { %v5962_v60 = vpack.i.bf16 %v7431_v41, %v7426_v37  ;;  %v726_v30 = vrot.slane %v7399_v56, 3  ;;  %v728_v17 = vrot.slane %v7413_v57, 3  ;;  %v760_v32 = vrot.slane %v7396_v33, 4 }
  0xaf   : > { %v762_v15 = vrot.slane %v7410_v62, 4  ;;  %v794_v7 = vrot.slane %v7396_v33, 5  ;;  %v796_v28 = vrot.slane %v7410_v62, 5  ;;  %v828_v27 = vrot.slane %v7396_v33, 6 }
  0xb0   : > { %5963 = vrot.lane.b32.xlu1 %v5962_v60, %s6393_s22  ;;  %v830_v49 = vrot.slane %v7410_v62, 6  ;;  %v862_v11 = vrot.slane %v7396_v33, 7  ;;  %v864_v35 = vrot.slane %v7410_v62, 7  ;;  %v896_v48 = vsel %vm503_vm1, %v7399_v56, %v658_v63 }
  0xb1   : > { %v898_v12 = vsel %vm503_vm1, %v7413_v57, %v660_v44  ;;  %v1024_v47 = vrot.slane %v7330_v50, 4  ;;  %v914_v60 = vsel %vm904_vm0, %v896_v48, %v692_v58  ;;  %v1026_v8 = vrot.slane %v7338_v18, 4 }
  0xb2   : > { %v916_v52 = vsel %vm904_vm0, %v898_v12, %v694_v42  ;;  %v1057_v3 = vsel %vm503_vm1, %v662_v20, %v696_v40  ;;  %v932_v21 = vsel %vm922_vm2, %v914_v60, %v726_v30  ;;  %v1059_v48 = vsel %vm503_vm1, %v664_v26, %v698_v14 }
  0xb3   : > { %v934_v31 = vsel %vm922_vm2, %v916_v52, %v728_v17  ;;  %v1074_v12 = vsel %vm904_vm0, %v1057_v3, %v730_v22  ;;  %v950_v59 = vsel %vm940_vm3, %v932_v21, %v760_v32  ;;  %v8707_v20 = vrot.slane %v7338_v18, 3 }
  0xb4   : > { %v952_v10 = vsel %vm940_vm3, %v934_v31, %v762_v15  ;;  %v1091_v52 = vsel %vm922_vm2, %v1074_v12, %v1024_v47  ;;  %v968_v60 = vsel %vm958_vm4, %v950_v59, %v794_v7  ;;  %v8708_v50 = vrot.slane %v7327_v55, 5 }
  0xb5   : > { %v1076_v40 = vsel %vm904_vm0, %v1059_v48, %v8707_v20  ;;  %v970_v9 = vsel %vm958_vm4, %v952_v10, %v796_v28  ;;  %v986_v22 = vsel %vm976_vm5, %v968_v60, %v828_v27  ;;  %v8709_v18 = vrot.slane %v7335_v34, 5 }
  0xb6   : > { %v1093_v26 = vsel %vm922_vm2, %v1076_v40, %v1026_v8  ;;  %v1108_v14 = vsel %vm940_vm3, %v1091_v52, %v8708_v50  ;;  %v988_v31 = vsel %vm976_vm5, %v970_v9, %v830_v49  ;;  %v8710_v3 = vrot.slane %v7327_v55, 6 }
  0xb7   : > { %v1110_v21 = vsel %vm940_vm3, %v1093_v26, %v8709_v18  ;;  %v1004_v10 = vsel %vm994_vm6, %v986_v22, %v862_v11  ;;  %v1006_v8 = vsel %vm994_vm6, %v988_v31, %v864_v35  ;;  %v8711_v47 = vrot.slane %v7335_v34, 6 }
  0xb8   : > { %v1125_v59 = vsel %vm958_vm4, %v1108_v14, %v8710_v3  ;;  %v8712_v15 = vrot.slane %v7327_v55, 7  ;;  %v1344_v48 = vrot.slane %v1006_v8, 1  ;;  %v5957_v12 = vpack.i.bf16 %v1006_v8, %v1004_v10 }
  0xb9   : > { %v1127_v32 = vsel %vm958_vm4, %v1110_v21, %v8711_v47  ;;  %v1341_v20 = vrot.slane %v1004_v10, 1  ;;  %v8713_v40 = vrot.slane %v7335_v34, 7  ;;  %v1020_v50 = vrot.slane %v7399_v56, 4 }
  0xba   : > { %v1142_v9 = vsel %vm976_vm5, %v1125_v59, %v8712_v15  ;;  %v1022_v14 = vrot.slane %v7413_v57, 4  ;;  %5958 = vrot.lane.b32.xlu0 %v5957_v12, %s6393_s22  ;;  %v1053_v31 = vsel %vm503_vm1, %v658_v63, %v692_v58  ;;  %v1055_v18 = vsel %vm503_vm1, %v660_v44, %v694_v42 }
  0xbb   : > { %v1144_v52 = vsel %vm976_vm5, %v1127_v32, %v8713_v40  ;;  %v1159_v60 = vsel %vm994_vm6, %v1142_v9, %v7327_v55  ;;  %v8714_v21 = vrot.slane %v7270_v45, 7  ;;  %v1070_v55 = vsel %vm904_vm0, %v1053_v31, %v726_v30  ;;  %v469_v32 = vld [vmem:[%s6577_s15 + $0xf0] sm:$0xff]  ;;  %v470_v40 = vld [vmem:[%s6577_s15 + $0xf8] sm:$0xff]  ;;  %s6404_s15 = smov [#allocation7]  }
  0xbc   : > { %v1161_v26 = vsel %vm994_vm6, %v1144_v52, %v7335_v34  ;;  %v1072_v34 = vsel %vm904_vm0, %v1055_v18, %v728_v17  ;;  %v8715_v56 = vrot.slane %v7302_v13, 7  ;;  %v1087_v63 = vsel %vm922_vm2, %v1070_v55, %v1020_v50 }
  0xbd   : > { %v5972_v22 = vpack.i.bf16 %v1161_v26, %v1159_v60  ;;  %v628_v3 = vsel %vm503_vm1, %v8714_v21, 0.0  ;;  %v1089_v44 = vsel %vm922_vm2, %v1072_v34, %v1022_v14  ;;  %v8716_v45 = vrot.slane %v7344_v43, 7 }
  0xbe   : > { %v630_v57 = vsel %vm503_vm1, %v8715_v56, 0.0  ;;  %v1348_v59 = vrot.slane %v628_v3, 1  ;;  %v1104_v30 = vsel %vm940_vm3, %v1087_v63, %v794_v7  ;;  %v1106_v17 = vsel %vm940_vm3, %v1089_v44, %v796_v28 }
  0xbf   : > { %5973 = vrot.lane.b32.xlu1 %v5972_v22, %s6395_s25  ;;  %v1351_v58 = vrot.slane %v630_v57, 1  ;;  %v624_v42 = vsel %vm503_vm1, %v8716_v45, 0.0  ;;  %v8717_v13 = vrot.slane %v7426_v37, 1  ;;  %v8718_v8 = vrot.slane %v7360_v25, 7 }
  0xc0   : > { %v1121_v15 = vsel %vm958_vm4, %v1104_v30, %v828_v27  ;;  %v1123_v9 = vsel %vm958_vm4, %v1106_v17, %v830_v49  ;;  %v8719_v43 = vrot.slane %v7431_v41, 1  ;;  %v1342_v7 = vrot.slane %v624_v42, 1 }
  0xc1   : > { %v1349_v10 = vsel %vm994_vm6, %v8717_v13, %v1348_v59  ;;  %v626_v47 = vsel %vm503_vm1, %v8718_v8, 0.0  ;;  %v1138_v28 = vsel %vm976_vm5, %v1121_v15, %v862_v11  ;;  %v1140_v37 = vsel %vm976_vm5, %v1123_v9, %v864_v35  ;;  %v6018_v59 = vld [vmem:[%s8609_s1 + $0x8] sm:$0xff]   ;;  %v6019_v15 = vld [vmem:[%s8609_s1] sm:$0xff]  }
  0xc2   : > { %v1352_v12 = vsel %vm994_vm6, %v8719_v43, %v1351_v58  ;;  %v1345_v60 = vrot.slane %v626_v47, 1  ;;  %v1155_v25 = vsel %vm994_vm6, %v1138_v28, %v7396_v33  ;;  %v1157_v27 = vsel %vm994_vm6, %v1140_v37, %v7410_v62  ;;  %v6020_v28 = vld [vmem:[#allocation2 + $0x78] sm:$0xff]  }
  0xc3   : > { %v5982_v52 = vpack.i.bf16 %v1352_v12, %v1349_v10  ;;  %v1343_v49 = vsel %vm994_vm6, %v1341_v20, %v1342_v7  ;;  %v549_v26 = vrot.slane %v469_v32, 7  ;;  %v5967_v41 = vpack.i.bf16 %v1157_v27, %v1155_v25  ;;  %v6022_v37 = vld [vmem:[#allocation2 + $0x38] sm:$0xff]   ;;  %5332 = vmatprep.subr.bf16.mxu1 %v6020_v28  ;;  %v6026_v25 = vld [vmem:[#allocation2 + $0x30] sm:$0xff]   ;;  %v6028_v27 = vld [vmem:[#allocation2 + $0x68] sm:$0xff]  }
  0xc4   : > { %v1346_v50 = vsel %vm994_vm6, %v1344_v48, %v1345_v60  ;;  %v550_v14 = vrot.slane %v470_v40, 7  ;;  %v5987_v56 = vpack.i.bf16 %v7288_v38, %v7318_v39  ;;  %v1572_v10 = vsel %vm904_vm0, %v7094_v54, 0  ;;  %5333 = vmatpush3.bf16.msra.mxu1 %v6022_v37 }
  0xc5   : > { %5983 = vrot.lane.b32.xlu1 %v5982_v52, %s6398_s12  ;;  %v5977_v11 = vpack.i.bf16 %v1346_v50, %v1343_v49  ;;  %v615_v35 = vsel %vm503_vm1, 0.0, %v549_v26  ;;  %5968 = vrot.lane.b32.xlu0 %v5967_v41, %s6395_s25  ;;  %v5997_v12 = vpack.i.bf16 %v7244_v53, %v7292_v4  ;;  %v6007_v60 = vpack.i.bf16 %v7309_v16, %v7348_v46  ;;  %v6021_v53 = vld [vmem:[#allocation2 + $0xf8] sm:$0xff]   ;;  %v6024_v4 = vld [vmem:[#allocation2 + $0x70] sm:$0xff]   ;;  %v6030_v49 = vld [vmem:[#allocation2 + $0x28] sm:$0xff]   ;;  %v5874_v46 = vpop.permute.xlu1 %5873  ;;  %s5004_s25 = sshll.u32 %s8327_s24, 4 }
  0xc6   : > { %v551_v22 = vsel %vm503_vm1, %v549_v26, %v550_v14  ;;  %v665_v33 = vrot.slane %v615_v35, 1  ;;  %v699_v31 = vrot.slane %v615_v35, 2  ;;  %v733_v18 = vrot.slane %v615_v35, 3  ;;  %5699 = vmatpush3.bf16.msra.mxu0 %v1572_v10  ;;  %5334 = vmatprep.subr.bf16.mxu1 %v6024_v4  ;;  %v6032_v26 = vld [vmem:[#allocation2 + $0x60] sm:$0xff]  }
  0xc7   : > { %v767_v62 = vrot.slane %v551_v22, 4  ;;  %v801_v21 = vrot.slane %v551_v22, 5  ;;  %v1027_v3 = vrot.slane %v615_v35, 4  ;;  %v835_v34 = vrot.slane %v551_v22, 6  ;;  %5700 = vmatprep.subr.bf16.mxu0 %v6018_v59  ;;  %v6034_v16 = vld [vmem:[#allocation2 + $0x20] sm:$0xff]  }
  0xc8   : > { %v903_v20 = vsel %vm503_vm1, %v615_v35, %v665_v33  ;;  %v1060_v55 = vsel %vm503_vm1, %v665_v33, %v699_v31  ;;  %v869_v63 = vrot.slane %v551_v22, 7  ;;  %v631_v45 = vsel %vm503_vm1, %v550_v14, 0.0  ;;  %5335 = vmatpush3.bf16.msra.mxu1 %v6026_v25 }
  0xc9   : > { %v921_v48 = vsel %vm904_vm0, %v903_v20, %v699_v31  ;;  %v1077_v57 = vsel %vm904_vm0, %v1060_v55, %v733_v18  ;;  %5978 = vrot.lane.b32.xlu0 %v5977_v11, %s6398_s12  ;;  %v1429_v32 = vrot.slane %v631_v45, 1  ;;  %5336 = vmatprep.subr.bf16.mxu1 %v6028_v27  ;;  %v5875_v55 = vunpack.i.l.bf16 %v5874_v46  ;;  %s5324_s12 = sshll.u32 %s6488_s21, 8 }
  0xca   : > { %v939_v44 = vsel %vm922_vm2, %v921_v48, %v733_v18  ;;  %v1094_v58 = vsel %vm922_vm2, %v1077_v57, %v1027_v3  ;;  %5701 = vmatpush3.bf16.msra.mxu0 %v6018_v59  ;;  %v5876_v3 = vunpack.i.h.bf16 %v5874_v46  ;;  %vm1518_vm14 = vcmask 261120   ;;  %s8532_s14 = scalar_lea.hbm %s8618_s10, %s5324_s12 }
  0xcb   : > { %v957_v42 = vsel %vm940_vm3, %v939_v44, %v767_v62  ;;  %v1111_v30 = vsel %vm940_vm3, %v1094_v58, %v801_v21  ;;  %5702 = vmatprep.subr.bf16.mxu0 %v6019_v15  ;;  %vm1558_vm15 = vcmask 293888  }
  0xcc   : > { %v975_v17 = vsel %vm958_vm4, %v957_v42, %v801_v21  ;;  %v1128_v13 = vsel %vm958_vm4, %v1111_v30, %v835_v34  ;;  %5337 = vmatpush3.bf16.msra.mxu1 %v6030_v49 }
  0xcd   : > { %v993_v8 = vsel %vm976_vm5, %v975_v17, %v835_v34  ;;  %v1145_v47 = vsel %vm976_vm5, %v1128_v13, %v869_v63  ;;  %5988 = vrot.lane.b32.xlu0 %v5987_v56, %s6396_s30  ;;  %5338 = vmatprep.subr.bf16.mxu1 %v6032_v26  ;;  %v5859_v41 = vpop.permute.xlu0 %5858 }
  0xce   : > { %v1011_v9 = vsel %vm994_vm6, %v993_v8, %v869_v63  ;;  %v1162_v43 = vsel %vm994_vm6, %v1145_v47, %v551_v22  ;;  %5703 = vmatpush3.bf16.msra.mxu0 %v6019_v15  ;;  %v5861_v22 = vunpack.i.h.bf16 %v5859_v41  ;;  %v5860_v33 = vunpack.i.l.bf16 %v5859_v41 }
  0xcf   : > { %v1428_v54 = vrot.slane %v1011_v9, 1  ;;  %v5992_v7 = vpack.i.bf16 %v1011_v9, %v7297_v0  ;;  %v6002_v40 = vpack.i.bf16 %v1162_v43, %v7248_v36  ;;  %5372 = vmatprep.subr.bf16.mxu0 %v6021_v53 }
  0xd0   : > { %5339 = vmatpush3.bf16.msra.mxu1 %v6034_v16  ;;  %v1456_v48 = vsel %vm1455_vm7, %v7006_v5, %v5860_v33  ;;  %v1457_v56 = vsel %vm1455_vm7, %v7013_v6, %v5861_v22 }
  0xd1   : > { %5993 = vrot.lane.b32.xlu1 %v5992_v7, %s6396_s30  ;;  %5998 = vrot.lane.b32.xlu0 %v5997_v12, %s6399_s13  ;;  %v1430_v52 = vsel %vm994_vm6, %v1428_v54, %v1429_v32  ;;  %v5884_v50 = vpop.permute.xlu1 %5883  ;;  %s8330_s30 = scalar_lea.vmem [#allocation7], %s5004_s25 }
  0xd2   : > { %v6012_v36 = vpack.i.bf16 %v1430_v52, %v7315_v24  ;;  %v5886_v13 = vunpack.i.h.bf16 %v5884_v50  ;;  %v5885_v10 = vunpack.i.l.bf16 %v5884_v50  ;;  %s4842_s29 = sshll.u32 %s8330_s30, 4  ;;  %s8526_s29 = int_to_ptr.vmem [resolvable:$true] %s4842_s29 }
  0xd3   : > { %s6288_s0 = scalar_lea.vmem %s8526_s29, 256 }
  0xd4   : > { %p6289_p10 = scmp.ne.s32.totalorder %s8526_s29, %s6288_s0 }
  0xd5   : > { %6003 = vrot.lane.b32.xlu1 %v6002_v40, %s6399_s13  ;;  %6008 = vrot.lane.b32.xlu0 %v6007_v60, %s6400_s16 }
  0xd6   : > { %p6290_p12 = pnand %p6289_p10, %p6505_p5 }
  0xd8   : > { %p6291_p8 = pneg %p6290_p12 }
  0xd9   : > { %6013 = vrot.lane.b32.xlu1 %v6012_v36, %s6400_s16  ;;  %s5323_s16 = sshll.u32 %s6558_s26, 6 }
  0xda   : > { %v5864_v24 = vpop.permute.xlu0 %5863  ;;  %s7910_s22 = scalar_lea.vmem %s8617_s9, %s5323_s16 }
  0xdb   : > { %v5866_v18 = vunpack.i.h.bf16 %v5864_v24  ;;  %v5865_v62 = vunpack.i.l.bf16 %v5864_v24 }
  0xdd   : > { %v7594_v14 = vpop.permute.xlu1 %5893  ;;  %v1459_v44 = vsel %vm1455_vm7, %v6932_v29, %v5866_v18  ;;  %v1458_v58 = vsel %vm1455_vm7, %v7086_v61, %v5865_v62 }
  0xde   : > { %v5896_v52 = vunpack.i.h.bf16 %v7594_v14  ;;  %v5895_v60 = vunpack.i.l.bf16 %v7594_v14 }
  0xe7   : > { %v5869_v11 = vpop.permute.xlu0 %5868 }
  0xe8   : > { %v5871_v30 = vunpack.i.h.bf16 %v5869_v11  ;;  %v5870_v17 = vunpack.i.l.bf16 %v5869_v11 }
  0xec   : > { %v5899_v35 = vpop.permute.xlu1 %5898 }
  0xed   : > { %v5901_v21 = vunpack.i.h.bf16 %v5899_v35  ;;  %v5900_v20 = vunpack.i.l.bf16 %v5899_v35 }
  0xef   : > { %v1466_v45 = vsel %vm1464_vm8, %v1457_v56, %v5901_v21  ;;  %v1465_v42 = vsel %vm1464_vm8, %v1456_v48, %v5900_v20 }
  0xf0   : > { %v1474_v61 = vsel %vm1473_vm9, %v1465_v42, %v5870_v17  ;;  %v1475_v32 = vsel %vm1473_vm9, %v1466_v45, %v5871_v30  ;;  %v6025_v30 = vld [vmem:[#allocation2 + $0xf0] sm:$0xff]  }
  0xf3   : > { %v5879_v31 = vpop.permute.xlu0 %5878 }
  0xf4   : > { %v5881_v28 = vunpack.i.h.bf16 %v5879_v31  ;;  %v5880_v37 = vunpack.i.l.bf16 %v5879_v31 }
  0xf6   : > { %v1483_v4 = vsel %vm1482_vm10, %v1474_v61, %v5880_v37  ;;  %v1484_v25 = vsel %vm1482_vm10, %v1475_v32, %v5881_v28 }
  0xf7   : > { %v5889_v63 = vpop.permute.xlu0 %5888 }
  0xf8   : > { %v5904_v34 = vpop.permute.xlu1 %5903  ;;  %v5891_v50 = vunpack.i.h.bf16 %v5889_v63  ;;  %v5890_v24 = vunpack.i.l.bf16 %v5889_v63 }
  0xf9   : > { %v5906_v57 = vunpack.i.h.bf16 %v5904_v34  ;;  %v5905_v59 = vunpack.i.l.bf16 %v5904_v34 }
  0xfb   : > { %v1468_v5 = vsel %vm1464_vm8, %v1459_v44, %v5906_v57  ;;  %v1467_v6 = vsel %vm1464_vm8, %v1458_v58, %v5905_v59  ;;  %v5909_v43 = vpop.permute.xlu0 %5908  ;;  %v6023_v44 = vld [vmem:[#allocation2 + $0xb8] sm:$0xff]  }
  0xfc   : > { %v1477_v8 = vsel %vm1473_vm9, %v1468_v5, %v5876_v3  ;;  %v1476_v29 = vsel %vm1473_vm9, %v1467_v6, %v5875_v55  ;;  %v5919_v47 = vpop.permute.xlu1 %5918  ;;  %v5911_v7 = vunpack.i.h.bf16 %v5909_v43  ;;  %v5910_v40 = vunpack.i.l.bf16 %v5909_v43  ;;  %v6027_v5 = vld [vmem:[#allocation2 + $0xb0] sm:$0xff]   ;;  %v6029_v6 = vld [vmem:[#allocation2 + $0xe8] sm:$0xff]  }
  0xfd   : > { %v5921_v15 = vunpack.i.h.bf16 %v5919_v47  ;;  %v5920_v9 = vunpack.i.l.bf16 %v5919_v47  ;;  %v1485_v12 = vsel %vm1482_vm10, %v1476_v29, %v5885_v10  ;;  %v1486_v54 = vsel %vm1482_vm10, %v1477_v8, %v5886_v13  ;;  %v6031_v10 = vld [vmem:[#allocation2 + $0xa8] sm:$0xff]   ;;  %v6033_v8 = vld [vmem:[#allocation2 + $0xe0] sm:$0xff]  }
  0xfe   : > { %v1493_v26 = vsel %vm1491_vm11, %v1484_v25, %v5911_v7  ;;  %v1492_v16 = vsel %vm1491_vm11, %v1483_v4, %v5910_v40 }
  0xff   : > { %v1494_v36 = vsel %vm1491_vm11, %v1485_v12, %v5920_v9  ;;  %v1495_v27 = vsel %vm1491_vm11, %v1486_v54, %v5921_v15  ;;  %v1501_v21 = vsel %vm1500_vm12, %v1492_v16, %v5890_v24  ;;  %v1502_v20 = vsel %vm1500_vm12, %v1493_v26, %v5891_v50  ;;  %v6035_v9 = vld [vmem:[#allocation2 + $0xa0] sm:$0xff]  }
 0x100   : > { %v1503_v35 = vsel %vm1500_vm12, %v1494_v36, %v5895_v60  ;;  %v1504_v22 = vsel %vm1500_vm12, %v1495_v27, %v5896_v52 }
 0x101   : > { %v5924_v53 = vpop.permute.xlu1 %5923 }
 0x102   : > { %v5926_v46 = vunpack.i.h.bf16 %v5924_v53  ;;  %v5925_v41 = vunpack.i.l.bf16 %v5924_v53 }
 0x104   : > { %v5914_v49 = vpop.permute.xlu0 %5913  ;;  %v1512_v3 = vsel %vm1509_vm13, %v1503_v35, %v5925_v41  ;;  %v1513_v55 = vsel %vm1509_vm13, %v1504_v22, %v5926_v46 }
 0x105   : > { %v5916_v14 = vunpack.i.h.bf16 %v5914_v49  ;;  %v5915_v11 = vunpack.i.l.bf16 %v5914_v49  ;;  %v5934_v33 = vpop.permute.xlu1 %5933 }
 0x106   : > { %v5936_v31 = vunpack.i.h.bf16 %v5934_v33  ;;  %v5935_v18 = vunpack.i.l.bf16 %v5934_v33 }
 0x107   : > { %v1510_v59 = vsel %vm1509_vm13, %v1501_v21, %v5915_v11  ;;  %v1511_v63 = vsel %vm1509_vm13, %v1502_v20, %v5916_v14 }
 0x108   : > { %v5929_v62 = vpop.permute.xlu0 %5928  ;;  %v1521_v56 = vsel %vm1518_vm14, %v1512_v3, %v5935_v18  ;;  %v1522_v57 = vsel %vm1518_vm14, %v1513_v55, %v5936_v31 }
 0x109   : > { %v5931_v34 = vunpack.i.h.bf16 %v5929_v62  ;;  %v5930_v48 = vunpack.i.l.bf16 %v5929_v62  ;;  %v1528_v58 = vpack.c.bf16 %v1522_v57, %v1521_v56 }
 0x10b   : > { %v1519_v45 = vsel %vm1518_vm14, %v1510_v59, %v5930_v48  ;;  %v1520_v42 = vsel %vm1518_vm14, %v1511_v63, %v5931_v34 }
 0x10c   : > { %v1527_v17 = vpack.c.bf16 %v1520_v42, %v1519_v45  ;;  %v5944_v13 = vpop.permute.xlu1 %5943 }
 0x10d   : > { %v5946_v29 = vunpack.i.h.bf16 %v5944_v13  ;;  %v5945_v47 = vunpack.i.l.bf16 %v5944_v13 }
 0x10e   : > { %5704 = vmatprep.mubr.msk.bf16.mxu0 %vm1558_vm15, %v1527_v17 }
 0x10f   : > { %5705 = vmatmul.mubr.msk.bf16.vlgmr.msra.gmra.mxu0 %vm1558_vm15, %v1528_v58  ;;  %v1463_v43 = vsel %vm1455_vm7, %v7297_v0, %v5946_v29  ;;  %v1462_v12 = vsel %vm1455_vm7, %v7288_v38, %v5945_v47 }
 0x110   : > { %5373 = vmatpush3.bf16.msra.mxu0 %v6023_v44 }
 0x111   : > { %5374 = vmatprep.subr.bf16.mxu0 %v6025_v30 }
 0x113   : > { %v5939_v28 = vpop.permute.xlu0 %5938 }
 0x114   : > { %5375 = vmatpush3.bf16.msra.mxu0 %v6027_v5  ;;  %v5941_v11 = vunpack.i.h.bf16 %v5939_v28  ;;  %v5940_v35 = vunpack.i.l.bf16 %v5939_v28 }
 0x115   : > { %5376 = vmatprep.subr.bf16.mxu0 %v6029_v6 }
 0x116   : > { %v5954_v61 = vpop.permute.xlu1 %5953  ;;  %v1461_v3 = vsel %vm1455_vm7, %v7318_v39, %v5941_v11  ;;  %v1460_v55 = vsel %vm1455_vm7, %v6937_v19, %v5940_v35  ;;  %v6044_v11 = vld [vmem:[#allocation2 + $0x48] sm:$0xff]   ;;  %vm7692_vm7 = vmneg %vm503_vm1 }
 0x117   : > { %v5956_v32 = vunpack.i.h.bf16 %v5954_v61  ;;  %v5955_v15 = vunpack.i.l.bf16 %v5954_v61  ;;  %v6045_v35 = vld [vmem:[#allocation2 + $0xc8] sm:$0xff]  }
 0x118   : > { %5377 = vmatpush3.bf16.msra.mxu0 %v6031_v10 }
 0x119   : > { %5378 = vmatprep.subr.bf16.mxu0 %v6033_v8  ;;  %v1471_v54 = vsel %vm1464_vm8, %v1462_v12, %v5955_v15  ;;  %v1472_v7 = vsel %vm1464_vm8, %v1463_v43, %v5956_v32  ;;  %v5949_v4 = vpop.permute.xlu0 %5948 }
 0x11a   : > { %v5951_v22 = vunpack.i.h.bf16 %v5949_v4  ;;  %v5950_v33 = vunpack.i.l.bf16 %v5949_v4 }
 0x11c   : > { %5379 = vmatpush3.bf16.msra.mxu0 %v6035_v9  ;;  %v1469_v57 = vsel %vm1464_vm8, %v1460_v55, %v5950_v33  ;;  %v1470_v59 = vsel %vm1464_vm8, %v1461_v3, %v5951_v22  ;;  %v6046_v22 = vld [vmem:[#allocation2 + $0x8] sm:$0xff]   ;;  %v6054_v3 = vld [vmem:[#allocation2 + $0x1f8] sm:$0xff]   ;;  %v7677_v55 = vld [vmem:[%s8610_s2] ss:$0 sm:$0xff] }
 0x11d   : > { %v6047_v33 = vld [vmem:[#allocation2 + $0x88] sm:$0xff]   ;;  %vm7704_vm8 = vmpackc.low %vm7692_vm7, %vm7692_vm7 }
 0x122   : > { %v5964_v40 = vpop.permute.xlu1 %5963 }
 0x123   : > { %v5966_v37 = vunpack.i.h.bf16 %v5964_v40  ;;  %v5965_v52 = vunpack.i.l.bf16 %v5964_v40 }
 0x125   : > { %v1480_v60 = vsel %vm1473_vm9, %v1471_v54, %v5965_v52  ;;  %v1481_v53 = vsel %vm1473_vm9, %v1472_v7, %v5966_v37 }
 0x12c   : > { %v5959_v0 = vpop.permute.xlu0 %5958 }
 0x12d   : > { %v5961_v18 = vunpack.i.h.bf16 %v5959_v0  ;;  %v5960_v62 = vunpack.i.l.bf16 %v5959_v0 }
 0x12f   : > { %v1478_v45 = vsel %vm1473_vm9, %v1469_v57, %v5960_v62  ;;  %v1479_v42 = vsel %vm1473_vm9, %v1470_v59, %v5961_v18  ;;  %v6049_v18 = vld [vmem:[#allocation2 + $0xc0] sm:$0xff]   ;;  %vm6401_vm9 = vmmov 1  }
 0x130   : > { %v6050_v62 = vld [vmem:[#allocation2] sm:$0xff]  }
 0x131   : > { %v5974_v25 = vpop.permute.xlu1 %5973 }
 0x132   : > { %v5976_v36 = vunpack.i.h.bf16 %v5974_v25  ;;  %v5975_v27 = vunpack.i.l.bf16 %v5974_v25 }
 0x134   : > { %v1489_v38 = vsel %vm1482_vm10, %v1480_v60, %v5975_v27  ;;  %v1490_v49 = vsel %vm1482_vm10, %v1481_v53, %v5976_v36 }
 0x137   : > { %v5984_v26 = vpop.permute.xlu1 %5983  ;;  %v5969_v41 = vpop.permute.xlu0 %5968 }
 0x138   : > { %v5986_v16 = vunpack.i.h.bf16 %v5984_v26  ;;  %v5985_v46 = vunpack.i.l.bf16 %v5984_v26  ;;  %v5971_v21 = vunpack.i.h.bf16 %v5969_v41  ;;  %v5970_v20 = vunpack.i.l.bf16 %v5969_v41  ;;  %v6037_v26 = vld [vmem:[#allocation2 + $0xd8] sm:$0xff]   ;;  %v6040_v41 = vld [vmem:[#allocation2 + $0x50] sm:$0xff]  }
 0x139   : > { %5380 = vmatprep.subr.bf16.mxu0 %v6037_v26 }
 0x13a   : > { %v1498_v50 = vsel %vm1491_vm11, %v1489_v38, %v5985_v46  ;;  %v1499_v24 = vsel %vm1491_vm11, %v1490_v49, %v5986_v16  ;;  %v1487_v30 = vsel %vm1482_vm10, %v1478_v45, %v5970_v20  ;;  %v1488_v39 = vsel %vm1482_vm10, %v1479_v42, %v5971_v21  ;;  %v6036_v49 = vld [vmem:[#allocation2 + $0x58] sm:$0xff]   ;;  %v6051_v21 = vld [vmem:[#allocation2 + $0x80] sm:$0xff]   ;;  %vm7716_vm10 = vmpackc.low %vm7692_vm7, %vm6401_vm9 }
 0x13b   : > { %v5979_v14 = vpop.permute.xlu0 %5978  ;;  %v6038_v16 = vld [vmem:[#allocation2 + $0x18] sm:$0xff]   ;;  %5340 = vmatprep.subr.bf16.mxu1 %v6036_v49 }
 0x13c   : > { %v5981_v34 = vunpack.i.h.bf16 %v5979_v14  ;;  %v5980_v48 = vunpack.i.l.bf16 %v5979_v14  ;;  %v6039_v46 = vld [vmem:[#allocation2 + $0x98] sm:$0xff]   ;;  %5341 = vmatpush3.bf16.msra.mxu1 %v6038_v16  ;;  %v6043_v14 = vld [vmem:[#allocation2 + $0x90] sm:$0xff]  }
 0x13d   : > { %5381 = vmatpush3.bf16.msra.mxu0 %v6039_v46  ;;  %5342 = vmatprep.subr.bf16.mxu1 %v6040_v41  ;;  %v6052_v20 = vld [vmem:[#allocation2 + $0x178] sm:$0xff]   ;;  %v6056_v16 = vld [vmem:[#allocation2 + $0x170] sm:$0xff]  }
 0x13e   : > { %v1496_v5 = vsel %vm1491_vm11, %v1487_v30, %v5980_v48  ;;  %v1497_v6 = vsel %vm1491_vm11, %v1488_v39, %v5981_v34  ;;  %v6058_v46 = vld [vmem:[#allocation2 + $0x1f0] sm:$0xff]  }
 0x13f   : > { %v5989_v31 = vpop.permute.xlu0 %5988 }
 0x140   : > { %v5991_v63 = vunpack.i.h.bf16 %v5989_v31  ;;  %v5990_v44 = vunpack.i.l.bf16 %v5989_v31  ;;  %v6048_v31 = vld [vmem:[#allocation2 + $0x40] sm:$0xff]  }
 0x142   : > { %v1505_v29 = vsel %vm1500_vm12, %v1496_v5, %v5990_v44  ;;  %v1506_v47 = vsel %vm1500_vm12, %v1497_v6, %v5991_v63 }
 0x143   : > { %v5994_v56 = vpop.permute.xlu1 %5993  ;;  %v5999_v58 = vpop.permute.xlu0 %5998 }
 0x144   : > { %v6001_v17 = vunpack.i.h.bf16 %v5999_v58  ;;  %v6000_v19 = vunpack.i.l.bf16 %v5999_v58  ;;  %v5995_v13 = vunpack.i.l.bf16 %v5994_v56  ;;  %v5996_v8 = vunpack.i.h.bf16 %v5994_v56 }
 0x146   : > { %v1514_v12 = vsel %vm1509_vm13, %v1505_v29, %v6000_v19  ;;  %v1515_v54 = vsel %vm1509_vm13, %v1506_v47, %v6001_v17  ;;  %v1507_v7 = vsel %vm1500_vm12, %v1498_v50, %v5995_v13  ;;  %v1508_v52 = vsel %vm1500_vm12, %v1499_v24, %v5996_v8  ;;  %v6041_v50 = vld [vmem:[#allocation2 + $0xd0] sm:$0xff]  }
 0x147   : > { %v6004_v10 = vpop.permute.xlu1 %6003  ;;  %v6009_v61 = vpop.permute.xlu0 %6008  ;;  %v6042_v24 = vld [vmem:[#allocation2 + $0x10] sm:$0xff]   ;;  %5382 = vmatprep.subr.bf16.mxu0 %v6041_v50 }
 0x148   : > { %v6006_v32 = vunpack.i.h.bf16 %v6004_v10  ;;  %v6005_v15 = vunpack.i.l.bf16 %v6004_v10  ;;  %v6011_v9 = vunpack.i.h.bf16 %v6009_v61  ;;  %v6010_v43 = vunpack.i.l.bf16 %v6009_v61  ;;  %5343 = vmatpush3.bf16.msra.mxu1 %v6042_v24  ;;  %5383 = vmatpush3.bf16.msra.mxu0 %v6043_v14  ;;  %v6092_v10 = vld [vmem:[#allocation5 + $0x78] sm:$0xff]  }
 0x149   : > { %5344 = vmatprep.subr.bf16.mxu1 %v6044_v11  ;;  %5384 = vmatprep.subr.bf16.mxu0 %v6045_v35  ;;  %v6057_v35 = vld [vmem:[#allocation2 + $0x130] sm:$0xff]  }
 0x14a   : > { %v1523_v28 = vsel %vm1518_vm14, %v1514_v12, %v6010_v43  ;;  %v1524_v37 = vsel %vm1518_vm14, %v1515_v54, %v6011_v9  ;;  %v1516_v25 = vsel %vm1509_vm13, %v1507_v7, %v6005_v15  ;;  %v1517_v0 = vsel %vm1509_vm13, %v1508_v52, %v6006_v32  ;;  %v6093_v12 = vld [vmem:[#allocation5 + $0x38] sm:$0xff]  }
 0x14b   : > { %v6014_v40 = vpop.permute.xlu1 %6013  ;;  %v1529_v4 = vpack.c.bf16 %v1524_v37, %v1523_v28  ;;  %v8726_v37 = vmov 0.0   ;;  %v7765_v28 = vld [vmem:[#allocation2 + $0x238] sm:$0xff]  }
 0x14c   : > { %v6016_v60 = vunpack.i.h.bf16 %v6014_v40  ;;  %v6015_v53 = vunpack.i.l.bf16 %v6014_v40  ;;  %5345 = vmatpush3.bf16.msra.mxu1 %v6046_v22  ;;  %5385 = vmatpush3.bf16.msra.mxu0 %v6047_v33 }
 0x14d   : > { %5708 = vmatprep.mubr.msk.bf16.mxu0 %vm1558_vm15, %v1529_v4  ;;  %5346 = vmatprep.subr.bf16.mxu1 %v6048_v31 }
 0x14e   : > { %v1525_v36 = vsel %vm1518_vm14, %v1516_v25, %v6015_v53  ;;  %v1526_v27 = vsel %vm1518_vm14, %v1517_v0, %v6016_v60  ;;  %5386 = vmatprep.subr.bf16.mxu0 %v6049_v18  ;;  %v6053_v53 = vld [vmem:[#allocation2 + $0x138] sm:$0xff]  }
 0x14f   : > { %v1530_v38 = vpack.c.bf16 %v1526_v27, %v1525_v36  ;;  %v6055_v27 = vld [vmem:[#allocation2 + $0x1b8] sm:$0xff]  }
 0x150   : > { %5347 = vmatpush3.bf16.msra.mxu1 %v6050_v62  ;;  %5387 = vmatpush3.bf16.msra.mxu0 %v6051_v21  ;;  %v6059_v62 = vld [vmem:[#allocation2 + $0x1b0] sm:$0xff]   ;;  %v6060_v21 = vld [vmem:[#allocation2 + $0x168] sm:$0xff]  }
 0x151   : > { %5709 = vmatmul.mubr.msk.bf16.gmra.mxu0 %vm1558_vm15, %v1530_v38  ;;  %5412 = vmatprep.subr.bf16.mxu1 %v6052_v20  ;;  %v6062_v20 = vld [vmem:[#allocation2 + $0x1e8] sm:$0xff]  }
 0x152   : > { %5452 = vmatprep.subr.bf16.mxu0 %v6054_v3 }
 0x1cf   : > { %v5706_v34 = vpop.f32.mrf.mxu0 }
 0x1d0   : > { %v1617_v48 = vadd.f32 %v5706_v34, %v7677_v55  ;;  %v6061_v34 = vld [vmem:[#allocation2 + $0x128] sm:$0xff]  }
 0x1d1   : > { %v1608_v56 = vpop.f32.mrf.mxu0 }
 0x1d2   : > { %v1641_v57 = vmax.f32 %v1617_v48, 0.0  ;;  %v1609_v59 = vadd.f32 %v7677_v55, %v1608_v56 }
 0x1d3   : > { %v5707_v63 = vpop.f32.mrf.mxu0 }
 0x1d4   : > { %v7681_v44 = vrot.slane %v1641_v57, 7  ;;  %v1639_v58 = vmax.f32 %v1609_v59, 0.0  ;;  %v1620_v45 = vadd.f32 %v5707_v63, %v7677_v55  ;;  %v6063_v57 = vld [vmem:[#allocation2 + $0x1a8] sm:$0xff]   ;;  %v6064_v59 = vld [vmem:[#allocation2 + $0x160] sm:$0xff]  }
 0x1d5   : > { %v1611_v42 = vpop.f32.mrf.mxu0 }
 0x1d6   : > { %v1655_v30 = vrot.slane %v1639_v58, 7  ;;  %v1642_v39 = vmax.f32 %v1620_v45, 0.0  ;;  %v1612_v17 = vadd.f32 %v7677_v55, %v1611_v42  ;;  %v1673_v19 = vsel %vm503_vm1, 0.0, %v7681_v44  ;;  %v6066_v58 = vld [vmem:[#allocation2 + $0x1e0] sm:$0xff]   ;;  %v6068_v42 = vld [vmem:[#allocation2 + $0x158] sm:$0xff]  }
 0x1d7   : > { %v1681_v5 = vsel %vm503_vm1, %v7681_v44, 0.0  ;;  %v1708_v54 = vrot.slane %v1673_v19, 1  ;;  %v1738_v11 = vrot.slane %v1673_v19, 2  ;;  %v6067_v45 = vld [vmem:[#allocation2 + $0x1a0] sm:$0xff]   ;;  %v6072_v19 = vld [vmem:[#allocation2 + $0x150] sm:$0xff]  }
 0x1d8   : > { %v1671_v6 = vsel %vm503_vm1, 0.0, %v1655_v30  ;;  %v1679_v13 = vsel %vm503_vm1, %v1655_v30, 0.0  ;;  %v1640_v8 = vmax.f32 %v1612_v17, 0.0  ;;  %v7696_v15 = vrot.slane %v1642_v39, 7  ;;  %v6069_v39 = vld [vmem:[#allocation2 + $0x118] sm:$0xff]  }
 0x1d9   : > { %v1702_v29 = vrot.slane %v1671_v6, 1  ;;  %v1703_v47 = vrot.slane %v1679_v13, 1  ;;  %v1732_v61 = vrot.slane %v1671_v6, 2  ;;  %v1733_v32 = vrot.slane %v1679_v13, 2  ;;  %v6071_v17 = vld [vmem:[#allocation2 + $0x198] sm:$0xff]   ;;  %v6073_v6 = vld [vmem:[#allocation2 + $0x110] sm:$0xff]  }
 0x1da   : > { %v1656_v9 = vrot.slane %v1640_v8, 7  ;;  %v5093_v52 = vpack.c.bf16 %v1655_v30, %v8726_v37  ;;  %v1709_v60 = vrot.slane %v1681_v5, 1  ;;  %v5118_v41 = vpack.c.bf16 %v7696_v15, %v7681_v44  ;;  %v6075_v13 = vld [vmem:[#allocation2 + $0x190] sm:$0xff]   ;;  %v6076_v8 = vld [vmem:[#allocation2 + $0x148] sm:$0xff]  }
 0x1db   : > { %v7699_v43 = vsel %vm994_vm6, %v1702_v29, %v1703_v47  ;;  %v7709_v7 = vsel %vm976_vm5, %v1732_v61, %v1733_v32  ;;  %v1739_v18 = vrot.slane %v1681_v5, 2  ;;  %v6074_v5 = vld [vmem:[#allocation2 + $0x1d0] sm:$0xff]   ;;  %v6078_v29 = vld [vmem:[#allocation2 + $0x1c8] sm:$0xff]   ;;  %v6080_v32 = vld [vmem:[#allocation2 + $0x140] sm:$0xff]  }
 0x1dc   : > { %v1772_v40 = vpack.c.bf16 %v7699_v43, %v6561_v1  ;;  %v1672_v4 = vsel %vm503_vm1, 0.0, %v1656_v9  ;;  %v1680_v25 = vsel %vm503_vm1, %v1656_v9, 0.0  ;;  %v5113_v0 = vpack.c.bf16 %v1656_v9, %v1655_v30  ;;  %v6070_v30 = vld [vmem:[#allocation2 + $0x1d8] sm:$0xff]   ;;  %v6077_v47 = vld [vmem:[#allocation2 + $0x108] sm:$0xff]  }
 0x1dd   : > { %v1773_v36 = vpack.c.bf16 %v7709_v7, %v6564_v2  ;;  %v1705_v38 = vrot.slane %v1672_v4, 1  ;;  %v1706_v49 = vrot.slane %v1680_v25, 1  ;;  %v1735_v26 = vrot.slane %v1672_v4, 2  ;;  %v6079_v61 = vld [vmem:[#allocation2 + $0x188] sm:$0xff]  }
 0x1de   : > { %2413 = vmatprep.mubr.bf16.mxu1 %v1772_v40  ;;  %5114 = vmatprep.mubr.msk.bf16.mxu0 %vm7704_vm8, %v5113_v0  ;;  %v1736_v50 = vrot.slane %v1680_v25, 2  ;;  %v7735_v14 = vsel %vm994_vm6, %v1708_v54, %v1709_v60  ;;  %v7752_v48 = vpack.c.bf16 %v7681_v44, %v1656_v9  ;;  %v7755_v56 = vsel %vm976_vm5, %v1738_v11, %v1739_v18  ;;  %v6065_v44 = vld [vmem:[#allocation2 + $0x120] sm:$0xff]  }
 0x1df   : > { %5094 = vmatmul.mubr.msk.bf16.vlgmr.msra.gmra.mxu1 %vm7716_vm10, %v5093_v52  ;;  %v7732_v24 = vsel %vm994_vm6, %v1705_v38, %v1706_v49  ;;  %2479 = vmatmul.mubr.bf16.vlgmr.msra.gmra.mxu0 %v1773_v36  ;;  %v6082_v9 = vld [vmem:[#allocation2 + $0x1c0] sm:$0xff]   ;;  %v1674_v4 = vsel %vm503_vm1, 0.0, %v7696_v15  ;;  %v1682_v36 = vsel %vm503_vm1, %v7696_v15, 0.0 }
 0x1e0   : > { %5413 = vmatpush3.bf16.msra.mxu1 %v6053_v53  ;;  %v1775_v22 = vpack.c.bf16 %v7732_v24, %v7699_v43  ;;  %5119 = vmatprep.mubr.msk.bf16.mxu0 %vm7704_vm8, %v5118_v41  ;;  %v7743_v33 = vpack.c.bf16 %v7735_v14, %v7732_v24  ;;  %v7746_v31 = vsel %vm976_vm5, %v1735_v26, %v1736_v50  ;;  %v6081_v54 = vld [vmem:[#allocation2 + $0x100] sm:$0xff]   ;;  %v1712_v50 = vrot.slane %v1682_v36, 1 }
 0x1e1   : > { %5453 = vmatpush3.bf16.msra.mxu0 %v6055_v27  ;;  %5414 = vmatprep.subr.bf16.mxu1 %v6056_v16  ;;  %v1776_v3 = vpack.c.bf16 %v7746_v31, %v7709_v7  ;;  %v7759_v63 = vpack.c.bf16 %v7755_v56, %v7746_v31  ;;  %v6083_v40 = vld [vmem:[#allocation2 + $0x180] sm:$0xff]   ;;  %v1741_v11 = vrot.slane %v1674_v4, 2 }
 0x1e2   : > { %5454 = vmatprep.subr.bf16.mxu0 %v6058_v46  ;;  %2421 = vmatprep.mubr.bf16.mxu1 %v7743_v33  ;;  %v1711_v46 = vrot.slane %v1674_v4, 1 }
 0x1e4   : > { %5415 = vmatpush3.bf16.msra.mxu1 %v6057_v35  ;;  %v1742_v35 = vrot.slane %v1682_v36, 2 }
 0x1e5   : > { %5455 = vmatpush3.bf16.msra.mxu0 %v6059_v62  ;;  %5416 = vmatprep.subr.bf16.mxu1 %v6060_v21 }
 0x1e6   : > { %5456 = vmatprep.subr.bf16.mxu0 %v6062_v20 }
 0x1e7   : > { %5099 = vmatmul.mubr.msk.bf16.gmra.mxu1 %vm7704_vm8, %v7752_v48  ;;  %2487 = vmatmul.mubr.bf16.gmra.mxu0 %v7759_v63 }
 0x1e8   : > { %5417 = vmatpush3.bf16.msra.mxu1 %v6061_v34 }
 0x1e9   : > { %5457 = vmatpush3.bf16.msra.mxu0 %v6063_v57  ;;  %5418 = vmatprep.subr.bf16.mxu1 %v6064_v59 }
 0x1ea   : > { %5458 = vmatprep.subr.bf16.mxu0 %v6066_v58 }
 0x1ec   : > { %5419 = vmatpush3.bf16.msra.mxu1 %v6065_v44 }
 0x1ed   : > { %5459 = vmatpush3.bf16.msra.mxu0 %v6067_v45  ;;  %5420 = vmatprep.subr.bf16.mxu1 %v6068_v42  ;;  %v1713_v42 = vsel %vm994_vm6, %v1711_v46, %v1712_v50  ;;  %v6085_v46 = vld [vmem:[#allocation2 + $0x230] sm:$0xff]  }
 0x1ee   : > { %5460 = vmatprep.subr.bf16.mxu0 %v6070_v30  ;;  %v1743_v30 = vsel %vm976_vm5, %v1741_v11, %v1742_v35  ;;  %v1781_v24 = vpack.c.bf16 %v1713_v42, %v7735_v14  ;;  %v6089_v35 = vld [vmem:[#allocation2 + $0x210] sm:$0xff]  }
 0x1f0   : > { %5421 = vmatpush3.bf16.msra.mxu1 %v6069_v39 }
 0x1f1   : > { %5461 = vmatpush3.bf16.msra.mxu0 %v6071_v17  ;;  %5422 = vmatprep.subr.bf16.mxu1 %v6072_v19 }
 0x1f2   : > { %5462 = vmatprep.subr.bf16.mxu0 %v6074_v5 }
 0x1f4   : > { %5423 = vmatpush3.bf16.msra.mxu1 %v6073_v6 }
 0x1f5   : > { %5463 = vmatpush3.bf16.msra.mxu0 %v6075_v13  ;;  %5424 = vmatprep.subr.bf16.mxu1 %v6076_v8 }
 0x1f6   : > { %5464 = vmatprep.subr.bf16.mxu0 %v6078_v29 }
 0x1f8   : > { %5425 = vmatpush3.bf16.msra.mxu1 %v6077_v47 }
 0x1f9   : > { %5465 = vmatpush3.bf16.msra.mxu0 %v6079_v61  ;;  %5426 = vmatprep.subr.bf16.mxu1 %v6080_v32 }
 0x1fa   : > { %5466 = vmatprep.subr.bf16.mxu0 %v6082_v9 }
 0x1fc   : > { %5427 = vmatpush3.bf16.msra.mxu1 %v6081_v54 }
 0x1fd   : > { %5467 = vmatpush3.bf16.msra.mxu0 %v6083_v40  ;;  %5712 = vmatprep.subr.bf16.mxu1 %v7765_v28 }
 0x1fe   : > { %5504 = vmatprep.subr.bf16.mxu0 %v6092_v10 }
 0x211   : > { %v5710_v52 = vpop.f32.mrf.mxu0 }
 0x212   : > { %v1633_v60 = vadd.f32 %v5710_v52, %v7677_v55 }
 0x213   : > { %v1624_v53 = vpop.f32.mrf.mxu0 }
 0x214   : > { %v1645_v25 = vmax.f32 %v1633_v60, 0.0  ;;  %v1625_v0 = vadd.f32 %v7677_v55, %v1624_v53 }
 0x215   : > { %v5711_v27 = vpop.f32.mrf.mxu0 }
 0x216   : > { %v1661_v38 = vrot.slane %v1645_v25, 7  ;;  %v1643_v49 = vmax.f32 %v1625_v0, 0.0  ;;  %v1636_v26 = vadd.f32 %v5711_v27, %v7677_v55 }
 0x217   : > { %v1627_v16 = vpop.f32.mrf.mxu0 }
 0x218   : > { %v1659_v41 = vrot.slane %v1643_v49, 7  ;;  %v1646_v18 = vmax.f32 %v1636_v26, 0.0  ;;  %v1628_v62 = vadd.f32 %v7677_v55, %v1627_v16  ;;  %v1677_v21 = vsel %vm503_vm1, 0.0, %v1661_v38 }
 0x219   : > { %v1685_v20 = vsel %vm503_vm1, %v1661_v38, 0.0  ;;  %v1720_v5 = vrot.slane %v1677_v21, 1  ;;  %v1750_v0 = vrot.slane %v1677_v21, 2  ;;  %v6090_v21 = vld [vmem:[#allocation2 + $0x208] sm:$0xff]  }
 0x21a   : > { %v1675_v34 = vsel %vm503_vm1, 0.0, %v1659_v41  ;;  %v1683_v57 = vsel %vm503_vm1, %v1659_v41, 0.0  ;;  %v1644_v59 = vmax.f32 %v1628_v62, 0.0  ;;  %v7782_v17 = vrot.slane %v1646_v18, 7 }
 0x21b   : > { %v1714_v58 = vrot.slane %v1675_v34, 1  ;;  %v1715_v44 = vrot.slane %v1683_v57, 1  ;;  %v1744_v45 = vrot.slane %v1675_v34, 2  ;;  %v1745_v39 = vrot.slane %v1683_v57, 2  ;;  %v6091_v34 = vld [vmem:[#allocation2 + $0x200] sm:$0xff]  }
 0x21c   : > { %v1660_v55 = vrot.slane %v1644_v59, 7  ;;  %v5103_v13 = vpack.c.bf16 %v1659_v41, %v7696_v15  ;;  %v1721_v29 = vrot.slane %v1685_v20, 1  ;;  %v5128_v15 = vpack.c.bf16 %v7782_v17, %v1661_v38  ;;  %v6094_v59 = vld [vmem:[#allocation5 + $0xf8] sm:$0xff]  }
 0x21d   : > { %v7785_v19 = vsel %vm994_vm6, %v1714_v58, %v1715_v44  ;;  %v1746_v8 = vsel %vm976_vm5, %v1744_v45, %v1745_v39  ;;  %v1751_v36 = vrot.slane %v1685_v20, 2  ;;  %v1678_v7 = vsel %vm503_vm1, 0.0, %v7782_v17  ;;  %v6095_v58 = vld [vmem:[#allocation5 + $0xb8] sm:$0xff]   ;;  %v6096_v44 = vld [vmem:[#allocation5 + $0x70] sm:$0xff]   ;;  %v6101_v39 = vld [vmem:[#allocation5 + $0x28] sm:$0xff]  }
 0x21e   : > { %v1784_v6 = vpack.c.bf16 %v7785_v19, %v1713_v42  ;;  %v1676_v47 = vsel %vm503_vm1, 0.0, %v1660_v55  ;;  %v1684_v61 = vsel %vm503_vm1, %v1660_v55, 0.0  ;;  %v5123_v32 = vpack.c.bf16 %v1660_v55, %v1659_v41  ;;  %v6086_v41 = vld [vmem:[#allocation2 + $0x228] sm:$0xff]   ;;  %v6097_v45 = vld [vmem:[#allocation5 + $0x30] sm:$0xff]  }
 0x21f   : > { %v7792_v9 = vpack.c.bf16 %v1746_v8, %v1743_v30  ;;  %v1717_v54 = vrot.slane %v1676_v47, 1  ;;  %v1718_v40 = vrot.slane %v1684_v61, 1  ;;  %v1747_v52 = vrot.slane %v1676_v47, 2  ;;  %v6098_v42 = vld [vmem:[#allocation5 + $0xf0] sm:$0xff]   ;;  %v6111_v47 = vld [vmem:[#allocation5 + $0x98] sm:$0xff]  }
 0x220   : > { %2429 = vmatprep.mubr.bf16.mxu1 %v1784_v6  ;;  %5124 = vmatprep.mubr.msk.bf16.mxu0 %vm7704_vm8, %v5123_v32  ;;  %v1748_v60 = vrot.slane %v1684_v61, 2  ;;  %v1722_v4 = vsel %vm994_vm6, %v1720_v5, %v1721_v29  ;;  %v5108_v49 = vpack.c.bf16 %v1661_v38, %v1660_v55  ;;  %v1752_v26 = vsel %vm976_vm5, %v1750_v0, %v1751_v36  ;;  %v6104_v55 = vld [vmem:[#allocation5 + $0x60] sm:$0xff]   ;;  %v6110_v29 = vld [vmem:[#allocation5 + $0xd8] sm:$0xff]   ;;  %v6112_v61 = vld [vmem:[#allocation5 + $0x50] sm:$0xff]  }
 0x221   : > { %5104 = vmatmul.mubr.msk.bf16.gmra.mxu1 %vm7704_vm8, %v5103_v13  ;;  %2495 = vmatmul.mubr.bf16.gmra.mxu0 %v7792_v9  ;;  %v1719_v53 = vsel %vm994_vm6, %v1717_v54, %v1718_v40  ;;  %v1782_v38 = vpack.c.bf16 %v1743_v30, %v7755_v56  ;;  %v1686_v43 = vsel %vm503_vm1, %v7782_v17, 0.0  ;;  %v1767_v31 = vrot.slane %v1678_v7, 2  ;;  %v6100_v30 = vld [vmem:[#allocation5 + $0x68] sm:$0xff]   ;;  %v6106_v5 = vld [vmem:[#allocation5 + $0xe0] sm:$0xff]   ;;  %v6113_v32 = vld [vmem:[#allocation5 + $0x10] sm:$0xff]  }
 0x222   : > { %5129 = vmatprep.mubr.msk.bf16.mxu0 %vm7704_vm8, %v5128_v15  ;;  %v1790_v25 = vpack.c.bf16 %v1722_v4, %v1719_v53  ;;  %v1749_v27 = vsel %vm976_vm5, %v1747_v52, %v1748_v60  ;;  %v1764_v56 = vrot.slane %v1686_v43, 1  ;;  %v1787_v11 = vpack.c.bf16 %v1719_v53, %v7785_v19  ;;  %v6105_v19 = vld [vmem:[#allocation5 + $0x20] sm:$0xff]   ;;  %v6115_v54 = vld [vmem:[#allocation5 + $0x90] sm:$0xff]   ;;  %v6116_v40 = vld [vmem:[#allocation5 + $0x48] sm:$0xff]  }
 0x223   : > { %v1791_v16 = vpack.c.bf16 %v1752_v26, %v1749_v27  ;;  %v5147_v57 = vpack.c.bf16 %v8726_v37, %v7782_v17  ;;  %v6103_v17 = vld [vmem:[#allocation5 + $0xa8] sm:$0xff]   ;;  %v6120_v53 = vld [vmem:[#allocation5 + $0x40] sm:$0xff]   ;;  %v6124_v36 = vld [vmem:[#allocation5 + $0x178] sm:$0xff]  }
 0x224   : > { %2437 = vmatprep.mubr.bf16.mxu1 %v1790_v25  ;;  %v6117_v15 = vld [vmem:[#allocation5 + $0x8] sm:$0xff]   ;;  %v6123_v0 = vld [vmem:[#allocation5 + $0x80] sm:$0xff]  }
 0x225   : > { %v6118_v52 = vld [vmem:[#allocation5 + $0xc8] sm:$0xff]  }
 0x226   : > { %v6119_v60 = vld [vmem:[#allocation5 + $0x88] sm:$0xff]  }
 0x229   : > { %5109 = vmatmul.mubr.msk.bf16.gmra.mxu1 %vm7704_vm8, %v5108_v49  ;;  %2503 = vmatmul.mubr.bf16.gmra.mxu0 %v1791_v16 }
 0x22a   : > { %2543 = vmatprep.mubr.bf16.mxu1 %v1776_v3  ;;  %2608 = vmatprep.mubr.bf16.mxu0 %v7743_v33  ;;  %v1788_v33 = vpack.c.bf16 %v1749_v27, %v1746_v8  ;;  %v1768_v3 = vrot.slane %v1686_v43, 2  ;;  %v6109_v8 = vld [vmem:[#allocation5 + $0x18] sm:$0xff]  }
 0x22b   : > { %v6126_v27 = vld [vmem:[#allocation5 + $0x1f8] sm:$0xff]  }
 0x22c   : > { %v1769_v50 = vsel %vm976_vm5, %v1767_v31, %v1768_v3  ;;  %vm5146_vm5 = vmpackc.low %vm6401_vm9, %vm7692_vm7 }
 0x22d   : > { %v1794_v18 = vpack.c.bf16 %v1769_v50, %v1752_v26 }
 0x231   : > { %2544 = vmatmul.mubr.bf16.vlgmr.msra.gmra.mxu1 %v1775_v22  ;;  %5134 = vmatmul.mubr.msk.bf16.vlgmr.msra.gmra.mxu0 %vm7704_vm8, %v7752_v48  ;;  %v6087_v22 = vld [vmem:[#allocation2 + $0x220] sm:$0xff]   ;;  %v1763_v48 = vrot.slane %v1678_v7, 1 }
 0x232   : > { %5713 = vmatpush3.bf16.msra.mxu1 %v7765_v28  ;;  %2551 = vmatprep.mubr.bf16.mxu1 %v1782_v38  ;;  %v6088_v28 = vld [vmem:[#allocation2 + $0x218] sm:$0xff]  }
 0x233   : > { %2616 = vmatprep.mubr.bf16.mxu0 %v1784_v6  ;;  %5714 = vmatprep.subr.bf16.mxu1 %v6085_v46  ;;  %v1765_v14 = vsel %vm994_vm6, %v1763_v48, %v1764_v56  ;;  %v6107_v6 = vld [vmem:[#allocation5 + $0xa0] sm:$0xff]  }
 0x234   : > { %v1796_v62 = vpack.c.bf16 %v6561_v1, %v1765_v14  ;;  %v1793_v20 = vpack.c.bf16 %v1765_v14, %v1722_v4  ;;  %v1797_v1 = vpack.c.bf16 %v6564_v2, %v1769_v50  ;;  %5505 = vmatpush3.bf16.msra.mxu0 %v6093_v12  ;;  %v6102_v2 = vld [vmem:[#allocation5 + $0xe8] sm:$0xff]   ;;  %v6121_v4 = vld [vmem:[#allocation5] sm:$0xff]  }
 0x235   : > { %5506 = vmatprep.subr.bf16.mxu0 %v6096_v44 }
 0x236   : > { %5715 = vmatpush3.bf16.msra.mxu1 %v6085_v46 }
 0x237   : > { %5716 = vmatprep.subr.bf16.mxu1 %v6086_v41 }
 0x238   : > { %5507 = vmatpush3.bf16.msra.mxu0 %v6097_v45 }
 0x239   : > { %2552 = vmatmul.mubr.bf16.gmra.mxu1 %v1781_v24  ;;  %5139 = vmatmul.mubr.msk.bf16.gmra.mxu0 %vm7704_vm8, %v5103_v13  ;;  %v6108_v13 = vld [vmem:[#allocation5 + $0x58] sm:$0xff]  }
 0x23a   : > { %5717 = vmatpush3.bf16.msra.mxu1 %v6086_v41  ;;  %2559 = vmatprep.mubr.bf16.mxu1 %v1788_v33 }
 0x23b   : > { %2624 = vmatprep.mubr.bf16.mxu0 %v1790_v25  ;;  %5718 = vmatprep.subr.bf16.mxu1 %v6087_v22  ;;  %v6122_v25 = vld [vmem:[#allocation5 + $0xc0] sm:$0xff]  }
 0x23c   : > { %5508 = vmatprep.subr.bf16.mxu0 %v6100_v30 }
 0x23d   : > { %5509 = vmatpush3.bf16.msra.mxu0 %v6101_v39 }
 0x23e   : > { %5719 = vmatpush3.bf16.msra.mxu1 %v6087_v22  ;;  %5510 = vmatprep.subr.bf16.mxu0 %v6104_v55 }
 0x23f   : > { %5720 = vmatprep.subr.bf16.mxu1 %v6088_v28 }
 0x241   : > { %2560 = vmatmul.mubr.bf16.gmra.mxu1 %v1787_v11  ;;  %5144 = vmatmul.mubr.msk.bf16.gmra.mxu0 %vm7704_vm8, %v5108_v49 }
 0x242   : > { %5721 = vmatpush3.bf16.msra.mxu1 %v6088_v28  ;;  %2567 = vmatprep.mubr.bf16.mxu1 %v1794_v18 }
 0x243   : > { %2632 = vmatprep.mubr.bf16.mxu0 %v1796_v62  ;;  %5722 = vmatprep.subr.bf16.mxu1 %v6089_v35 }
 0x244   : > { %5511 = vmatpush3.bf16.msra.mxu0 %v6105_v19 }
 0x245   : > { %5512 = vmatprep.subr.bf16.mxu0 %v6108_v13 }
 0x246   : > { %5723 = vmatpush3.bf16.msra.mxu1 %v6089_v35 }
 0x247   : > { %5724 = vmatprep.subr.bf16.mxu1 %v6090_v21 }
 0x248   : > { %5513 = vmatpush3.bf16.msra.mxu0 %v6109_v8 }
 0x249   : > { %2568 = vmatmul.mubr.bf16.gmra.mxu1 %v1793_v20  ;;  %5148 = vmatmul.mubr.msk.bf16.gmra.mxu0 %vm5146_vm5, %v5147_v57 }
 0x24a   : > { %5725 = vmatpush3.bf16.msra.mxu1 %v6090_v21  ;;  %5728 = vmatprep.mubr.bf16.mxu1 %v7759_v63  ;;  %v6099_v63 = vld [vmem:[#allocation5 + $0xb0] sm:$0xff]  }
 0x24b   : > { %5726 = vmatprep.subr.bf16.mxu1 %v6091_v34  ;;  %5514 = vmatprep.subr.bf16.mxu0 %v6112_v61 }
 0x24c   : > { %5515 = vmatpush3.bf16.msra.mxu0 %v6113_v32 }
 0x24d   : > { %5516 = vmatprep.subr.bf16.mxu0 %v6116_v40 }
 0x24e   : > { %5727 = vmatpush3.bf16.msra.mxu1 %v6091_v34 }
 0x24f   : > { %5526 = vmatprep.subr.bf16.mxu1 %v6094_v59 }
 0x250   : > { %5517 = vmatpush3.bf16.msra.mxu0 %v6117_v15 }
 0x251   : > { %5729 = vmatmul.mubr.bf16.vlgmr.msra.gmra.mxu1 %v7792_v9  ;;  %v6114_v9 = vld [vmem:[#allocation5 + $0xd0] sm:$0xff]   ;;  %5518 = vmatprep.subr.bf16.mxu0 %v6120_v53 }
 0x252   : > { %5732 = vmatprep.mubr.bf16.mxu1 %v1791_v16  ;;  %5527 = vmatpush3.bf16.msra.mxu1 %v6095_v58 }
 0x253   : > { %5528 = vmatprep.subr.bf16.mxu1 %v6098_v42 }
 0x254   : > { %5519 = vmatpush3.bf16.msra.mxu0 %v6121_v4 }
 0x255   : > { %5548 = vmatprep.subr.bf16.mxu0 %v6124_v36 }
 0x256   : > { %5529 = vmatpush3.bf16.msra.mxu1 %v6099_v63 }
 0x257   : > { %5530 = vmatprep.subr.bf16.mxu1 %v6102_v2 }
 0x259   : > { %5733 = vmatmul.mubr.bf16.gmra.mxu1 %v1797_v1 }
 0x25a   : > { %5531 = vmatpush3.bf16.msra.mxu1 %v6103_v17 }
 0x25b   : > { %5532 = vmatprep.subr.bf16.mxu1 %v6106_v5 }
 0x25e   : > { %5533 = vmatpush3.bf16.msra.mxu1 %v6107_v6 }
 0x25f   : > { %5534 = vmatprep.subr.bf16.mxu1 %v6110_v29 }
 0x262   : > { %5535 = vmatpush3.bf16.msra.mxu1 %v6111_v47 }
 0x263   : > { %5536 = vmatprep.subr.bf16.mxu1 %v6114_v9 }
 0x266   : > { %5537 = vmatpush3.bf16.msra.mxu1 %v6115_v54 }
 0x267   : > { %5538 = vmatprep.subr.bf16.mxu1 %v6118_v52 }
 0x26a   : > { %5539 = vmatpush3.bf16.msra.mxu1 %v6119_v60  ;;  %v5018_v60 = vld [vmem:[%s8612_s4] ss:$0 sm:$0xff] }
 0x26b   : > { %5540 = vmatprep.subr.bf16.mxu1 %v6122_v25 }
 0x26e   : > { %5541 = vmatpush3.bf16.msra.mxu1 %v6123_v0 }
 0x26f   : > { %5570 = vmatprep.subr.bf16.mxu1 %v6126_v27 }
 0x29f   : > { %v5348_v49 = vpop.f32.mrf.mxu1  ;;  %v7841_v26 = vpop.f32.mrf.mxu0 }
 0x2a1   : > { %v5349_v16 = vpop.f32.mrf.mxu1  ;;  %v7843_v46 = vpop.f32.mrf.mxu0 }
 0x2a2   : > { %v5350_v15 = vadd.f32 %v5349_v16, %v5348_v49  ;;  %v5390_v49 = vadd.f32 %v7843_v46, %v7841_v26 }
 0x2a3   : > { %v7845_v38 = vpop.f32.mrf.mxu1  ;;  %v7847_v41 = vpop.f32.mrf.mxu0 }
 0x2a4   : > { %v2416_v27 = vadd.f32 %v5350_v15, %v5018_v60 }
 0x2a5   : > { %v7849_v7 = vpop.f32.mrf.mxu1  ;;  %v7851_v43 = vpop.f32.mrf.mxu0 }
 0x2a6   : > { %v2481_v15 = vadd.f32 %v5390_v49, %v2416_v27 }
 0x2a7   : > { %v5354_v24 = vpop.f32.mrf.mxu1  ;;  %v5394_v22 = vpop.f32.mrf.mxu0 }
 0x2a9   : > { %v5355_v33 = vpop.f32.mrf.mxu1  ;;  %v5395_v31 = vpop.f32.mrf.mxu0 }
 0x2aa   : > { %v5356_v9 = vadd.f32 %v5355_v33, %v5354_v24  ;;  %v5396_v37 = vadd.f32 %v5395_v31, %v5394_v22 }
 0x2ab   : > { %v5357_v3 = vpop.f32.mrf.mxu1  ;;  %v5397_v48 = vpop.f32.mrf.mxu0 }
 0x2ac   : > { %v2424_v25 = vadd.f32 %v5356_v9, %v5018_v60 }
 0x2ad   : > { %v5358_v56 = vpop.f32.mrf.mxu1  ;;  %v5398_v28 = vpop.f32.mrf.mxu0 }
 0x2ae   : > { %v5359_v53 = vadd.f32 %v5358_v56, %v5357_v3  ;;  %v2489_v16 = vadd.f32 %v5396_v37, %v2424_v25  ;;  %v5353_v3 = vadd.f32 %v7849_v7, %v7845_v38  ;;  %v5399_v56 = vadd.f32 %v5398_v28, %v5397_v48 }
 0x2af   : > { %v5393_v38 = vadd.f32 %v7851_v43, %v7847_v41 }
 0x2b0   : > { %v2427_v33 = vadd.f32 %v5359_v53, %v5018_v60  ;;  %v2419_v46 = vadd.f32 %v5353_v3, %v5018_v60 }
 0x2e1   : > { %v5360_v50 = vpop.f32.mrf.mxu1  ;;  %v7853_v14 = vpop.f32.mrf.mxu0 }
 0x2e3   : > { %v5361_v11 = vpop.f32.mrf.mxu1  ;;  %v7855_v35 = vpop.f32.mrf.mxu0 }
 0x2e4   : > { %v5362_v22 = vadd.f32 %v5361_v11, %v5360_v50  ;;  %v5402_v7 = vadd.f32 %v7855_v35, %v7853_v14 }
 0x2e5   : > { %v5363_v18 = vpop.f32.mrf.mxu1  ;;  %v7857_v62 = vpop.f32.mrf.mxu0 }
 0x2e6   : > { %v2432_v50 = vadd.f32 %v5362_v22, %v5018_v60 }
 0x2e7   : > { %v5364_v21 = vpop.f32.mrf.mxu1  ;;  %v7859_v20 = vpop.f32.mrf.mxu0 }
 0x2e9   : > { %v5366_v34 = vpop.f32.mrf.mxu1  ;;  %v7861_v57 = vpop.f32.mrf.mxu0 }
 0x2eb   : > { %v5367_v1 = vpop.f32.mrf.mxu1  ;;  %v7863_v10 = vpop.f32.mrf.mxu0 }
 0x2ec   : > { %v5368_v53 = vadd.f32 %v5367_v1, %v5366_v34  ;;  %v5408_v1 = vadd.f32 %v7863_v10, %v7861_v57 }
 0x2ed   : > { %v5369_v12 = vpop.f32.mrf.mxu1  ;;  %v7865_v59 = vpop.f32.mrf.mxu0 }
 0x2ee   : > { %v2440_v34 = vadd.f32 %v5368_v53, %v5018_v60 }
 0x2ef   : > { %v5370_v58 = vpop.f32.mrf.mxu1  ;;  %v7867_v44 = vpop.f32.mrf.mxu0 }
 0x2f0   : > { %v5411_v14 = vadd.f32 %v7867_v44, %v7865_v59  ;;  %v2484_v44 = vadd.f32 %v5393_v38, %v2419_v46  ;;  %v8737_v46 = vld [vmem:[#allocation18_spill] sm:$0xff] }
 0x2f1   : > { %v5428_v45 = vpop.f32.mrf.mxu1  ;;  %v5468_v42 = vpop.f32.mrf.mxu0 }
 0x2f3   : > { %v5429_v63 = vpop.f32.mrf.mxu1  ;;  %v5469_v30 = vpop.f32.mrf.mxu0 }
 0x2f4   : > { %v5470_v11 = vadd.f32 %v5469_v30, %v5468_v42 }
 0x2f5   : > { %v7869_v39 = vpop.f32.mrf.mxu1  ;;  %v7871_v2 = vpop.f32.mrf.mxu0 }
 0x2f7   : > { %v7873_v17 = vpop.f32.mrf.mxu1  ;;  %v7875_v55 = vpop.f32.mrf.mxu0 }
 0x2f8   : > { %8727 = vst [vmem:[#allocation19_spill] sm:$0xff] %v7875_v55  ;;  %v5371_v55 = vadd.f32 %v5370_v58, %v5369_v12 }
 0x2f9   : > { %v5434_v19 = vpop.f32.mrf.mxu1  ;;  %v5474_v5 = vpop.f32.mrf.mxu0 }
 0x2fa   : > { %v2443_v43 = vadd.f32 %v5371_v55, %v5018_v60 }
 0x2fb   : > { %v5435_v6 = vpop.f32.mrf.mxu1  ;;  %v5475_v13 = vpop.f32.mrf.mxu0 }
 0x2fc   : > { %v5436_v23 = vadd.f32 %v5435_v6, %v5434_v19  ;;  %v2492_v19 = vadd.f32 %v5399_v56, %v2427_v33  ;;  %v5365_v6 = vadd.f32 %v5364_v21, %v5363_v18  ;;  %v5476_v37 = vadd.f32 %v5475_v13, %v5474_v5 }
 0x2fd   : > { %v5437_v8 = vpop.f32.mrf.mxu1  ;;  %v5477_v29 = vpop.f32.mrf.mxu0  ;;  %v2497_v13 = vadd.f32 %v5402_v7, %v2432_v50 }
 0x2fe   : > { %v2554_v31 = vadd.f32 %v5436_v23, %v2489_v16  ;;  %v5405_v23 = vadd.f32 %v7859_v20, %v7857_v62  ;;  %v2435_v21 = vadd.f32 %v5365_v6, %v5018_v60 }
 0x2ff   : > { %v5438_v47 = vpop.f32.mrf.mxu1  ;;  %v5478_v61 = vpop.f32.mrf.mxu0  ;;  %v8732_v27 = vld [vmem:[#allocation19_spill] sm:$0xff] }
 0x300   : > { %v5439_v9 = vadd.f32 %v5438_v47, %v5437_v8  ;;  %v2619_v18 = vadd.f32 %v5476_v37, %v2554_v31  ;;  %v5479_v12 = vadd.f32 %v5478_v61, %v5477_v29  ;;  %v2500_v8 = vadd.f32 %v5405_v23, %v2435_v21 }
 0x301   : > { %v5440_v32 = vpop.f32.mrf.mxu1  ;;  %v7877_v54 = vpop.f32.mrf.mxu0  ;;  %v2508_v29 = vadd.f32 %v5411_v14, %v2443_v43 }
 0x302   : > { %8728 = vst [vmem:[#allocation20_spill] sm:$0xff] %v7877_v54  ;;  %v2557_v48 = vadd.f32 %v5439_v9, %v2492_v19 }
 0x303   : > { %v5441_v40 = vpop.f32.mrf.mxu1  ;;  %v7879_v52 = vpop.f32.mrf.mxu0 }
 0x304   : > { %8729 = vst [vmem:[#allocation21_spill] sm:$0xff] %v7879_v52  ;;  %v5430_v52 = vadd.f32 %v5429_v63, %v5428_v45  ;;  %v5433_v63 = vadd.f32 %v7873_v17, %v7869_v39  ;;  %v5442_v62 = vadd.f32 %v5441_v40, %v5440_v32  ;;  %v2622_v10 = vadd.f32 %v5479_v12, %v2557_v48 }
 0x305   : > { %v5443_v4 = vpop.f32.mrf.mxu1  ;;  %v7884_v0 = vpop.f32.mrf.mxu0  ;;  %v2505_v39 = vadd.f32 %v5408_v1, %v2440_v34 }
 0x306   : > { %8730 = vst [vmem:[#allocation22_spill] sm:$0xff] %v7884_v0  ;;  %v2546_v26 = vadd.f32 %v5430_v52, %v2481_v15  ;;  %v2549_v40 = vadd.f32 %v5433_v63, %v2484_v44  ;;  %v2562_v52 = vadd.f32 %v5442_v62, %v2497_v13 }
 0x307   : > { %v5444_v36 = vpop.f32.mrf.mxu1  ;;  %v7886_v24 = vpop.f32.mrf.mxu0 }
 0x308   : > { %8731 = vst [vmem:[#allocation23_spill] sm:$0xff] %v7886_v24  ;;  %v2611_v58 = vadd.f32 %v5470_v11, %v2546_v26  ;;  %v5445_v20 = vadd.f32 %v5444_v36, %v5443_v4 }
 0x309   : > { %v5446_v51 = vpop.f32.mrf.mxu1  ;;  %v7892_v54 = vpop.f32.mrf.mxu0  ;;  %v8733_v33 = vld [vmem:[#allocation20_spill] sm:$0xff] }
 0x30b   : > { %v5447_v0 = vpop.f32.mrf.mxu1  ;;  %v5487_v28 = vpop.f32.mrf.mxu0  ;;  %v8734_v49 = vld [vmem:[#allocation21_spill] sm:$0xff] }
 0x30c   : > { %v5448_v30 = vadd.f32 %v5447_v0, %v5446_v51  ;;  %v2565_v51 = vadd.f32 %v5445_v20, %v2500_v8  ;;  %v5482_v16 = vadd.f32 %v8734_v49, %v8733_v33  ;;  %v5488_v31 = vadd.f32 %v5487_v28, %v7892_v54 }
 0x30d   : > { %v5449_v24 = vpop.f32.mrf.mxu1  ;;  %v5489_v42 = vpop.f32.mrf.mxu0  ;;  %v8735_v9 = vld [vmem:[#allocation22_spill] sm:$0xff] }
 0x30e   : > { %v2570_v25 = vadd.f32 %v5448_v30, %v2505_v39  ;;  %v2627_v26 = vadd.f32 %v5482_v16, %v2562_v52 }
 0x30f   : > { %v5450_v45 = vpop.f32.mrf.mxu1  ;;  %v5490_v60 = vpop.f32.mrf.mxu0  ;;  %v8736_v15 = vld [vmem:[#allocation23_spill] sm:$0xff] }
 0x310   : > { %v5451_v55 = vadd.f32 %v5450_v45, %v5449_v24  ;;  %v5473_v24 = vadd.f32 %v8732_v27, %v7871_v2  ;;  %v5485_v22 = vadd.f32 %v8736_v15, %v8735_v9  ;;  %v5491_v19 = vadd.f32 %v5490_v60, %v5489_v42 }
 0x311   : > { %v5730_v41 = vpop.f32.mrf.mxu1  ;;  %v2942_v2 = vrot.slane %v8737_v46, 1  ;;  %v2635_v7 = vadd.f32 %v5488_v31, %v2570_v25 }
 0x312   : > { %v2684_v35 = vadd.f32 %v5730_v41, %v2619_v18  ;;  %v2573_v0 = vadd.f32 %v5451_v55, %v2508_v29  ;;  %v2614_v53 = vadd.f32 %v5473_v24, %v2549_v40  ;;  %v2630_v45 = vadd.f32 %v5485_v22, %v2565_v51 }
 0x313   : > { %v2675_v57 = vpop.f32.mrf.mxu1 }
 0x314   : > { %v2708_v5 = vmax.f32 %v2684_v35, 0.0  ;;  %v2676_v59 = vadd.f32 %v2675_v57, %v2611_v58  ;;  %v2638_v48 = vadd.f32 %v5491_v19, %v2573_v0 }
 0x315   : > { %v5731_v17 = vpop.f32.mrf.mxu1 }
 0x316   : > { %2716 = vst [vmem:[%s7910_s22 + $0x10] sm:$0xff] %v2708_v5  ;;  %v2732_v47 = vrot.slane %v2708_v5, 7  ;;  %v2706_v61 = vmax.f32 %v2676_v59, 0.0  ;;  %v2687_v32 = vadd.f32 %v5731_v17, %v2622_v10 }
 0x317   : > { %v2678_v4 = vpop.f32.mrf.mxu1 }
 0x318   : > { %2714 = vst [vmem:[%s7910_s22] sm:$0xff] %v2706_v61  ;;  %v2709_v36 = vmax.f32 %v2687_v32, 0.0  ;;  %v2730_v3 = vrot.slane %v2706_v61, 7  ;;  %v7922_v6 = vsel %vm503_vm1, 0.0, %v2732_v47  ;;  %v7927_v38 = vsel %vm503_vm1, %v2732_v47, 0.0 }
 0x319   : > { %v5734_v56 = vpop.f32.mrf.mxu1  ;;  %v8663_v50 = vrot.slane %v7922_v6, 1  ;;  %v2679_v23 = vadd.f32 %v2678_v4, %v2614_v53  ;;  %v2788_v18 = vrot.slane %v7922_v6, 2  ;;  %v8661_v12 = vrot.slane %v7922_v6, 3 }
 0x31a   : > { %2717 = vst [vmem:[%s7910_s22 + $0x18] sm:$0xff] %v2709_v36  ;;  %v7931_v54 = vsel %vm503_vm1, 0.0, %v2730_v3  ;;  %v2733_v28 = vrot.slane %v2709_v36, 7  ;;  %v2700_v21 = vadd.f32 %v5734_v56, %v2635_v7  ;;  %v2828_v41 = vrot.slane %v7927_v38, 4 }
 0x31b   : > { %v2691_v37 = vpop.f32.mrf.mxu1  ;;  %v2707_v14 = vmax.f32 %v2679_v23, 0.0  ;;  %v7940_v35 = vsel %vm503_vm1, %v2730_v3, 0.0  ;;  %v2770_v58 = vrot.slane %v7931_v54, 1  ;;  %v2844_v20 = vsel %vm503_vm1, %v7922_v6, %v8663_v50 }
 0x31c   : > { %v2692_v34 = vadd.f32 %v2691_v37, %v2627_v26  ;;  %v7937_v43 = vsel %vm503_vm1, 0.0, %v2733_v28  ;;  %v2786_v42 = vrot.slane %v7931_v54, 2  ;;  %v2712_v10 = vmax.f32 %v2700_v21, 0.0 }
 0x31d   : > { %v5735_v11 = vpop.f32.mrf.mxu1  ;;  %v2773_v63 = vrot.slane %v7937_v43, 1  ;;  %v2789_v62 = vrot.slane %v7937_v43, 2  ;;  %2715 = vst [vmem:[%s7910_s22 + $0x8] sm:$0xff] %v2707_v14  ;;  %v2731_v57 = vrot.slane %v2707_v14, 7  ;;  %v7952_v30 = vsel %vm503_vm1, %v2733_v28, 0.0 }
 0x31e   : > { %v2703_v1 = vadd.f32 %v5735_v11, %v2638_v48  ;;  %v2710_v5 = vmax.f32 %v2692_v34, 0.0  ;;  %v2805_v44 = vrot.slane %v7937_v43, 3  ;;  %2720 = vst [vmem:[%s7910_s22 + $0x30] sm:$0xff] %v2712_v10  ;;  %v2736_v39 = vrot.slane %v2712_v10, 7 }
 0x31f   : > { %v2845_v55 = vsel %vm503_vm1, %v7937_v43, %v2773_v63  ;;  %v7963_v8 = vsel %vm503_vm1, 0.0, %v2731_v57  ;;  %v2694_v17 = vpop.f32.mrf.mxu1  ;;  %v8662_v29 = vrot.slane %v7931_v54, 3  ;;  %v2842_v47 = vsel %vm503_vm1, %v7931_v54, %v2770_v58 }
 0x320   : > { %v2713_v59 = vmax.f32 %v2703_v1, 0.0  ;;  %v2853_v13 = vsel %vm904_vm0, %v2845_v55, %v2789_v62  ;;  %v2771_v61 = vrot.slane %v7963_v8, 1  ;;  %v2787_v32 = vrot.slane %v7963_v8, 2  ;;  %2718 = vst [vmem:[%s7910_s22 + $0x20] sm:$0xff] %v2710_v5 }
 0x321   : > { %v2826_v40 = vrot.slane %v7940_v35, 4  ;;  %v2829_v52 = vrot.slane %v7952_v30, 4  ;;  %v2861_v60 = vsel %vm922_vm2, %v2853_v13, %v2805_v44  ;;  %v7981_v4 = vsel %vm503_vm1, %v2731_v57, 0.0 }
 0x322   : > { %2721 = vst [vmem:[%s7910_s22 + $0x38] sm:$0xff] %v2713_v59  ;;  %v2803_v51 = vrot.slane %v7963_v8, 3  ;;  %v2843_v25 = vsel %vm503_vm1, %v7963_v8, %v2771_v61  ;;  %v7989_v0 = vsel %vm503_vm1, 0.0, %v2736_v39  ;;  %v2695_v36 = vadd.f32 %v2694_v17, %v2630_v45 }
 0x323   : > { %v2851_v27 = vsel %vm904_vm0, %v2843_v25, %v2787_v32  ;;  %v2776_v24 = vrot.slane %v7989_v0, 1  ;;  %v2850_v33 = vsel %vm904_vm0, %v2842_v47, %v2786_v42  ;;  %v2852_v49 = vsel %vm904_vm0, %v2844_v20, %v2788_v18 }
 0x324   : > { %v8002_v16 = vsel %vm940_vm3, %v2861_v60, %v2829_v52  ;;  %v2877_v3 = vrot.slane %v7937_v43, 4  ;;  %v2827_v56 = vrot.slane %v7981_v4, 4  ;;  %v2859_v9 = vsel %vm922_vm2, %v2851_v27, %v2803_v51 }
 0x325   : > { %v2893_v15 = vrot.slane %v7952_v30, 5  ;;  %v2875_v22 = vrot.slane %v7963_v8, 4  ;;  %v8012_v31 = vsel %vm503_vm1, %v2736_v39, 0.0  ;;  %v2734_v19 = vrot.slane %v2710_v5, 7 }
 0x326   : > { %v8015_v53 = vsel %vm940_vm3, %v2859_v9, %v2827_v56  ;;  %v2792_v26 = vrot.slane %v7989_v0, 2  ;;  %v2737_v37 = vrot.slane %v2713_v59, 7  ;;  %v2711_v7 = vmax.f32 %v2695_v36, 0.0 }
 0x327   : > { %v2944_v48 = vrot.slane %v8002_v16, 1  ;;  %v2891_v45 = vrot.slane %v7981_v4, 5  ;;  %v2848_v28 = vsel %vm503_vm1, %v7989_v0, %v2776_v24  ;;  %v8025_v23 = vsel %vm503_vm1, 0.0, %v2734_v19 }
 0x328   : > { %v8664_v11 = vrot.slane %v7989_v0, 3  ;;  %v8029_v21 = vsel %vm503_vm1, %v2734_v19, 0.0  ;;  %v2774_v34 = vrot.slane %v8025_v23, 1  ;;  %v2790_v1 = vrot.slane %v8025_v23, 2  ;;  %2719 = vst [vmem:[%s7910_s22 + $0x28] sm:$0xff] %v2711_v7  ;;  %s6292_s22 = sshll.u32 %s6404_s15, 4  ;;  %s6293_s22 = int_to_ptr.vmem [resolvable:$false] %s6292_s22 }
 0x329   : > { %v2943_v14 = vrot.slane %v8015_v53, 1  ;;  %v5149_v20 = vcombine.low %v8737_v46, %v8015_v53  ;;  %v2832_v57 = vrot.slane %v8012_v31, 4  ;;  %v8039_v10 = vsel %vm503_vm1, 0.0, %v2737_v37  ;;  %p6295_p11 = scmp.lt.s32.totalorder %s8526_s29, %s6293_s22 }
 0x32a   : > { %v2806_v55 = vrot.slane %v8025_v23, 3  ;;  %v2846_v5 = vsel %vm503_vm1, %v8025_v23, %v2774_v34  ;;  %v2856_v59 = vsel %vm904_vm0, %v2848_v28, %v2792_v26  ;;  %v2858_v13 = vsel %vm922_vm2, %v2850_v33, %v8662_v29 }
 0x32b   : > { %v2830_v39 = vrot.slane %v8029_v21, 4  ;;  %v8054_v17 = vsel %vm503_vm1, %v2737_v37, 0.0  ;;  %v2777_v47 = vrot.slane %v8039_v10, 1  ;;  %v2793_v52 = vrot.slane %v8039_v10, 2 }
 0x32c   : > { %v2809_v60 = vrot.slane %v8039_v10, 3  ;;  %v2735_v4 = vrot.slane %v2711_v7, 7  ;;  %v2854_v25 = vsel %vm904_vm0, %v2846_v5, %v2790_v1  ;;  %v2860_v36 = vsel %vm922_vm2, %v2852_v49, %v8661_v12 }
 0x32d   : > { %v2881_v27 = vrot.slane %v8039_v10, 4  ;;  %v2862_v33 = vsel %vm922_vm2, %v2854_v25, %v2806_v55  ;;  %v2864_v56 = vsel %vm922_vm2, %v2856_v59, %v8664_v11  ;;  %v2866_v9 = vsel %vm940_vm3, %v2858_v13, %v2826_v40 }
 0x32e   : > { %v2751_v19 = vsel %vm503_vm1, 0.0, %v2735_v4  ;;  %v2759_v37 = vsel %vm503_vm1, %v2735_v4, 0.0  ;;  %v2868_v49 = vsel %vm940_vm3, %v2860_v36, %v2828_v41  ;;  %v2870_v7 = vsel %vm940_vm3, %v2862_v33, %v2830_v39 }
 0x32f   : > { %v2775_v28 = vrot.slane %v2751_v19, 1  ;;  %v2791_v5 = vrot.slane %v2751_v19, 2  ;;  %v2807_v12 = vrot.slane %v2751_v19, 3  ;;  %v2831_v25 = vrot.slane %v2759_v37, 4 }
 0x330   : > { %v2879_v29 = vrot.slane %v2751_v19, 4  ;;  %v2895_v50 = vrot.slane %v2759_v37, 5  ;;  %v2872_v59 = vsel %vm940_vm3, %v2864_v56, %v2832_v57  ;;  %v5152_v11 = vcombine.low %v2866_v9, %v2868_v49 }
 0x331   : > { %v2847_v40 = vsel %vm503_vm1, %v2751_v19, %v2775_v28  ;;  %v5160_v13 = vcombine.low %v2870_v7, %v2872_v59  ;;  %v2907_v41 = vsel %vm503_vm1, %v2771_v61, %v2787_v32  ;;  %v2909_v39 = vsel %vm503_vm1, %v2773_v63, %v2789_v62 }
 0x332   : > { %v2855_v4 = vsel %vm904_vm0, %v2847_v40, %v2791_v5  ;;  %v2911_v57 = vsel %vm503_vm1, %v2775_v28, %v2791_v5  ;;  %v2915_v36 = vsel %vm904_vm0, %v2907_v41, %v2803_v51  ;;  %v2917_v33 = vsel %vm904_vm0, %v2909_v39, %v2805_v44  ;;  %v6125_v40 = vld [vmem:[#allocation5 + $0x138] sm:$0xff]  }
 0x333   : > { %v2863_v61 = vsel %vm922_vm2, %v2855_v4, %v2807_v12  ;;  %v3017_v32 = vpack.c.bf16 %v5160_v13, %v5152_v11  ;;  %v2919_v56 = vsel %vm904_vm0, %v2911_v57, %v2807_v12  ;;  %v2923_v19 = vsel %vm922_vm2, %v2915_v36, %v2875_v22  ;;  %v6127_v41 = vld [vmem:[#allocation5 + $0x1b8] sm:$0xff]   ;;  %v6130_v4 = vld [vmem:[#allocation5 + $0x1f0] sm:$0xff]  }
 0x334   : > { %v8103_v63 = vsel %vm940_vm3, %v2863_v61, %v2831_v25  ;;  %v2925_v62 = vsel %vm922_vm2, %v2917_v33, %v2877_v3  ;;  %v2927_v8 = vsel %vm922_vm2, %v2919_v56, %v2879_v29  ;;  %v2931_v51 = vsel %vm940_vm3, %v2923_v19, %v2891_v45  ;;  %v8738_v3 = vld [vmem:[#allocation17_spill] sm:$0xff]  ;;  %v6131_v56 = vld [vmem:[#allocation5 + $0x1b0] sm:$0xff]   ;;  %v6132_v19 = vld [vmem:[#allocation5 + $0x168] sm:$0xff]  }
 0x335   : > { %v2945_v44 = vrot.slane %v8103_v63, 1  ;;  %v5157_v11 = vcombine.low %v8002_v16, %v8103_v63  ;;  %3679 = vmatprep.mubr.bf16.mxu1 %v3017_v32  ;;  %v2933_v12 = vsel %vm940_vm3, %v2925_v62, %v2893_v15  ;;  %v2935_v22 = vsel %vm940_vm3, %v2927_v8, %v2895_v50  ;;  %v6129_v32 = vld [vmem:[#allocation5 + $0x130] sm:$0xff]   ;;  %v6134_v8 = vld [vmem:[#allocation5 + $0x1e8] sm:$0xff]  }
 0x336   : > { %v2849_v43 = vsel %vm503_vm1, %v8039_v10, %v2777_v47  ;;  %v5150_v37 = vcombine.low %v8738_v3, %v2931_v51  ;;  %v5158_v29 = vcombine.low %v2933_v12, %v2935_v22  ;;  %v2950_v28 = vrot.slane %v2866_v9, 1  ;;  %v6137_v3 = vld [vmem:[#allocation5 + $0x120] sm:$0xff]  }
 0x337   : > { %v3014_v45 = vpack.c.bf16 %v5157_v11, %v5149_v20  ;;  %v5151_v5 = vcombine.low %v2942_v2, %v2943_v14  ;;  %v5159_v30 = vcombine.low %v2944_v48, %v2945_v44  ;;  %v2952_v25 = vrot.slane %v2870_v7, 1  ;;  %v6128_v2 = vld [vmem:[#allocation5 + $0x170] sm:$0xff]   ;;  %v6133_v11 = vld [vmem:[#allocation5 + $0x128] sm:$0xff]  }
 0x338   : > { %v3015_v15 = vpack.c.bf16 %v5158_v29, %v5150_v37  ;;  %v2951_v50 = vrot.slane %v2868_v49, 1  ;;  %v2953_v13 = vrot.slane %v2872_v59, 1  ;;  %v2913_v39 = vsel %vm503_vm1, %v2777_v47, %v2793_v52  ;;  %v6139_v37 = vld [vmem:[#allocation5 + $0x1a0] sm:$0xff]   ;;  %v6140_v29 = vld [vmem:[#allocation5 + $0x158] sm:$0xff]  }
 0x339   : > { %v2897_v20 = vrot.slane %v8054_v17, 5  ;;  %v3016_v9 = vpack.c.bf16 %v5159_v30, %v5151_v5  ;;  %v2921_v46 = vsel %vm904_vm0, %v2913_v39, %v2809_v60  ;;  %v2857_v59 = vsel %vm904_vm0, %v2849_v43, %v2793_v52  ;;  %v6144_v5 = vld [vmem:[#allocation5 + $0x150] sm:$0xff]  }
 0x33a   : > { %3638 = vmatprep.mubr.bf16.mxu0 %v3015_v15  ;;  %v5154_v7 = vcombine.low %v2950_v28, %v2951_v50  ;;  %v5162_v57 = vcombine.low %v2952_v25, %v2953_v13  ;;  %v2929_v49 = vsel %vm922_vm2, %v2921_v46, %v2881_v27  ;;  %v5156_v33 = vcombine.low %v2931_v51, %v2933_v12  ;;  %v6141_v28 = vld [vmem:[#allocation5 + $0x118] sm:$0xff]   ;;  %v6146_v30 = vld [vmem:[#allocation5 + $0x1d0] sm:$0xff]   ;;  %v6148_v13 = vld [vmem:[#allocation5 + $0x148] sm:$0xff]  }
 0x33b   : > { %3639 = vmatmul.mubr.bf16.vlgmr.msra.gmra.mxu0 %v3014_v45  ;;  %3680 = vmatmul.mubr.bf16.vlgmr.msra.gmra.mxu1 %v3016_v9  ;;  %v2937_v47 = vsel %vm940_vm3, %v2929_v49, %v2897_v20  ;;  %v2833_v27 = vrot.slane %v8054_v17, 4  ;;  %v2865_v52 = vsel %vm922_vm2, %v2857_v59, %v2809_v60  ;;  %v8149_v12 = vcombine.low %v2943_v14, %v2944_v48  ;;  %v6135_v17 = vld [vmem:[#allocation5 + $0x1a8] sm:$0xff]   ;;  %v6138_v60 = vld [vmem:[#allocation5 + $0x1e0] sm:$0xff]   ;;  %v6142_v14 = vld [vmem:[#allocation5 + $0x1d8] sm:$0xff]  }
 0x33c   : > { %5549 = vmatpush3.bf16.msra.mxu0 %v6125_v40  ;;  %v3019_v36 = vpack.c.bf16 %v5162_v57, %v5154_v7  ;;  %5571 = vmatpush3.bf16.msra.mxu1 %v6127_v41  ;;  %v5164_v61 = vcombine.low %v2935_v22, %v2937_v47  ;;  %v6136_v22 = vld [vmem:[#allocation5 + $0x160] sm:$0xff]   ;;  %v6143_v45 = vld [vmem:[#allocation5 + $0x198] sm:$0xff]   ;;  %v2906_v25 = vsel %vm503_vm1, %v2770_v58, %v2786_v42  ;;  %v8739_v40 = vrot.slane %v7922_v6, 1  ;;  %v6147_v42 = vld [vmem:[#allocation5 + $0x190] sm:$0xff]  }
 0x33d   : > { %5550 = vmatprep.subr.bf16.mxu0 %v6128_v2  ;;  %5572 = vmatprep.subr.bf16.mxu1 %v6130_v4  ;;  %v8143_v51 = vsel %vm940_vm3, %v2865_v52, %v2833_v27  ;;  %v2912_v15 = vsel %vm503_vm1, %v2776_v24, %v2792_v26  ;;  %v2878_v58 = vrot.slane %v8025_v23, 4  ;;  %v6150_v24 = vld [vmem:[#allocation5 + $0x1c8] sm:$0xff]   ;;  %v8740_v26 = vrot.slane %v7931_v54, 3  ;;  %v6152_v49 = vld [vmem:[#allocation5 + $0x140] sm:$0xff]  }
 0x33e   : > { %3720 = vmatprep.mubr.bf16.mxu0 %v3019_v36  ;;  %v3021_v62 = vpack.c.bf16 %v5164_v61, %v5156_v33  ;;  %v2955_v10 = vrot.slane %v8143_v51, 1  ;;  %v2908_v50 = vsel %vm503_vm1, %v8739_v40, %v2788_v18  ;;  %v2874_v20 = vrot.slane %v7931_v54, 4  ;;  %v6149_v46 = vld [vmem:[#allocation5 + $0x108] sm:$0xff]   ;;  %v6154_v47 = vld [vmem:[#allocation5 + $0x1c0] sm:$0xff]   ;;  %v6180_v40 = vld [vmem:[%s8615_s7 + $0x58] sm:$0xff]  }
 0x33f   : > { %v2914_v41 = vsel %vm904_vm0, %v2906_v25, %v8740_v26  ;;  %v2880_v18 = vrot.slane %v7989_v0, 4  ;;  %v2894_v9 = vrot.slane %v8029_v21, 5  ;;  %v8742_v2 = vrot.slane %v7922_v6, 3  ;;  %v6151_v57 = vld [vmem:[#allocation5 + $0x188] sm:$0xff]   ;;  %v6153_v61 = vld [vmem:[#allocation5 + $0x100] sm:$0xff]   ;;  %v6185_v26 = vld [vmem:[%s8615_s7 + $0x10] sm:$0xff]  }
 0x340   : > { %3761 = vmatprep.mubr.bf16.mxu1 %v3021_v62  ;;  %5551 = vmatpush3.bf16.msra.mxu0 %v6129_v32  ;;  %v8152_v43 = vcombine.low %v2945_v44, %v2955_v10  ;;  %v2910_v44 = vsel %vm503_vm1, %v2774_v34, %v2790_v1  ;;  %v6145_v34 = vld [vmem:[#allocation5 + $0x110] sm:$0xff]   ;;  %v2876_v7 = vrot.slane %v7922_v6, 4  ;;  %v2922_v54 = vsel %vm922_vm2, %v2914_v41, %v2874_v20  ;;  %v6162_v10 = vld [vmem:[#allocation5 + $0x208] sm:$0xff]   ;;  %v6176_v25 = vld [vmem:[%s8615_s7 + $0x60] sm:$0xff]  }
 0x341   : > { %5573 = vmatpush3.bf16.msra.mxu1 %v6131_v56  ;;  %5552 = vmatprep.subr.bf16.mxu0 %v6132_v19  ;;  %v2918_v1 = vsel %vm904_vm0, %v2910_v44, %v2806_v55  ;;  %v8741_v55 = vrot.slane %v7989_v0, 3  ;;  %v2916_v4 = vsel %vm904_vm0, %v2908_v50, %v8742_v2  ;;  %v2890_v59 = vrot.slane %v7940_v35, 5  ;;  %v6155_v19 = vld [vmem:[#allocation5 + $0x180] sm:$0xff]   ;;  %v6172_v44 = vld [vmem:[%s8615_s7 + $0x68] sm:$0xff]   ;;  %v6182_v50 = vld [vmem:[%s8615_s7 + $0xd8] sm:$0xff]  }
 0x342   : > { %5574 = vmatprep.subr.bf16.mxu1 %v6134_v8  ;;  %v3022_v48 = vpack.c.bf16 %v8152_v43, %v8149_v12  ;;  %v2926_v23 = vsel %vm922_vm2, %v2918_v1, %v2878_v58  ;;  %v2896_v21 = vrot.slane %v8012_v31, 5  ;;  %v2924_v33 = vsel %vm922_vm2, %v2916_v4, %v2876_v7  ;;  %v6156_v8 = vld [vmem:[#allocation5 + $0x238] sm:$0xff]   ;;  %v6168_v12 = vld [vmem:[%s8615_s7 + $0x70] sm:$0xff]   ;;  %v6179_v1 = vld [vmem:[%s8615_s7 + $0xa0] sm:$0xff]  }
 0x343   : > { %v2920_v39 = vsel %vm904_vm0, %v2912_v15, %v8741_v55  ;;  %v2934_v36 = vsel %vm940_vm3, %v2926_v23, %v2894_v9  ;;  %v2892_v6 = vrot.slane %v7927_v38, 5  ;;  %v2930_v32 = vsel %vm940_vm3, %v2922_v54, %v2890_v59  ;;  %v6169_v43 = vld [vmem:[%s8615_s7 + $0x30] sm:$0xff]   ;;  %v6178_v15 = vld [vmem:[%s8615_s7 + $0xe0] sm:$0xff]   ;;  %v6181_v58 = vld [vmem:[%s8615_s7 + $0x18] sm:$0xff]  }
 0x344   : > { %5553 = vmatpush3.bf16.msra.mxu0 %v6133_v11  ;;  %v2928_v0 = vsel %vm922_vm2, %v2920_v39, %v2880_v18  ;;  %v5163_v27 = vcombine.low %v8103_v63, %v8143_v51  ;;  %v5155_v38 = vcombine.low %v8015_v53, %v8002_v16  ;;  %v8743_v11 = vmov 0.0   ;;  %v6158_v63 = vld [vmem:[#allocation5 + $0x228] sm:$0xff]   ;;  %v6159_v16 = vld [vmem:[#allocation5 + $0x220] sm:$0xff]   ;;  %v6160_v53 = vld [vmem:[#allocation5 + $0x218] sm:$0xff]  }
 0x345   : > { %5575 = vmatpush3.bf16.msra.mxu1 %v6135_v17  ;;  %5554 = vmatprep.subr.bf16.mxu0 %v6136_v22  ;;  %v2936_v56 = vsel %vm940_vm3, %v2928_v0, %v2896_v21  ;;  %v2932_v31 = vsel %vm940_vm3, %v2924_v33, %v2892_v6  ;;  %v6157_v22 = vld [vmem:[#allocation5 + $0x230] sm:$0xff]   ;;  %vm6402_vm2 = vmmov 0   ;;  %v6188_v55 = vld [vmem:[%s8615_s7 + $0x48] sm:$0xff]   ;;  %v6192_v23 = vld [vmem:[%s8615_s7 + $0x40] sm:$0xff]  }
 0x346   : > { %5576 = vmatprep.subr.bf16.mxu1 %v6138_v60  ;;  %v5161_v35 = vcombine.low %v2934_v36, %v2936_v56  ;;  %v5153_v62 = vcombine.low %v2930_v32, %v2932_v31  ;;  %v3020_v17 = vpack.c.bf16 %v5163_v27, %v5155_v38  ;;  %v6161_v51 = vld [vmem:[#allocation5 + $0x210] sm:$0xff]   ;;  %v6163_v60 = vld [vmem:[#allocation5 + $0x200] sm:$0xff]   ;;  %v6190_v39 = vld [vmem:[%s8615_s7 + $0xc8] sm:$0xff]  }
 0x347   : > { %v6187_v41 = vld [vmem:[%s8615_s7 + $0x90] sm:$0xff]   ;;  %v6189_v20 = vld [vmem:[%s8615_s7 + $0x8] sm:$0xff]   ;;  %v6194_v9 = vld [vmem:[%s8615_s7 + $0xc0] sm:$0xff]  }
 0x348   : > { %5555 = vmatpush3.bf16.msra.mxu0 %v6137_v3  ;;  %v3018_v52 = vpack.c.bf16 %v5161_v35, %v5153_v62  ;;  %v6164_v3 = vld [vmem:[%s8615_s7 + $0x78] sm:$0xff]   ;;  %v6191_v18 = vld [vmem:[%s8615_s7 + $0x88] sm:$0xff]   ;;  %v6195_v2 = vld [vmem:[%s8615_s7 + $0x80] sm:$0xff]  }
 0x349   : > { %5577 = vmatpush3.bf16.msra.mxu1 %v6139_v37  ;;  %5556 = vmatprep.subr.bf16.mxu0 %v6140_v29  ;;  %v6165_v37 = vld [vmem:[%s8615_s7 + $0x38] sm:$0xff]   ;;  %v5165_v56 = vld [vmem:[%s8614_s6] ss:$0 sm:$0xff] }
 0x34a   : > { %5578 = vmatprep.subr.bf16.mxu1 %v6142_v14  ;;  %v6166_v29 = vld [vmem:[%s8615_s7 + $0xf8] sm:$0xff]  }
 0x34b   : > { %v6167_v14 = vld [vmem:[%s8615_s7 + $0xb8] sm:$0xff]  }
 0x34c   : > { %5557 = vmatpush3.bf16.msra.mxu0 %v6141_v28  ;;  %v6171_v28 = vld [vmem:[%s8615_s7 + $0xb0] sm:$0xff]   ;;  %v6196_v4 = vld [vmem:[%s8615_s7 + $0x178] sm:$0xff]  }
 0x34d   : > { %5579 = vmatpush3.bf16.msra.mxu1 %v6143_v45  ;;  %5558 = vmatprep.subr.bf16.mxu0 %v6144_v5  ;;  %v6173_v45 = vld [vmem:[%s8615_s7 + $0x28] sm:$0xff]   ;;  %v6198_v7 = vld [vmem:[%s8615_s7 + $0x1f8] sm:$0xff]  }
 0x34e   : > { %5580 = vmatprep.subr.bf16.mxu1 %v6146_v30  ;;  %v6174_v5 = vld [vmem:[%s8615_s7 + $0xe8] sm:$0xff]  }
 0x34f   : > { %v6175_v30 = vld [vmem:[%s8615_s7 + $0xa8] sm:$0xff]  }
 0x350   : > { %5559 = vmatpush3.bf16.msra.mxu0 %v6145_v34  ;;  %v6177_v34 = vld [vmem:[%s8615_s7 + $0x20] sm:$0xff]  }
 0x351   : > { %5581 = vmatpush3.bf16.msra.mxu1 %v6147_v42  ;;  %5560 = vmatprep.subr.bf16.mxu0 %v6148_v13  ;;  %v6183_v42 = vld [vmem:[%s8615_s7 + $0x98] sm:$0xff]   ;;  %v6184_v13 = vld [vmem:[%s8615_s7 + $0x50] sm:$0xff]  }
 0x352   : > { %5582 = vmatprep.subr.bf16.mxu1 %v6150_v24  ;;  %v6186_v24 = vld [vmem:[%s8615_s7 + $0xd0] sm:$0xff]  }
 0x354   : > { %5561 = vmatpush3.bf16.msra.mxu0 %v6149_v46  ;;  %v6193_v46 = vld [vmem:[%s8615_s7] sm:$0xff]  }
 0x355   : > { %5583 = vmatpush3.bf16.msra.mxu1 %v6151_v57  ;;  %5562 = vmatprep.subr.bf16.mxu0 %v6152_v49 }
 0x356   : > { %5584 = vmatprep.subr.bf16.mxu1 %v6154_v47 }
 0x358   : > { %5563 = vmatpush3.bf16.msra.mxu0 %v6153_v61 }
 0x359   : > { %5585 = vmatpush3.bf16.msra.mxu1 %v6155_v19  ;;  %5736 = vmatprep.subr.bf16.mxu0 %v8743_v11 }
 0x35a   : > { %5601 = vmatprep.subr.bf16.mxu1 %v6164_v3  ;;  %v3899_v3 = vlaneseq }
 0x35b   : > { %3721 = vmatmul.mubr.bf16.vlgmr.msra.gmra.mxu0 %v3018_v52 }
 0x35c   : > { %3762 = vmatmul.mubr.bf16.vlgmr.msra.gmra.mxu1 %v3020_v17  ;;  %5737 = vmatpush3.bf16.msra.mxu0 %v6156_v8 }
 0x35d   : > { %5738 = vmatprep.subr.bf16.mxu0 %v8743_v11  ;;  %5752 = vmatprep.mubr.msk.bf16.mxu0 %vm6402_vm2, %v8743_v11 }
 0x35e   : > { %5602 = vmatpush3.bf16.msra.mxu1 %v6165_v37 }
 0x35f   : > { %5603 = vmatprep.subr.bf16.mxu1 %v6168_v12  ;;  %v6403_v12 = vmov 1983009808  }
 0x360   : > { %5739 = vmatpush3.bf16.msra.mxu0 %v6157_v22 }
 0x361   : > { %5740 = vmatprep.subr.bf16.mxu0 %v8743_v11 }
 0x362   : > { %5604 = vmatpush3.bf16.msra.mxu1 %v6169_v43  ;;  %v3897_v43 = vunpack.c.l.s4 %v6403_v12 }
 0x363   : > { %5605 = vmatprep.subr.bf16.mxu1 %v6172_v44 }
 0x364   : > { %5741 = vmatpush3.bf16.msra.mxu0 %v6158_v63 }
 0x365   : > { %5742 = vmatprep.subr.bf16.mxu0 %v8743_v11 }
 0x366   : > { %5606 = vmatpush3.bf16.msra.mxu1 %v6173_v45 }
 0x367   : > { %5607 = vmatprep.subr.bf16.mxu1 %v6176_v25  ;;  %v3900_v25 = vshrl.u32 %v3899_v3, 7 }
 0x368   : > { %5743 = vmatpush3.bf16.msra.mxu0 %v6159_v16 }
 0x369   : > { %5744 = vmatprep.subr.bf16.mxu0 %v8743_v11 }
 0x36a   : > { %5608 = vmatpush3.bf16.msra.mxu1 %v6177_v34 }
 0x36b   : > { %5609 = vmatprep.subr.bf16.mxu1 %v6180_v40 }
 0x36c   : > { %5745 = vmatpush3.bf16.msra.mxu0 %v6160_v53 }
 0x36d   : > { %5746 = vmatprep.subr.bf16.mxu0 %v8743_v11 }
 0x36e   : > { %5610 = vmatpush3.bf16.msra.mxu1 %v6181_v58  ;;  %v8745_v58 = vld [vmem:[#allocation16_spill] sm:$0xff] }
 0x36f   : > { %5611 = vmatprep.subr.bf16.mxu1 %v6184_v13 }
 0x370   : > { %5747 = vmatpush3.bf16.msra.mxu0 %v6161_v51 }
 0x371   : > { %5748 = vmatprep.subr.bf16.mxu0 %v8743_v11 }
 0x372   : > { %5612 = vmatpush3.bf16.msra.mxu1 %v6185_v26 }
 0x373   : > { %5613 = vmatprep.subr.bf16.mxu1 %v6188_v55 }
 0x374   : > { %5749 = vmatpush3.bf16.msra.mxu0 %v6162_v10 }
 0x375   : > { %5750 = vmatprep.subr.bf16.mxu0 %v8743_v11 }
 0x376   : > { %5614 = vmatpush3.bf16.msra.mxu1 %v6189_v20 }
 0x377   : > { %5615 = vmatprep.subr.bf16.mxu1 %v6192_v23 }
 0x378   : > { %5751 = vmatpush3.bf16.msra.mxu0 %v6163_v60 }
 0x379   : > { %5623 = vmatprep.subr.bf16.mxu0 %v6166_v29 }
 0x37a   : > { %5616 = vmatpush3.bf16.msra.mxu1 %v6193_v46 }
 0x37b   : > { %5753 = vmatmul.mubr.bf16.vlgmr.msra.gmra.mxu0 %v3022_v48  ;;  %v6170_v48 = vld [vmem:[%s8615_s7 + $0xf0] sm:$0xff]   ;;  %5645 = vmatprep.subr.bf16.mxu1 %v6196_v4 }
 0x37c   : > { %5624 = vmatpush3.bf16.msra.mxu0 %v6167_v14 }
 0x37d   : > { %5625 = vmatprep.subr.bf16.mxu0 %v6170_v48 }
 0x380   : > { %5626 = vmatpush3.bf16.msra.mxu0 %v6171_v28 }
 0x381   : > { %5627 = vmatprep.subr.bf16.mxu0 %v6174_v5 }
 0x384   : > { %5628 = vmatpush3.bf16.msra.mxu0 %v6175_v30  ;;  %v3898_v30 = vunpack.c.0.s8 %v3897_v43 }
 0x385   : > { %5629 = vmatprep.subr.bf16.mxu0 %v6178_v15 }
 0x386   : > { %v8336_v55 = vsub.s32 %v3898_v30, %v3900_v25 }
 0x388   : > { %5630 = vmatpush3.bf16.msra.mxu0 %v6179_v1 }
 0x389   : > { %5631 = vmatprep.subr.bf16.mxu0 %v6182_v50  ;;  %v8744_v50 = vld [vmem:[#allocation15_spill] sm:$0xff] }
 0x38c   : > { %5632 = vmatpush3.bf16.msra.mxu0 %v6183_v42  ;;  %v3894_v42 = vcombine.low %v8745_v58, %v8744_v50 }
 0x38d   : > { %5633 = vmatprep.subr.bf16.mxu0 %v6186_v24 }
 0x390   : > { %5634 = vmatpush3.bf16.msra.mxu0 %v6187_v41 }
 0x391   : > { %5635 = vmatprep.subr.bf16.mxu0 %v6190_v39 }
 0x394   : > { %5636 = vmatpush3.bf16.msra.mxu0 %v6191_v18 }
 0x395   : > { %5637 = vmatprep.subr.bf16.mxu0 %v6194_v9  ;;  %v3902_v9 = vrot.slane %v3894_v42, %v8336_v55 }
 0x398   : > { %5638 = vmatpush3.bf16.msra.mxu0 %v6195_v2 }
 0x399   : > { %5667 = vmatprep.subr.bf16.mxu0 %v6198_v7  ;;  %v3881_v7 = vrot.slane %v8745_v58, 1 }
 0x3fb   : > { %v5520_v57 = vpop.f32.mrf.mxu0  ;;  %v5542_v49 = vpop.f32.mrf.mxu1 }
 0x3fd   : > { %v5521_v54 = vpop.f32.mrf.mxu0  ;;  %v5543_v0 = vpop.f32.mrf.mxu1 }
 0x3fe   : > { %v5522_v32 = vadd.f32 %v5521_v54, %v5520_v57  ;;  %v5544_v27 = vadd.f32 %v5543_v0, %v5542_v49 }
 0x3ff   : > { %v5523_v59 = vpop.f32.mrf.mxu0  ;;  %v5545_v21 = vpop.f32.mrf.mxu1 }
 0x400   : > { %v3641_v31 = vadd.f32 %v5522_v32, %v5165_v56 }
 0x401   : > { %v5524_v47 = vpop.f32.mrf.mxu0  ;;  %v5546_v33 = vpop.f32.mrf.mxu1 }
 0x402   : > { %v5525_v62 = vadd.f32 %v5524_v47, %v5523_v59  ;;  %v3682_v17 = vadd.f32 %v5544_v27, %v3641_v31  ;;  %v5547_v63 = vadd.f32 %v5546_v33, %v5545_v21 }
 0x404   : > { %v3644_v22 = vadd.f32 %v5525_v62, %v5165_v56 }
 0x406   : > { %v3685_v60 = vadd.f32 %v5547_v63, %v3644_v22 }
 0x41b   : > { %v5564_v36 = vpop.f32.mrf.mxu0 }
 0x41c   : > { %v5586_v6 = vpop.f32.mrf.mxu1 }
 0x41d   : > { %v5565_v61 = vpop.f32.mrf.mxu0 }
 0x41e   : > { %v5587_v19 = vpop.f32.mrf.mxu1  ;;  %v5566_v38 = vadd.f32 %v5565_v61, %v5564_v36 }
 0x41f   : > { %v5567_v35 = vpop.f32.mrf.mxu0  ;;  %v5588_v53 = vadd.f32 %v5587_v19, %v5586_v6 }
 0x420   : > { %v5589_v8 = vpop.f32.mrf.mxu1  ;;  %v3723_v16 = vadd.f32 %v5566_v38, %v3682_v17 }
 0x421   : > { %v5568_v52 = vpop.f32.mrf.mxu0 }
 0x422   : > { %v5569_v51 = vadd.f32 %v5568_v52, %v5567_v35  ;;  %v5590_v10 = vpop.f32.mrf.mxu1  ;;  %v3764_v14 = vadd.f32 %v5588_v53, %v3723_v16 }
 0x423   : > { %v5591_v29 = vadd.f32 %v5590_v10, %v5589_v8 }
 0x424   : > { %v3726_v37 = vadd.f32 %v5569_v51, %v3685_v60 }
 0x426   : > { %v3767_v5 = vadd.f32 %v5591_v29, %v3726_v37 }
 0x43b   : > { %v3804_v48 = vpop.f32.mrf.mxu0 }
 0x43c   : > { %v3805_v28 = vadd.f32 %v3804_v48, %v3764_v14 }
 0x43d   : > { %v5754_v44 = vpop.f32.mrf.mxu0 }
 0x43e   : > { %v3811_v45 = vmax.f32 %v3805_v28, 0.0 }
 0x43f   : > { %v3807_v15 = vpop.f32.mrf.mxu0 }
 0x440   : > { %v3815_v34 = vcombine.high %v3811_v45, %v3811_v45  ;;  %3817 = vst [vmem:[%s8330_s30] sm:$0xff] %v3811_v45  ;;  %v3819_v1 = vrot.slane %v3811_v45, 7  ;;  %v3808_v40 = vadd.f32 %v3807_v15, %v3767_v5 }
 0x441   : > { %v5755_v13 = vpop.f32.mrf.mxu0 }
 0x442   : > { %v3820_v24 = vrot.slane %v3815_v34, 7  ;;  %v3827_v26 = vsel %vm503_vm1, 0.0, %v3819_v1  ;;  %v3812_v41 = vmax.f32 %v3808_v40, 0.0 }
 0x443   : > { %v3831_v39 = vsel %vm958_vm4, %v3827_v26, 0.0 }
 0x444   : > { %v3828_v20 = vsel %vm503_vm1, 0.0, %v3820_v24  ;;  %v3839_v18 = vrot.slane %v3831_v39, 1  ;;  %v3847_v23 = vrot.slane %v3831_v39, 2  ;;  %3818 = vst [vmem:[%s8330_s30 + $0x8] sm:$0xff] %v3812_v41  ;;  %v3816_v2 = vcombine.high %v3812_v41, %v3812_v41  ;;  %s6294_s30 = scalar_lea.vmem %s6293_s22, 512 }
 0x445   : > { %v3832_v46 = vsel %vm958_vm4, %v3828_v20, 0.0  ;;  %v3821_v4 = vrot.slane %v3812_v41, 7  ;;  %v3863_v59 = vrot.slane %v3831_v39, 3  ;;  %v6197_v20 = vld [vmem:[%s8615_s7 + $0x138] sm:$0xff]   ;;  %p6296_p0 = scmp.lt.s32.totalorder %s6294_s30, %s6288_s0 }
 0x446   : > { %v3840_v57 = vrot.slane %v3832_v46, 1  ;;  %v3848_v49 = vrot.slane %v3832_v46, 2  ;;  %v3855_v54 = vsel %vm503_vm1, %v3831_v39, %v3839_v18  ;;  %v3864_v0 = vrot.slane %v3832_v46, 3 }
 0x447   : > { %v3822_v21 = vrot.slane %v3816_v2, 7  ;;  %v3829_v47 = vsel %vm503_vm1, 0.0, %v3821_v4  ;;  %v3859_v36 = vsel %vm904_vm0, %v3855_v54, %v3847_v23  ;;  %v3871_v32 = vsel %vm503_vm1, %v3839_v18, %v3847_v23  ;;  %p6297_p1 = por %p6296_p0, %p6295_p11 }
 0x448   : > { %v3856_v33 = vsel %vm503_vm1, %v3832_v46, %v3840_v57  ;;  %v3833_v6 = vsel %vm958_vm4, %v3829_v47, 0.0  ;;  %v3872_v61 = vsel %vm503_vm1, %v3840_v57, %v3848_v49  ;;  %v3895_v31 = vcombine.low %v3881_v7, %v3859_v36  ;;  %v6200_v46 = vld [vmem:[%s8615_s7 + $0x170] sm:$0xff]   ;;  %v6199_v7 = vld [vmem:[%s8615_s7 + $0x1b8] sm:$0xff]  }
 0x449   : > { %v3830_v56 = vsel %vm503_vm1, 0.0, %v3822_v21  ;;  %v3841_v19 = vrot.slane %v3833_v6, 1  ;;  %v3849_v35 = vrot.slane %v3833_v6, 2  ;;  %v3865_v62 = vrot.slane %v3833_v6, 3  ;;  %v6201_v21 = vld [vmem:[%s8615_s7 + $0x130] sm:$0xff]   ;;  %p6298_p3 = pnand %p6297_p1, %p6291_p8 }
 0x44a   : > { %v3834_v27 = vsel %vm958_vm4, %v3830_v56, 0.0  ;;  %v8354_v38 = vsel %vm904_vm0, %v3856_v33, %v3848_v49  ;;  %v3876_v8 = vsel %vm904_vm0, %v3872_v61, %v3864_v0  ;;  %v3875_v3 = vsel %vm904_vm0, %v3871_v32, %v3863_v59  ;;  %v6202_v0 = vld [vmem:[%s8615_s7 + $0x1f0] sm:$0xff]   ;;  %v6205_v61 = vld [vmem:[%s8615_s7 + $0x128] sm:$0xff]   ;;  %v6208_v32 = vld [vmem:[%s8615_s7 + $0x160] sm:$0xff]  }
 0x44b   : > { %v3842_v52 = vrot.slane %v3834_v27, 1  ;;  %v3850_v17 = vrot.slane %v3834_v27, 2  ;;  %v3857_v22 = vsel %vm503_vm1, %v3833_v6, %v3841_v19  ;;  %v3866_v63 = vrot.slane %v3834_v27, 3  ;;  %v6203_v33 = vld [vmem:[%s8615_s7 + $0x1b0] sm:$0xff]   ;;  %v6206_v6 = vld [vmem:[%s8615_s7 + $0x1e8] sm:$0xff]  }
 0x44c   : > { %v3912_v16 = vcombine.low %v8354_v38, %v3876_v8  ;;  %v3861_v53 = vsel %vm904_vm0, %v3857_v22, %v3849_v35  ;;  %v3882_v51 = vrot.slane %v8354_v38, 1  ;;  %v3873_v10 = vsel %vm503_vm1, %v3841_v19, %v3849_v35  ;;  %v6207_v56 = vld [vmem:[%s8615_s7 + $0x1a8] sm:$0xff]   ;;  %v6210_v19 = vld [vmem:[%s8615_s7 + $0x1e0] sm:$0xff]   ;;  %v6213_v8 = vld [vmem:[%s8615_s7 + $0x118] sm:$0xff]  }
 0x44d   : > { %v3858_v60 = vsel %vm503_vm1, %v3834_v27, %v3842_v52  ;;  %v3885_v37 = vrot.slane %v3859_v36, 1  ;;  %v3886_v12 = vrot.slane %v3861_v53, 1  ;;  %v3909_v48 = vrot.slane %v3895_v31, %v8336_v55  ;;  %v6204_v36 = vld [vmem:[%s8615_s7 + $0x168] sm:$0xff]   ;;  %v6209_v35 = vld [vmem:[%s8615_s7 + $0x120] sm:$0xff]   ;;  %v6212_v31 = vld [vmem:[%s8615_s7 + $0x158] sm:$0xff]  }
 0x44e   : > { %v3926_v29 = vrot.slane %v3912_v16, %v8336_v55  ;;  %v3935_v14 = vcombine.low %v3882_v51, %v3861_v53  ;;  %v8368_v43 = vsel %vm904_vm0, %v3858_v60, %v3850_v17  ;;  %v3877_v28 = vsel %vm904_vm0, %v3873_v10, %v3865_v62  ;;  %v6211_v27 = vld [vmem:[%s8615_s7 + $0x1a0] sm:$0xff]   ;;  %v6214_v62 = vld [vmem:[%s8615_s7 + $0x1d8] sm:$0xff]   ;;  %v6218_v22 = vld [vmem:[%s8615_s7 + $0x1d0] sm:$0xff]  }
 0x44f   : > { %v3911_v44 = vcombine.low %v3875_v3, %v3885_v37  ;;  %v3874_v45 = vsel %vm503_vm1, %v3842_v52, %v3850_v17  ;;  %v3944_v25 = vcombine.low %v3877_v28, %v3886_v12  ;;  %v6216_v52 = vld [vmem:[%s8615_s7 + $0x150] sm:$0xff]   ;;  %v6215_v17 = vld [vmem:[%s8615_s7 + $0x198] sm:$0xff]   ;;  %v6220_v16 = vld [vmem:[%s8615_s7 + $0x148] sm:$0xff]  }
 0x450   : > { %v5238_v5 = vcombine.low %v3902_v9, %v3926_v29  ;;  %v3942_v30 = vrot.slane %v3935_v14, %v8336_v55  ;;  %v3878_v15 = vsel %vm904_vm0, %v3874_v45, %v3866_v63  ;;  %v6217_v63 = vld [vmem:[%s8615_s7 + $0x110] sm:$0xff]   ;;  %v6222_v10 = vld [vmem:[%s8615_s7 + $0x1c8] sm:$0xff]   ;;  %v6224_v3 = vld [vmem:[%s8615_s7 + $0x140] sm:$0xff]  }
 0x451   : > { %v3945_v34 = vcombine.low %v8368_v43, %v3878_v15  ;;  %v3919_v50 = vrot.slane %v3911_v44, %v8336_v55  ;;  %v3952_v58 = vrot.slane %v3944_v25, %v8336_v55  ;;  %v6219_v53 = vld [vmem:[%s8615_s7 + $0x190] sm:$0xff]   ;;  %v6221_v60 = vld [vmem:[%s8615_s7 + $0x108] sm:$0xff]   ;;  %v6225_v14 = vld [vmem:[%s8615_s7 + $0x100] sm:$0xff]   ;;  %v3888_v15 = vrot.slane %v8368_v43, 1 }
 0x452   : > { %v3976_v1 = vrot.slane %v5238_v5, %v8336_v55  ;;  %v5239_v40 = vcombine.low %v3909_v48, %v3942_v30  ;;  %v6223_v37 = vld [vmem:[%s8615_s7 + $0x188] sm:$0xff]   ;;  %v6227_v12 = vld [vmem:[%s8615_s7 + $0x180] sm:$0xff]   ;;  %v6228_v48 = vld [vmem:[%s8615_s7 + $0x238] sm:$0xff]  }
 0x453   : > { %v3959_v42 = vrot.slane %v3945_v34, %v8336_v55  ;;  %v5240_v26 = vcombine.low %v3919_v50, %v3952_v58  ;;  %v6229_v45 = vld [vmem:[%s8615_s7 + $0x230] sm:$0xff]   ;;  %v6230_v5 = vld [vmem:[%s8615_s7 + $0x228] sm:$0xff]   ;;  %v6231_v30 = vld [vmem:[%s8615_s7 + $0x220] sm:$0xff]  }
 0x454   : > { %v3984_v13 = vcombine.high %v3976_v1, %v3976_v1  ;;  %v3983_v24 = vrot.slane %v5239_v40, %v8336_v55  ;;  %v4021_v9 = vpack.c.bf16 %v3976_v1, %v3976_v1  ;;  %v6232_v25 = vld [vmem:[%s8615_s7 + $0x218] sm:$0xff]   ;;  %v6233_v34 = vld [vmem:[%s8615_s7 + $0x210] sm:$0xff]   ;;  %v3967_v1 = vrot.slane %v3888_v15, %v8336_v55  ;;  %v6234_v43 = vld [vmem:[%s8615_s7 + $0x208] sm:$0xff]  }
 0x455   : > { %v5241_v41 = vcombine.low %v3926_v29, %v3959_v42  ;;  %v8385_v23 = vrot.slane %v5240_v26, %v8336_v55  ;;  %v6226_v29 = vld [vmem:[%s8615_s7 + $0x1c0] sm:$0xff]   ;;  %v3934_v40 = vrot.slane %v3882_v51, %v8336_v55 }
 0x456   : > { %v4022_v39 = vpack.c.bf16 %v3984_v13, %v3984_v13  ;;  %v3985_v18 = vcombine.high %v3983_v24, %v3983_v24  ;;  %v4023_v49 = vpack.c.bf16 %v3983_v24, %v3983_v24  ;;  %v6235_v58 = vld [vmem:[%s8615_s7 + $0x200] sm:$0xff]  }
 0x457   : > { %v8391_v2 = vrot.slane %v5241_v41, %v8336_v55  ;;  %v4002_v57 = vcombine.high %v8385_v23, %v8385_v23  ;;  %v4025_v28 = vpack.c.bf16 %v8385_v23, %v8385_v23  ;;  %v4004_v50 = vcombine.low %v3934_v40, %v3967_v1 }
 0x458   : > { %4645 = vmatprep.mubr.bf16.mxu1 %v4022_v39  ;;  %v4024_v4 = vpack.c.bf16 %v3985_v18, %v3985_v18 }
 0x459   : > { %4646 = vmatmul.mubr.bf16.vlgmr.msra.gmra.mxu1 %v4021_v9  ;;  %v4003_v54 = vcombine.high %v8391_v2, %v8391_v2  ;;  %v4026_v59 = vpack.c.bf16 %v4002_v57, %v4002_v57  ;;  %v4027_v44 = vpack.c.bf16 %v8391_v2, %v8391_v2  ;;  %v4011_v38 = vrot.slane %v4004_v50, %v8336_v55 }
 0x45a   : > { %5646 = vmatpush3.bf16.msra.mxu1 %v6197_v20  ;;  %4685 = vmatprep.mubr.bf16.mxu0 %v4024_v4 }
 0x45b   : > { %4686 = vmatmul.mubr.bf16.vlgmr.msra.gmra.mxu0 %v4023_v49  ;;  %5647 = vmatprep.subr.bf16.mxu1 %v6200_v46  ;;  %v4028_v47 = vpack.c.bf16 %v4003_v54, %v4003_v54  ;;  %v4029_v51 = vpack.c.bf16 %v4011_v38, %v4011_v38 }
 0x45c   : > { %5668 = vmatpush3.bf16.msra.mxu0 %v6199_v7  ;;  %4725 = vmatprep.mubr.bf16.mxu1 %v4026_v59 }
 0x45d   : > { %4765 = vmatprep.mubr.bf16.mxu0 %v4028_v47  ;;  %5669 = vmatprep.subr.bf16.mxu0 %v6202_v0 }
 0x45e   : > { %5648 = vmatpush3.bf16.msra.mxu1 %v6201_v21 }
 0x45f   : > { %5649 = vmatprep.subr.bf16.mxu1 %v6204_v36 }
 0x460   : > { %5670 = vmatpush3.bf16.msra.mxu0 %v6203_v33 }
 0x461   : > { %5671 = vmatprep.subr.bf16.mxu0 %v6206_v6 }
 0x462   : > { %5650 = vmatpush3.bf16.msra.mxu1 %v6205_v61 }
 0x463   : > { %5651 = vmatprep.subr.bf16.mxu1 %v6208_v32 }
 0x464   : > { %5672 = vmatpush3.bf16.msra.mxu0 %v6207_v56 }
 0x465   : > { %5673 = vmatprep.subr.bf16.mxu0 %v6210_v19 }
 0x466   : > { %5652 = vmatpush3.bf16.msra.mxu1 %v6209_v35 }
 0x467   : > { %5653 = vmatprep.subr.bf16.mxu1 %v6212_v31 }
 0x468   : > { %5674 = vmatpush3.bf16.msra.mxu0 %v6211_v27 }
 0x469   : > { %5675 = vmatprep.subr.bf16.mxu0 %v6214_v62 }
 0x46a   : > { %5654 = vmatpush3.bf16.msra.mxu1 %v6213_v8 }
 0x46b   : > { %5655 = vmatprep.subr.bf16.mxu1 %v6216_v52 }
 0x46c   : > { %5676 = vmatpush3.bf16.msra.mxu0 %v6215_v17 }
 0x46d   : > { %5677 = vmatprep.subr.bf16.mxu0 %v6218_v22 }
 0x46e   : > { %5656 = vmatpush3.bf16.msra.mxu1 %v6217_v63 }
 0x46f   : > { %5657 = vmatprep.subr.bf16.mxu1 %v6220_v16 }
 0x470   : > { %5678 = vmatpush3.bf16.msra.mxu0 %v6219_v53 }
 0x471   : > { %5679 = vmatprep.subr.bf16.mxu0 %v6222_v10 }
 0x472   : > { %5658 = vmatpush3.bf16.msra.mxu1 %v6221_v60 }
 0x473   : > { %5659 = vmatprep.subr.bf16.mxu1 %v6224_v3 }
 0x474   : > { %5680 = vmatpush3.bf16.msra.mxu0 %v6223_v37 }
 0x475   : > { %5681 = vmatprep.subr.bf16.mxu0 %v6226_v29 }
 0x476   : > { %5660 = vmatpush3.bf16.msra.mxu1 %v6225_v14 }
 0x477   : > { %5756 = vmatprep.subr.bf16.mxu1 %v8743_v11 }
 0x478   : > { %5682 = vmatpush3.bf16.msra.mxu0 %v6227_v12 }
 0x479   : > { %4726 = vmatmul.mubr.bf16.vlgmr.msra.gmra.mxu1 %v4025_v28 }
 0x47a   : > { %5757 = vmatpush3.bf16.msra.mxu1 %v6228_v48  ;;  %5772 = vmatprep.mubr.msk.bf16.mxu1 %vm6402_vm2, %v8743_v11 }
 0x47b   : > { %4766 = vmatmul.mubr.bf16.vlgmr.msra.gmra.mxu0 %v4027_v44  ;;  %5758 = vmatprep.subr.bf16.mxu1 %v8743_v11 }
 0x47e   : > { %5759 = vmatpush3.bf16.msra.mxu1 %v6229_v45 }
 0x47f   : > { %5760 = vmatprep.subr.bf16.mxu1 %v8743_v11 }
 0x482   : > { %5761 = vmatpush3.bf16.msra.mxu1 %v6230_v5 }
 0x483   : > { %5762 = vmatprep.subr.bf16.mxu1 %v8743_v11 }
 0x486   : > { %5763 = vmatpush3.bf16.msra.mxu1 %v6231_v30 }
 0x487   : > { %5764 = vmatprep.subr.bf16.mxu1 %v8743_v11 }
 0x48a   : > { %5765 = vmatpush3.bf16.msra.mxu1 %v6232_v25 }
 0x48b   : > { %5766 = vmatprep.subr.bf16.mxu1 %v8743_v11 }
 0x48e   : > { %5767 = vmatpush3.bf16.msra.mxu1 %v6233_v34 }
 0x48f   : > { %5768 = vmatprep.subr.bf16.mxu1 %v8743_v11 }
 0x492   : > { %5769 = vmatpush3.bf16.msra.mxu1 %v6234_v43 }
 0x493   : > { %5770 = vmatprep.subr.bf16.mxu1 %v8743_v11 }
 0x496   : > { %5771 = vmatpush3.bf16.msra.mxu1 %v6235_v58 }
 0x499   : > { %5773 = vmatmul.mubr.bf16.vlgmr.msra.gmra.mxu1 %v4029_v51 }
 0x49a   : > { %6301 = shalt.err (!%p6298_p3)
}
 0x49b   : > { %s6302_s25 = scalar_lea.hbm %s8532_s14, 256  ;;  %s6306_s16 = scalar_lea.hbm %s8618_s10, 512 }
 0x49c   : > { %p6303_p2 = scmp.ne.s32.totalorder %s8532_s14, %s6302_s25  ;;  %p6307_p7 = scmp.lt.s32.totalorder %s8532_s14, %s8618_s10 }
 0x49d   : > { %p6308_p6 = scmp.lt.s32.totalorder %s6306_s16, %s6302_s25 }
 0x49e   : > { %p6304_p4 = pnand %p6303_p2, %p6505_p5 }
 0x49f   : > { %p6309_p9 = por %p6308_p6, %p6307_p7 }
 0x4a0   : > { %p6305_p13 = pneg %p6304_p4 }
 0x4a2   : > { %p6310_p10 = pnand %p6309_p9, %p6305_p13 }
 0x4a4   : > { %6313 = shalt.err (!%p6310_p10)
}
 0x4a5   : > { %s6405_s0 = smov 128   ;;  %s8746_s22 = smov 8   ;;  %v5242_v49 = vld [vmem:[%s8616_s8] ss:$0 sm:$0xff] }
 0x4a6   : > { %s8747_s30 = scalar_lea.sflag [#allocation4], %s8327_s24  ;;  %s5005_s26 = sshll.u32 %s8327_s24, 2 }
 0x4a7   : > { %5785 = dma.vmem_to_hbm [thread:$0]  (%p6505_p5), %s8526_s29, 256, %s8532_s14, %s8747_s30, %s6405_s0, %s6405_s0, %s8746_s22  }
 0x4a8   : > { %s5319_s25 = sshll.u32 %s6488_s21, 6  ;;  %s427_s12 = scalar_lea.vmem [#allocation8], %s5005_s26 }
 0x4a9   : > { %s4858_s13 = sshll.u32 %s427_s12, 4  ;;  %s8566_s0 = scalar_lea.hbm %s8619_s11, %s5319_s25  ;;  %s8568_s13 = int_to_ptr.vmem [resolvable:$true] %s4858_s13 }
 0x4aa   : > { %s4826_s22 = scalar_lea.sflag [#allocation9], %s8327_s24  ;;  %s6314_s21 = scalar_lea.vmem %s8568_s13, 64 }
 0x4ab   : > { %p6315_p12 = scmp.ne.s32.totalorder %s8568_s13, %s6314_s21  ;;  %s6406_s30 = smov [#allocation8]  }
 0x4ac   : > { %s6318_s29 = sshll.u32 %s6406_s30, 4  ;;  %s6319_s29 = int_to_ptr.vmem [resolvable:$false] %s6318_s29 }
 0x4ad   : > { %p6316_p8 = pnand %p6315_p12, %p6505_p5  ;;  %s6320_s14 = scalar_lea.vmem %s6319_s29, 128 }
 0x4ae   : > { %p6321_p0 = scmp.lt.s32.totalorder %s8568_s13, %s6319_s29  ;;  %p6322_p1 = scmp.lt.s32.totalorder %s6320_s14, %s6314_s21 }
 0x4af   : > { %p6317_p11 = pneg %p6316_p8 }
 0x4b0   : > { %p6323_p3 = por %p6322_p1, %p6321_p0 }
 0x4b2   : > { %p6324_p2 = pnand %p6323_p3, %p6317_p11 }
 0x519   : > { %v5617_v11 = vpop.f32.mrf.mxu1 }
 0x51b   : > { %v5618_v55 = vpop.f32.mrf.mxu1  ;;  %v5639_v42 = vpop.f32.mrf.mxu0 }
 0x51c   : > { %v5619_v57 = vadd.f32 %v5618_v55, %v5617_v11 }
 0x51d   : > { %v5620_v13 = vpop.f32.mrf.mxu1  ;;  %v5640_v24 = vpop.f32.mrf.mxu0 }
 0x51e   : > { %v4648_v54 = vadd.f32 %v5619_v57, %v5242_v49  ;;  %v5641_v0 = vadd.f32 %v5640_v24, %v5639_v42 }
 0x51f   : > { %v5621_v26 = vpop.f32.mrf.mxu1  ;;  %v5642_v41 = vpop.f32.mrf.mxu0 }
 0x520   : > { %v4688_v21 = vadd.f32 %v5641_v0, %v4648_v54 }
 0x521   : > { %v5643_v39 = vpop.f32.mrf.mxu0 }
 0x539   : > { %v5661_v20 = vpop.f32.mrf.mxu1 }
 0x53b   : > { %v5662_v18 = vpop.f32.mrf.mxu1  ;;  %v5683_v23 = vpop.f32.mrf.mxu0 }
 0x53c   : > { %v5663_v59 = vadd.f32 %v5662_v18, %v5661_v20 }
 0x53d   : > { %v5664_v9 = vpop.f32.mrf.mxu1  ;;  %v5684_v46 = vpop.f32.mrf.mxu0 }
 0x53e   : > { %v4728_v47 = vadd.f32 %v5663_v59, %v4688_v21  ;;  %v5685_v36 = vadd.f32 %v5684_v46, %v5683_v23 }
 0x53f   : > { %v5665_v2 = vpop.f32.mrf.mxu1  ;;  %v5686_v4 = vpop.f32.mrf.mxu0 }
 0x540   : > { %v4768_v33 = vadd.f32 %v5685_v36, %v4728_v47 }
 0x541   : > { %v5687_v7 = vpop.f32.mrf.mxu0 }
 0x559   : > { %v4807_v6 = vpop.f32.mrf.mxu1 }
 0x55a   : > { %v4808_v61 = vadd.f32 %v4807_v6, %v4768_v33 }
 0x55b   : > { %v5774_v32 = vpop.f32.mrf.mxu1 }
 0x55c   : > { %v4813_v56 = vmax.f32 %v4808_v61, 0.0 }
 0x55d   : > { %v4810_v19 = vpop.f32.mrf.mxu1 }
 0x55e   : > { %4814 = vst [vmem:[%s427_s12] sm:$0xf] %v4813_v56 }
 0x55f   : > { %v5775_v35 = vpop.f32.mrf.mxu1 }
 0x560   : > { %6327 = shalt.err (!%p6324_p2)
}
 0x561   : > { %s6328_s26 = scalar_lea.hbm %s8566_s0, 64  ;;  %s6332_s12 = scalar_lea.hbm %s8619_s11, 128 }
 0x562   : > { %p6329_p4 = scmp.ne.s32.totalorder %s8566_s0, %s6328_s26  ;;  %p6333_p6 = scmp.lt.s32.totalorder %s8566_s0, %s8619_s11 }
 0x563   : > { %p6334_p9 = scmp.lt.s32.totalorder %s6332_s12, %s6328_s26 }
 0x564   : > { %p6330_p13 = pnand %p6329_p4, %p6505_p5 }
 0x565   : > { %p6335_p10 = por %p6334_p9, %p6333_p6 }
 0x566   : > { %p6331_p7 = pneg %p6330_p13 }
 0x568   : > { %p6336_p12 = pnand %p6335_p10, %p6331_p7 }
 0x56a   : > { %6339 = shalt.err (!%p6336_p12)
}
 0x56b   : > { %5786 = dma.vmem_to_hbm [thread:$0]  (%p6505_p5), %s8568_s13, 64, %s8566_s0, %s4826_s22  }
 0x56c PF: > { %p5807_p8 = scmp.ge.s32.totalorder %s6386_s20, 2  ;;  %s4878_s21 = sand.u32 1, %s6374_s17  }
 0x56d   : > { %p8748_p11 = scmp.ne.s32.totalorder %s8669_s28, 0  ;;  %s4879_s30 = scalar_lea.sflag [#allocation4], %s4878_s21 }
 0x56f   : > { %p5797_p0 = pnand %p5807_p8, %p8748_p11 }
 0x571   : > { %p5798_p1 = pneg %p5797_p0 }
 0x573   : > { %6365 = dma.done.wait (%p5798_p1), %s4879_s30, 256  }
 0x574   : > { %6367 = vsyncadd (%p5798_p1), %s4879_s30, 4294967040  ;;  %s4888_s29 = scalar_lea.sflag [#allocation9], %s4878_s21 }
 0x575   : > { %6369 = dma.done.wait (%p5798_p1), %s4888_s29, 64  }
 0x576   : > { %6371 = vsyncadd (%p5798_p1), %s4888_s29, 4294967232  ;;  %s8749_s27 = sld [smem:[#allocation14_spill]]  ;;  %p27_p5 = scmp.ge.s32.totalorder %s6492_s23, 4  }
 0x577   : > { %s8750_s17 = smov %s6378_s18  ;;  %s8751_s18 = smov %s6382_s19 }
 0x578   : > { %s8753_s20 = smov %s6492_s23  ;;  %29 = sbr.rel (!%p27_p5) target bundleno = 9 (0x9), region = 129 }
 0x57c   : > { %s8752_s19 = smov %s8749_s27 }
 0x57d   :  { %4893 = vsyncpa [#allocation3], 1 }
 0x57e   :  { %4895 = vsyncpa [#allocation3 + $0x1], 1 }
 0x57f   :  { %4896 = vsyncpa [#allocation6], 1 }
 0x580   :  { %4897 = vsyncpa [#allocation4], 1 }
 0x581   :  { %4899 = vsyncpa [#allocation4 + $0x1], 1 }
 0x582   :  { %4900 = vsyncpa [#allocation9], 1 }
 0x583   :  { %4902 = vsyncpa [#allocation9 + $0x1], 1 }

</bundles_post_ra>
